<compile_context>
chip_gen: v5e
topology: v5e:2x2
jax: 0.10.0
libtpu: 0.0.40
codegen_flags: <defaults>
</compile_context>

<pallas_src>
import functools

import jax
import jax.numpy as jnp
from jax.experimental import pallas as pl
from jax.experimental.pallas import tpu as pltpu

EPS = 1e-5


# ----------------------------------------------------------------------------
# Kernel 1: fused stem + full residual (EulerStep) stack.
#   grid = (n_layers,); activation resident in padded VMEM scratch.
# ----------------------------------------------------------------------------
def _fused_stem_residual_kernel(
        patches_ref, stem_w_ref, stem_s_ref, stem_t_ref,
        w1_ref, b1_ref, s1_ref, t1_ref,
        w2_ref, b2_ref, s2_ref, t2_ref,
        o_ref, xp_scr, hp_scr,
        *, N, H, W, C, n_layers):
    l = pl.program_id(0)
    M = N * H * W
    inv_depth = 1.0 / float(n_layers)

    @pl.when(l == 0)
    def _stem():
        # Zero both padded scratches ONCE; the border stays zero for the whole
        # stack, only the interior is rewritten per layer.
        xp_scr[...] = jnp.zeros_like(xp_scr)
        hp_scr[...] = jnp.zeros_like(hp_scr)
        # Stem conv (already im2col'ed, K padded to 128): matmul + BN + ReLU.
        a = jnp.dot(patches_ref[...], stem_w_ref[...],
                    preferred_element_type=jnp.float32)
        a = jnp.maximum(a * stem_s_ref[...] + stem_t_ref[...], 0.0)
        xp_scr[:, 1:H + 1, 1:W + 1, :] = a.reshape(N, H, W, C)

    def conv3x3(padded, w_ref):
        # 3x3 conv as ONE MXU matmul: concatenate the 9 shifted views along K
        # (K = 9*C) and hit the pre-reshaped (9C, C) weight.  bf16 operands,
        # f32 accumulation.
        cols = []
        for kh in range(3):
            for kw in range(3):
                cols.append(padded[:, kh:kh + H, kw:kw + W, :].reshape(M, C))
        p = jnp.concatenate(cols, axis=-1).astype(jnp.bfloat16)
        return jnp.dot(p, w_ref[0], preferred_element_type=jnp.float32)

    xp = xp_scr[...]                                   # (N, H+2, W+2, C)

    # f(x):  conv1 -> bias -> BN affine -> ReLU
    h = conv3x3(xp, w1_ref)
    h = jnp.maximum((h + b1_ref[0]) * s1_ref[0] + t1_ref[0], 0.0)
    hp_scr[:, 1:H + 1, 1:W + 1, :] = h.reshape(N, H, W, C)

    #        conv2 -> bias -> BN affine
    f = conv3x3(hp_scr[...], w2_ref)
    f = (f + b2_ref[0]) * s2_ref[0] + t2_ref[0]

    # EulerStep:  x <- x + f(x) / depth
    x_center = xp[:, 1:H + 1, 1:W + 1, :].reshape(M, C)
    new_act = x_center + f * inv_depth
    xp_scr[:, 1:H + 1, 1:W + 1, :] = new_act.reshape(N, H, W, C)

    @pl.when(l == n_layers - 1)
    def _write_out():
        o_ref[...] = new_act.astype(o_ref.dtype)


def fused_stem_and_residual_stack(patches, stem_w, stem_scale, stem_shift,
                                  layers, N, H, W, C):
    n_layers = layers["w1"].shape[0]
    assert n_layers >= 1, "need at least one EulerStep layer"
    M = N * H * W
    Ks = patches.shape[1]

    kernel = functools.partial(_fused_stem_residual_kernel,
                               N=N, H=H, W=W, C=C, n_layers=n_layers)

    const = lambda shape: pl.BlockSpec(shape, lambda l: (0, 0))
    per_layer3 = lambda shape: pl.BlockSpec(shape, lambda l: (l, 0, 0))
    vec = lambda a: a.reshape(n_layers, 1, C)

    return pl.pallas_call(
        kernel,
        out_shape=jax.ShapeDtypeStruct((M, C), jnp.float32),
        grid=(n_layers,),
        in_specs=[
            const((M, Ks)),                  # stem im2col patches (bf16)
            const((Ks, C)),                  # stem weight (bf16)
            const((1, C)),                   # stem BN scale
            const((1, C)),                   # stem BN shift
            per_layer3((1, 9 * C, C)),       # w1[l]  (bf16, (9C, C))
            per_layer3((1, 1, C)),           # b1[l]
            per_layer3((1, 1, C)),           # s1[l]
            per_layer3((1, 1, C)),           # t1[l]
            per_layer3((1, 9 * C, C)),       # w2[l]
            per_layer3((1, 1, C)),           # b2[l]
            per_layer3((1, 1, C)),           # s2[l]
            per_layer3((1, 1, C)),           # t2[l]
        ],
        out_specs=pl.BlockSpec((M, C), lambda l: (0, 0)),
        scratch_shapes=[
            pltpu.VMEM((N, H + 2, W + 2, C), jnp.float32),   # padded x
            pltpu.VMEM((N, H + 2, W + 2, C), jnp.float32),   # padded relu(bn(conv1))
        ],
        compiler_params=pltpu.CompilerParams(
            # layer axis carries state through scratch -> must stay sequential
            dimension_semantics=("arbitrary",)),
    )(patches, stem_w, stem_scale.reshape(1, C), stem_shift.reshape(1, C),
      layers["w1"], vec(layers["b1"]), vec(layers["s1"]), vec(layers["t1"]),
      layers["w2"], vec(layers["b2"]), vec(layers["s2"]), vec(layers["t2"]))


# ----------------------------------------------------------------------------
# Kernel 2: fused matmul + per-column affine (bias) + optional ReLU.
# Used for the head (pooling is folded into the weight in the wrapper).
# ----------------------------------------------------------------------------
def _matmul_affine_kernel(x_ref, w_ref, scale_ref, shift_ref, o_ref, *, apply_relu):
    acc = jnp.dot(x_ref[...].astype(jnp.bfloat16),
                  w_ref[...].astype(jnp.bfloat16),
                  preferred_element_type=jnp.float32)
    acc = acc * scale_ref[...] + shift_ref[...]
    if apply_relu:
        acc = jnp.maximum(acc, 0.0)
    o_ref[...] = acc.astype(o_ref.dtype)


def matmul_affine(x, w, scale, shift, apply_relu):
    M, K = x.shape
    _, Nc = w.shape
    kernel = functools.partial(_matmul_affine_kernel, apply_relu=apply_relu)
    # Shapes here are tiny (M=2, K=512, Nc=128) so a single block suffices;
    # for large M/K this should grow an M (and K-accumulator) grid.
    return pl.pallas_call(
        kernel,
        out_shape=jax.ShapeDtypeStruct((M, Nc), jnp.float32),
        grid=(1,),
        in_specs=[
            pl.BlockSpec((M, K), lambda i: (0, 0)),
            pl.BlockSpec((K, Nc), lambda i: (0, 0)),
            pl.BlockSpec((1, Nc), lambda i: (0, 0)),
            pl.BlockSpec((1, Nc), lambda i: (0, 0)),
        ],
        out_specs=pl.BlockSpec((M, Nc), lambda i: (0, 0)),
        compiler_params=pltpu.CompilerParams(dimension_semantics=("arbitrary",)),
    )(x, w, scale, shift)


# ----------------------------------------------------------------------------
# Wrapper glue
# ----------------------------------------------------------------------------
def stem_im2col(x_nchw, ksize=5, stride=3, pad=1, k_align=128):
    """NCHW -> NHWC, pad, extract 5x5/stride-3 patches, pad K to 128, bf16."""
    N, Cin, H, W = x_nchw.shape
    x = jnp.transpose(x_nchw, (0, 2, 3, 1))
    xp = jnp.pad(x, ((0, 0), (pad, pad), (pad, pad), (0, 0)))
    Ho = (H + 2 * pad - ksize) // stride + 1
    Wo = (W + 2 * pad - ksize) // stride + 1
    cols = []
    for kh in range(ksize):
        for kw in range(ksize):
            cols.append(xp[:, kh:kh + stride * (Ho - 1) + 1:stride,
                           kw:kw + stride * (Wo - 1) + 1:stride, :])
    patches = jnp.stack(cols, axis=3).reshape(N * Ho * Wo, ksize * ksize * Cin)
    Kraw = patches.shape[1]                                  # (kh, kw, cin) order
    Kpad = ((Kraw + k_align - 1) // k_align) * k_align
    patches = jnp.pad(patches, ((0, 0), (0, Kpad - Kraw)))
    return patches.astype(jnp.bfloat16), Ho, Wo, Kraw, Kpad


def head_pool_linear(act_rows, lin_w, lin_b, N, H, W, C, pool=4, n_align=128):
    """F.avg_pool2d(x, 4) -> flatten (c,h,w order) -> Linear, as one matmul.

    The 4x4 averaging and the PyTorch (c, ph, pw) flatten order are folded
    into an effective (H*W*C, K) weight built once here (glue)."""
    assert H % pool == 0 and W % pool == 0
    K = lin_w.shape[0]
    Ph, Pw = H // pool, W // pool
    assert lin_w.shape[1] == C * Ph * Pw
    w4 = lin_w.reshape(K, C, Ph, Pw)
    w_full = jnp.repeat(jnp.repeat(w4, pool, axis=2), pool, axis=3) / float(pool * pool)
    weff = jnp.transpose(w_full, (2, 3, 1, 0)).reshape(H * W * C, K)   # (h,w,c) rows
    Npad = ((K + n_align - 1) // n_align) * n_align                    # lane-dense out
    weff = jnp.pad(weff, ((0, 0), (0, Npad - K))).astype(jnp.bfloat16)

    feats = act_rows.reshape(N, H * W * C)          # rows are (n); (h,w,c) features
    bias = jnp.zeros((1, Npad), jnp.float32).at[0, :K].set(lin_b)
    ones = jnp.ones((1, Npad), jnp.float32)
    out = matmul_affine(feats, weff, ones, bias, apply_relu=False)
    return out[:, :K]


# ----------------------------------------------------------------------------
# Parameters (deterministic synthetic) and full forward
# ----------------------------------------------------------------------------
def _bn_affine(gamma, beta):
    # eval-mode BN with running_mean=0, running_var=1
    return gamma / jnp.sqrt(1.0 + EPS), beta


def init_params(key, n_layers, in_planes, num_classes, stem_hw):
    P = in_planes
    keys = iter(jax.random.split(key, 8 + 8 * n_layers))
    nrm = lambda k, shape, s: jax.random.normal(k, shape, jnp.float32) * s

    conv1_w = nrm(next(keys), (5, 5, 3, P), 0.1)                       # HWIO
    bn1_s, bn1_t = _bn_affine(1.0 + nrm(next(keys), (P,), 0.1),
                              nrm(next(keys), (P,), 0.1))

    w1s, b1s, s1s, t1s, w2s, b2s, s2s, t2s = ([] for _ in range(8))
    for _ in range(n_layers):
        w1 = nrm(next(keys), (3, 3, P, P), 0.1)                        # HWIO
        b1 = nrm(next(keys), (P,), 0.1)
        g1 = 1.0 + nrm(next(keys), (P,), 0.1)
        be1 = nrm(next(keys), (P,), 0.1)
        w2 = nrm(next(keys), (3, 3, P, P), 0.1)
        b2 = nrm(next(keys), (P,), 0.1)
        g2 = 1.0 + nrm(next(keys), (P,), 0.1)
        be2 = nrm(next(keys), (P,), 0.1)
        s1, t1 = _bn_affine(g1, be1)
        s2, t2 = _bn_affine(g2, be2)
        w1s.append(w1.reshape(9 * P, P)); b1s.append(b1); s1s.append(s1); t1s.append(t1)
        w2s.append(w2.reshape(9 * P, P)); b2s.append(b2); s2s.append(s2); t2s.append(t2)

    layers = dict(
        w1=jnp.stack(w1s).astype(jnp.bfloat16),      # (L, 9P, P) MXU operands
        b1=jnp.stack(b1s), s1=jnp.stack(s1s), t1=jnp.stack(t1s),
        w2=jnp.stack(w2s).astype(jnp.bfloat16),
        b2=jnp.stack(b2s), s2=jnp.stack(s2s), t2=jnp.stack(t2s),
    )

    pooled_feat = P * (stem_hw // 4) * (stem_hw // 4)
    lin_w = nrm(next(keys), (num_classes, pooled_feat), 0.1)           # PyTorch layout
    lin_b = nrm(next(keys), (num_classes,), 0.1)
    return dict(conv1_w=conv1_w, bn1_scale=bn1_s, bn1_shift=bn1_t,
                layers=layers, lin_w=lin_w, lin_b=lin_b)


def itiny_resnet_forward(x_nchw, params):
    P = params["conv1_w"].shape[-1]
    N = x_nchw.shape[0]

    # stem im2col (glue) + weight reshape/pad/cast
    patches, Ho, Wo, Kraw, Kpad = stem_im2col(x_nchw)
    stem_w = params["conv1_w"].reshape(Kraw, P)
    stem_w = jnp.pad(stem_w, ((0, Kpad - Kraw), (0, 0))).astype(jnp.bfloat16)

    # fused stem matmul + full EulerStep residual stack (one pallas_call)
    act = fused_stem_and_residual_stack(
        patches, stem_w, params["bn1_scale"], params["bn1_shift"],
        params["layers"], N, Ho, Wo, P)                    # (N*Ho*Wo, P)

    # head: avgpool(4) + flatten + Linear folded into one matmul kernel
    return head_pool_linear(act, params["lin_w"], params["lin_b"], N, Ho, Wo, P)


if __name__ == "__main__":
    key = jax.random.PRNGKey(0)
    k_x, k_p = jax.random.split(key)

    # batch=2, 3x24x24 input -> 8x8 after stem -> 2x2 after pool
    N, H, W = 2, 24, 24
    in_planes, num_classes, n_layers = 8, 10, 2

    x = jax.random.normal(k_x, (N, 3, H, W), jnp.float32)
    stem_hw = (H + 2 - 5) // 3 + 1          # 8
    params = init_params(k_p, n_layers, in_planes, num_classes, stem_hw)

    out = jax.jit(itiny_resnet_forward)(x, params)
    out = jax.block_until_ready(out)
    assert out.shape == (N, num_classes) and out.dtype == jnp.float32
    print("KERNEL_OK")
</pallas_src>

<mosaic_0001>
module attributes {stable_mosaic.version = 11 : i64} {
  func.func @_fused_stem_residual_kernel(%arg0: i32, %arg1: memref<128x128xbf16, #tpu.memory_space<vmem>>, %arg2: memref<128x8xbf16, #tpu.memory_space<vmem>>, %arg3: memref<1x8xf32, #tpu.memory_space<vmem>>, %arg4: memref<1x8xf32, #tpu.memory_space<vmem>>, %arg5: memref<1x72x8xbf16, #tpu.memory_space<vmem>>, %arg6: memref<1x1x8xf32, #tpu.memory_space<vmem>>, %arg7: memref<1x1x8xf32, #tpu.memory_space<vmem>>, %arg8: memref<1x1x8xf32, #tpu.memory_space<vmem>>, %arg9: memref<1x72x8xbf16, #tpu.memory_space<vmem>>, %arg10: memref<1x1x8xf32, #tpu.memory_space<vmem>>, %arg11: memref<1x1x8xf32, #tpu.memory_space<vmem>>, %arg12: memref<1x1x8xf32, #tpu.memory_space<vmem>>, %arg13: memref<128x8xf32, #tpu.memory_space<vmem>>, %arg14: memref<2x10x10x8xf32, #tpu.memory_space<vmem>>, %arg15: memref<2x10x10x8xf32, #tpu.memory_space<vmem>>) attributes {dimension_semantics = [#tpu.dimension_semantics<arbitrary>], iteration_bounds = array<i64: 2>, scalar_prefetch = 0 : i64, scratch_operands = 2 : i64, tpu.core_type = #tpu.core_type<tc>, window_params = [{pipeline_mode = #tpu.pipeline_mode<synchronous>, transform_indices = @transform_0, window_bounds = array<i64: 128, 128>}, {pipeline_mode = #tpu.pipeline_mode<synchronous>, transform_indices = @transform_1, window_bounds = array<i64: 128, 8>}, {pipeline_mode = #tpu.pipeline_mode<synchronous>, transform_indices = @transform_2, window_bounds = array<i64: 1, 8>}, {pipeline_mode = #tpu.pipeline_mode<synchronous>, transform_indices = @transform_3, window_bounds = array<i64: 1, 8>}, {transform_indices = @transform_4, window_bounds = array<i64: 1, 72, 8>}, {transform_indices = @transform_5, window_bounds = array<i64: 1, 1, 8>}, {transform_indices = @transform_6, window_bounds = array<i64: 1, 1, 8>}, {transform_indices = @transform_7, window_bounds = array<i64: 1, 1, 8>}, {transform_indices = @transform_8, window_bounds = array<i64: 1, 72, 8>}, {transform_indices = @transform_9, window_bounds = array<i64: 1, 1, 8>}, {transform_indices = @transform_10, window_bounds = array<i64: 1, 1, 8>}, {transform_indices = @transform_11, window_bounds = array<i64: 1, 1, 8>}, {pipeline_mode = #tpu.pipeline_mode<synchronous>, transform_indices = @transform_12, window_bounds = array<i64: 128, 8>}]} {
    %c0_i32 = arith.constant 0 : i32
    %0 = arith.cmpi eq, %arg0, %c0_i32 : i32
    %1 = arith.extui %0 : i1 to i32
    %c0_i32_0 = arith.constant 0 : i32
    %2 = arith.cmpi ne, %1, %c0_i32_0 : i32
    scf.if %2 {
      %cst_43 = arith.constant 0.000000e+00 : f32
      %89 = vector.broadcast %cst_43 : f32 to vector<2x10x10x8xf32>
      %c0_44 = arith.constant 0 : index
      %c0_45 = arith.constant 0 : index
      %c0_46 = arith.constant 0 : index
      %c0_47 = arith.constant 0 : index
      %90 = vector.load %arg14[%c0_44, %c0_45, %c0_46, %c0_47] : memref<2x10x10x8xf32, #tpu.memory_space<vmem>>, vector<2x10x10x8xf32>
      tpu.vector_store %arg14[%c0_44, %c0_45, %c0_46, %c0_47], %89 {strides = array<i32>} : memref<2x10x10x8xf32, #tpu.memory_space<vmem>>, vector<2x10x10x8xf32>,
      %cst_48 = arith.constant 0.000000e+00 : f32
      %91 = vector.broadcast %cst_48 : f32 to vector<2x10x10x8xf32>
      %c0_49 = arith.constant 0 : index
      %c0_50 = arith.constant 0 : index
      %c0_51 = arith.constant 0 : index
      %c0_52 = arith.constant 0 : index
      %92 = vector.load %arg15[%c0_49, %c0_50, %c0_51, %c0_52] : memref<2x10x10x8xf32, #tpu.memory_space<vmem>>, vector<2x10x10x8xf32>
      tpu.vector_store %arg15[%c0_49, %c0_50, %c0_51, %c0_52], %91 {strides = array<i32>} : memref<2x10x10x8xf32, #tpu.memory_space<vmem>>, vector<2x10x10x8xf32>,
      %c0_53 = arith.constant 0 : index
      %c0_54 = arith.constant 0 : index
      %93 = vector.load %arg1[%c0_53, %c0_54] : memref<128x128xbf16, #tpu.memory_space<vmem>>, vector<128x128xbf16>
      %c0_55 = arith.constant 0 : index
      %c0_56 = arith.constant 0 : index
      %94 = vector.load %arg2[%c0_55, %c0_56] : memref<128x8xbf16, #tpu.memory_space<vmem>>, vector<128x8xbf16>
      %cst_57 = arith.constant dense<0.000000e+00> : vector<128x8xf32>
      %95 = tpu.matmul %93, %94, %cst_57 {dimension_numbers = #tpu.dot_dimension_numbers<[1], [0], [0], [1], [0, 0, 1, 1], [], []>} : vector<128x128xbf16>, vector<128x8xbf16>, vector<128x8xf32> -> vector<128x8xf32>
      %c0_58 = arith.constant 0 : index
      %c0_59 = arith.constant 0 : index
      %96 = vector.load %arg3[%c0_58, %c0_59] : memref<1x8xf32, #tpu.memory_space<vmem>>, vector<1x8xf32>
      %97 = vector.broadcast %96 : vector<1x8xf32> to vector<128x8xf32>
      %98 = arith.mulf %95, %97 : vector<128x8xf32>
      %c0_60 = arith.constant 0 : index
      %c0_61 = arith.constant 0 : index
      %99 = vector.load %arg4[%c0_60, %c0_61] : memref<1x8xf32, #tpu.memory_space<vmem>>, vector<1x8xf32>
      %100 = vector.broadcast %99 : vector<1x8xf32> to vector<128x8xf32>
      %101 = arith.addf %98, %100 : vector<128x8xf32>
      %cst_62 = arith.constant 0.000000e+00 : f32
      %102 = vector.broadcast %cst_62 : f32 to vector<128x8xf32>
      %103 = arith.maximumf %101, %102 : vector<128x8xf32>
      %104 = vector.shape_cast %103 : vector<128x8xf32> to vector<2x8x8x8xf32>
      %c0_63 = arith.constant 0 : index
      %c1_64 = arith.constant 1 : index
      %c1_65 = arith.constant 1 : index
      %c0_66 = arith.constant 0 : index
      %105 = vector.load %arg14[%c0_63, %c1_64, %c1_65, %c0_66] : memref<2x10x10x8xf32, #tpu.memory_space<vmem>>, vector<2x8x8x8xf32>
      tpu.vector_store %arg14[%c0_63, %c1_64, %c1_65, %c0_66], %104 {strides = array<i32>} : memref<2x10x10x8xf32, #tpu.memory_space<vmem>>, vector<2x8x8x8xf32>,
    } else {
    }
    %c0 = arith.constant 0 : index
    %c0_1 = arith.constant 0 : index
    %c0_2 = arith.constant 0 : index
    %c0_3 = arith.constant 0 : index
    %3 = vector.load %arg14[%c0, %c0_1, %c0_2, %c0_3] : memref<2x10x10x8xf32, #tpu.memory_space<vmem>>, vector<2x10x10x8xf32>
    %4 = vector.extract_strided_slice %3 {offsets = [0, 0, 0, 0], sizes = [2, 8, 8, 8], strides = [1, 1, 1, 1]} : vector<2x10x10x8xf32> to vector<2x8x8x8xf32>
    %5 = vector.shape_cast %4 : vector<2x8x8x8xf32> to vector<128x8xf32>
    %6 = vector.extract_strided_slice %3 {offsets = [0, 0, 1, 0], sizes = [2, 8, 8, 8], strides = [1, 1, 1, 1]} : vector<2x10x10x8xf32> to vector<2x8x8x8xf32>
    %7 = vector.shape_cast %6 : vector<2x8x8x8xf32> to vector<128x8xf32>
    %8 = vector.extract_strided_slice %3 {offsets = [0, 0, 2, 0], sizes = [2, 8, 8, 8], strides = [1, 1, 1, 1]} : vector<2x10x10x8xf32> to vector<2x8x8x8xf32>
    %9 = vector.shape_cast %8 : vector<2x8x8x8xf32> to vector<128x8xf32>
    %10 = vector.extract_strided_slice %3 {offsets = [0, 1, 0, 0], sizes = [2, 8, 8, 8], strides = [1, 1, 1, 1]} : vector<2x10x10x8xf32> to vector<2x8x8x8xf32>
    %11 = vector.shape_cast %10 : vector<2x8x8x8xf32> to vector<128x8xf32>
    %12 = vector.extract_strided_slice %3 {offsets = [0, 1, 1, 0], sizes = [2, 8, 8, 8], strides = [1, 1, 1, 1]} : vector<2x10x10x8xf32> to vector<2x8x8x8xf32>
    %13 = vector.shape_cast %12 : vector<2x8x8x8xf32> to vector<128x8xf32>
    %14 = vector.extract_strided_slice %3 {offsets = [0, 1, 2, 0], sizes = [2, 8, 8, 8], strides = [1, 1, 1, 1]} : vector<2x10x10x8xf32> to vector<2x8x8x8xf32>
    %15 = vector.shape_cast %14 : vector<2x8x8x8xf32> to vector<128x8xf32>
    %16 = vector.extract_strided_slice %3 {offsets = [0, 2, 0, 0], sizes = [2, 8, 8, 8], strides = [1, 1, 1, 1]} : vector<2x10x10x8xf32> to vector<2x8x8x8xf32>
    %17 = vector.shape_cast %16 : vector<2x8x8x8xf32> to vector<128x8xf32>
    %18 = vector.extract_strided_slice %3 {offsets = [0, 2, 1, 0], sizes = [2, 8, 8, 8], strides = [1, 1, 1, 1]} : vector<2x10x10x8xf32> to vector<2x8x8x8xf32>
    %19 = vector.shape_cast %18 : vector<2x8x8x8xf32> to vector<128x8xf32>
    %20 = vector.extract_strided_slice %3 {offsets = [0, 2, 2, 0], sizes = [2, 8, 8, 8], strides = [1, 1, 1, 1]} : vector<2x10x10x8xf32> to vector<2x8x8x8xf32>
    %21 = vector.shape_cast %20 : vector<2x8x8x8xf32> to vector<128x8xf32>
    %22 = tpu.concatenate %5, %7, %9, %11, %13, %15, %17, %19, %21 in 1 : vector<128x8xf32>, vector<128x8xf32>, vector<128x8xf32>, vector<128x8xf32>, vector<128x8xf32>, vector<128x8xf32>, vector<128x8xf32>, vector<128x8xf32>, vector<128x8xf32> -> vector<128x72xf32>
    %23 = arith.truncf %22 : vector<128x72xf32> to vector<128x72xbf16>
    %c0_4 = arith.constant 0 : index
    %c0_5 = arith.constant 0 : index
    %c0_6 = arith.constant 0 : index
    %24 = vector.load %arg5[%c0_4, %c0_5, %c0_6] : memref<1x72x8xbf16, #tpu.memory_space<vmem>>, vector<1x72x8xbf16>
    %25 = vector.shape_cast %24 : vector<1x72x8xbf16> to vector<72x8xbf16>
    %cst = arith.constant dense<0.000000e+00> : vector<128x8xf32>
    %26 = tpu.matmul %23, %25, %cst {dimension_numbers = #tpu.dot_dimension_numbers<[1], [0], [0], [1], [0, 0, 1, 1], [], []>} : vector<128x72xbf16>, vector<72x8xbf16>, vector<128x8xf32> -> vector<128x8xf32>
    %c0_7 = arith.constant 0 : index
    %c0_8 = arith.constant 0 : index
    %c0_9 = arith.constant 0 : index
    %27 = vector.load %arg6[%c0_7, %c0_8, %c0_9] : memref<1x1x8xf32, #tpu.memory_space<vmem>>, vector<1x1x8xf32>
    %28 = vector.shape_cast %27 : vector<1x1x8xf32> to vector<1x8xf32>
    %29 = vector.broadcast %28 : vector<1x8xf32> to vector<128x8xf32>
    %30 = arith.addf %26, %29 : vector<128x8xf32>
    %c0_10 = arith.constant 0 : index
    %c0_11 = arith.constant 0 : index
    %c0_12 = arith.constant 0 : index
    %31 = vector.load %arg7[%c0_10, %c0_11, %c0_12] : memref<1x1x8xf32, #tpu.memory_space<vmem>>, vector<1x1x8xf32>
    %32 = vector.shape_cast %31 : vector<1x1x8xf32> to vector<1x8xf32>
    %33 = vector.broadcast %32 : vector<1x8xf32> to vector<128x8xf32>
    %34 = arith.mulf %30, %33 : vector<128x8xf32>
    %c0_13 = arith.constant 0 : index
    %c0_14 = arith.constant 0 : index
    %c0_15 = arith.constant 0 : index
    %35 = vector.load %arg8[%c0_13, %c0_14, %c0_15] : memref<1x1x8xf32, #tpu.memory_space<vmem>>, vector<1x1x8xf32>
    %36 = vector.shape_cast %35 : vector<1x1x8xf32> to vector<1x8xf32>
    %37 = vector.broadcast %36 : vector<1x8xf32> to vector<128x8xf32>
    %38 = arith.addf %34, %37 : vector<128x8xf32>
    %cst_16 = arith.constant 0.000000e+00 : f32
    %39 = vector.broadcast %cst_16 : f32 to vector<128x8xf32>
    %40 = arith.maximumf %38, %39 : vector<128x8xf32>
    %41 = vector.shape_cast %40 : vector<128x8xf32> to vector<2x8x8x8xf32>
    %c0_17 = arith.constant 0 : index
    %c1 = arith.constant 1 : index
    %c1_18 = arith.constant 1 : index
    %c0_19 = arith.constant 0 : index
    %42 = vector.load %arg15[%c0_17, %c1, %c1_18, %c0_19] : memref<2x10x10x8xf32, #tpu.memory_space<vmem>>, vector<2x8x8x8xf32>
    tpu.vector_store %arg15[%c0_17, %c1, %c1_18, %c0_19], %41 {strides = array<i32>} : memref<2x10x10x8xf32, #tpu.memory_space<vmem>>, vector<2x8x8x8xf32>,
    %c0_20 = arith.constant 0 : index
    %c0_21 = arith.constant 0 : index
    %c0_22 = arith.constant 0 : index
    %c0_23 = arith.constant 0 : index
    %43 = vector.load %arg15[%c0_20, %c0_21, %c0_22, %c0_23] : memref<2x10x10x8xf32, #tpu.memory_space<vmem>>, vector<2x10x10x8xf32>
    %44 = vector.extract_strided_slice %43 {offsets = [0, 0, 0, 0], sizes = [2, 8, 8, 8], strides = [1, 1, 1, 1]} : vector<2x10x10x8xf32> to vector<2x8x8x8xf32>
    %45 = vector.shape_cast %44 : vector<2x8x8x8xf32> to vector<128x8xf32>
    %46 = vector.extract_strided_slice %43 {offsets = [0, 0, 1, 0], sizes = [2, 8, 8, 8], strides = [1, 1, 1, 1]} : vector<2x10x10x8xf32> to vector<2x8x8x8xf32>
    %47 = vector.shape_cast %46 : vector<2x8x8x8xf32> to vector<128x8xf32>
    %48 = vector.extract_strided_slice %43 {offsets = [0, 0, 2, 0], sizes = [2, 8, 8, 8], strides = [1, 1, 1, 1]} : vector<2x10x10x8xf32> to vector<2x8x8x8xf32>
    %49 = vector.shape_cast %48 : vector<2x8x8x8xf32> to vector<128x8xf32>
    %50 = vector.extract_strided_slice %43 {offsets = [0, 1, 0, 0], sizes = [2, 8, 8, 8], strides = [1, 1, 1, 1]} : vector<2x10x10x8xf32> to vector<2x8x8x8xf32>
    %51 = vector.shape_cast %50 : vector<2x8x8x8xf32> to vector<128x8xf32>
    %52 = vector.extract_strided_slice %43 {offsets = [0, 1, 1, 0], sizes = [2, 8, 8, 8], strides = [1, 1, 1, 1]} : vector<2x10x10x8xf32> to vector<2x8x8x8xf32>
    %53 = vector.shape_cast %52 : vector<2x8x8x8xf32> to vector<128x8xf32>
    %54 = vector.extract_strided_slice %43 {offsets = [0, 1, 2, 0], sizes = [2, 8, 8, 8], strides = [1, 1, 1, 1]} : vector<2x10x10x8xf32> to vector<2x8x8x8xf32>
    %55 = vector.shape_cast %54 : vector<2x8x8x8xf32> to vector<128x8xf32>
    %56 = vector.extract_strided_slice %43 {offsets = [0, 2, 0, 0], sizes = [2, 8, 8, 8], strides = [1, 1, 1, 1]} : vector<2x10x10x8xf32> to vector<2x8x8x8xf32>
    %57 = vector.shape_cast %56 : vector<2x8x8x8xf32> to vector<128x8xf32>
    %58 = vector.extract_strided_slice %43 {offsets = [0, 2, 1, 0], sizes = [2, 8, 8, 8], strides = [1, 1, 1, 1]} : vector<2x10x10x8xf32> to vector<2x8x8x8xf32>
    %59 = vector.shape_cast %58 : vector<2x8x8x8xf32> to vector<128x8xf32>
    %60 = vector.extract_strided_slice %43 {offsets = [0, 2, 2, 0], sizes = [2, 8, 8, 8], strides = [1, 1, 1, 1]} : vector<2x10x10x8xf32> to vector<2x8x8x8xf32>
    %61 = vector.shape_cast %60 : vector<2x8x8x8xf32> to vector<128x8xf32>
    %62 = tpu.concatenate %45, %47, %49, %51, %53, %55, %57, %59, %61 in 1 : vector<128x8xf32>, vector<128x8xf32>, vector<128x8xf32>, vector<128x8xf32>, vector<128x8xf32>, vector<128x8xf32>, vector<128x8xf32>, vector<128x8xf32>, vector<128x8xf32> -> vector<128x72xf32>
    %63 = arith.truncf %62 : vector<128x72xf32> to vector<128x72xbf16>
    %c0_24 = arith.constant 0 : index
    %c0_25 = arith.constant 0 : index
    %c0_26 = arith.constant 0 : index
    %64 = vector.load %arg9[%c0_24, %c0_25, %c0_26] : memref<1x72x8xbf16, #tpu.memory_space<vmem>>, vector<1x72x8xbf16>
    %65 = vector.shape_cast %64 : vector<1x72x8xbf16> to vector<72x8xbf16>
    %cst_27 = arith.constant dense<0.000000e+00> : vector<128x8xf32>
    %66 = tpu.matmul %63, %65, %cst_27 {dimension_numbers = #tpu.dot_dimension_numbers<[1], [0], [0], [1], [0, 0, 1, 1], [], []>} : vector<128x72xbf16>, vector<72x8xbf16>, vector<128x8xf32> -> vector<128x8xf32>
    %c0_28 = arith.constant 0 : index
    %c0_29 = arith.constant 0 : index
    %c0_30 = arith.constant 0 : index
    %67 = vector.load %arg10[%c0_28, %c0_29, %c0_30] : memref<1x1x8xf32, #tpu.memory_space<vmem>>, vector<1x1x8xf32>
    %68 = vector.shape_cast %67 : vector<1x1x8xf32> to vector<1x8xf32>
    %69 = vector.broadcast %68 : vector<1x8xf32> to vector<128x8xf32>
    %70 = arith.addf %66, %69 : vector<128x8xf32>
    %c0_31 = arith.constant 0 : index
    %c0_32 = arith.constant 0 : index
    %c0_33 = arith.constant 0 : index
    %71 = vector.load %arg11[%c0_31, %c0_32, %c0_33] : memref<1x1x8xf32, #tpu.memory_space<vmem>>, vector<1x1x8xf32>
    %72 = vector.shape_cast %71 : vector<1x1x8xf32> to vector<1x8xf32>
    %73 = vector.broadcast %72 : vector<1x8xf32> to vector<128x8xf32>
    %74 = arith.mulf %70, %73 : vector<128x8xf32>
    %c0_34 = arith.constant 0 : index
    %c0_35 = arith.constant 0 : index
    %c0_36 = arith.constant 0 : index
    %75 = vector.load %arg12[%c0_34, %c0_35, %c0_36] : memref<1x1x8xf32, #tpu.memory_space<vmem>>, vector<1x1x8xf32>
    %76 = vector.shape_cast %75 : vector<1x1x8xf32> to vector<1x8xf32>
    %77 = vector.broadcast %76 : vector<1x8xf32> to vector<128x8xf32>
    %78 = arith.addf %74, %77 : vector<128x8xf32>
    %79 = vector.extract_strided_slice %3 {offsets = [0, 1, 1, 0], sizes = [2, 8, 8, 8], strides = [1, 1, 1, 1]} : vector<2x10x10x8xf32> to vector<2x8x8x8xf32>
    %80 = vector.shape_cast %79 : vector<2x8x8x8xf32> to vector<128x8xf32>
    %cst_37 = arith.constant 5.000000e-01 : f32
    %81 = vector.broadcast %cst_37 : f32 to vector<128x8xf32>
    %82 = arith.mulf %78, %81 : vector<128x8xf32>
    %83 = arith.addf %80, %82 : vector<128x8xf32>
    %84 = vector.shape_cast %83 : vector<128x8xf32> to vector<2x8x8x8xf32>
    %c0_38 = arith.constant 0 : index
    %c1_39 = arith.constant 1 : index
    %c1_40 = arith.constant 1 : index
    %c0_41 = arith.constant 0 : index
    %85 = vector.load %arg14[%c0_38, %c1_39, %c1_40, %c0_41] : memref<2x10x10x8xf32, #tpu.memory_space<vmem>>, vector<2x8x8x8xf32>
    tpu.vector_store %arg14[%c0_38, %c1_39, %c1_40, %c0_41], %84 {strides = array<i32>} : memref<2x10x10x8xf32, #tpu.memory_space<vmem>>, vector<2x8x8x8xf32>,
    %c1_i32 = arith.constant 1 : i32
    %86 = arith.cmpi eq, %arg0, %c1_i32 : i32
    %87 = arith.extui %86 : i1 to i32
    %c0_i32_42 = arith.constant 0 : i32
    %88 = arith.cmpi ne, %87, %c0_i32_42 : i32
    scf.if %88 {
      %c0_43 = arith.constant 0 : index
      %c0_44 = arith.constant 0 : index
      %89 = vector.load %arg13[%c0_43, %c0_44] : memref<128x8xf32, #tpu.memory_space<vmem>>, vector<128x8xf32>
      tpu.vector_store %arg13[%c0_43, %c0_44], %83 {strides = array<i32>} : memref<128x8xf32, #tpu.memory_space<vmem>>, vector<128x8xf32>,
    } else {
    }
    return
  }
  func.func @transform_0(%arg0: i32) -> (i32, i32) {
    %c0_i32 = arith.constant 0 : i32
    %c0_i32_0 = arith.constant 0 : i32
    %c0_i32_1 = arith.constant 0 : i32
    return %c0_i32, %c0_i32_0 : i32, i32
  }
  func.func @transform_1(%arg0: i32) -> (i32, i32) {
    %c0_i32 = arith.constant 0 : i32
    %c0_i32_0 = arith.constant 0 : i32
    %c0_i32_1 = arith.constant 0 : i32
    return %c0_i32, %c0_i32_0 : i32, i32
  }
  func.func @transform_2(%arg0: i32) -> (i32, i32) {
    %c0_i32 = arith.constant 0 : i32
    %c0_i32_0 = arith.constant 0 : i32
    %c0_i32_1 = arith.constant 0 : i32
    return %c0_i32, %c0_i32_0 : i32, i32
  }
  func.func @transform_3(%arg0: i32) -> (i32, i32) {
    %c0_i32 = arith.constant 0 : i32
    %c0_i32_0 = arith.constant 0 : i32
    %c0_i32_1 = arith.constant 0 : i32
    return %c0_i32, %c0_i32_0 : i32, i32
  }
  func.func @transform_4(%arg0: i32) -> (i32, i32, i32) {
    %c0_i32 = arith.constant 0 : i32
    %c0_i32_0 = arith.constant 0 : i32
    %c0_i32_1 = arith.constant 0 : i32
    return %arg0, %c0_i32, %c0_i32_0 : i32, i32, i32
  }
  func.func @transform_5(%arg0: i32) -> (i32, i32, i32) {
    %c0_i32 = arith.constant 0 : i32
    %c0_i32_0 = arith.constant 0 : i32
    %c0_i32_1 = arith.constant 0 : i32
    return %arg0, %c0_i32, %c0_i32_0 : i32, i32, i32
  }
  func.func @transform_6(%arg0: i32) -> (i32, i32, i32) {
    %c0_i32 = arith.constant 0 : i32
    %c0_i32_0 = arith.constant 0 : i32
    %c0_i32_1 = arith.constant 0 : i32
    return %arg0, %c0_i32, %c0_i32_0 : i32, i32, i32
  }
  func.func @transform_7(%arg0: i32) -> (i32, i32, i32) {
    %c0_i32 = arith.constant 0 : i32
    %c0_i32_0 = arith.constant 0 : i32
    %c0_i32_1 = arith.constant 0 : i32
    return %arg0, %c0_i32, %c0_i32_0 : i32, i32, i32
  }
  func.func @transform_8(%arg0: i32) -> (i32, i32, i32) {
    %c0_i32 = arith.constant 0 : i32
    %c0_i32_0 = arith.constant 0 : i32
    %c0_i32_1 = arith.constant 0 : i32
    return %arg0, %c0_i32, %c0_i32_0 : i32, i32, i32
  }
  func.func @transform_9(%arg0: i32) -> (i32, i32, i32) {
    %c0_i32 = arith.constant 0 : i32
    %c0_i32_0 = arith.constant 0 : i32
    %c0_i32_1 = arith.constant 0 : i32
    return %arg0, %c0_i32, %c0_i32_0 : i32, i32, i32
  }
  func.func @transform_10(%arg0: i32) -> (i32, i32, i32) {
    %c0_i32 = arith.constant 0 : i32
    %c0_i32_0 = arith.constant 0 : i32
    %c0_i32_1 = arith.constant 0 : i32
    return %arg0, %c0_i32, %c0_i32_0 : i32, i32, i32
  }
  func.func @transform_11(%arg0: i32) -> (i32, i32, i32) {
    %c0_i32 = arith.constant 0 : i32
    %c0_i32_0 = arith.constant 0 : i32
    %c0_i32_1 = arith.constant 0 : i32
    return %arg0, %c0_i32, %c0_i32_0 : i32, i32, i32
  }
  func.func @transform_12(%arg0: i32) -> (i32, i32) {
    %c0_i32 = arith.constant 0 : i32
    %c0_i32_0 = arith.constant 0 : i32
    %c0_i32_1 = arith.constant 0 : i32
    return %c0_i32, %c0_i32_0 : i32, i32
  }
}

module attributes {stable_mosaic.version = 11 : i64} {
  func.func @_matmul_affine_kernel(%arg0: i32, %arg1: memref<2x512xf32, #tpu.memory_space<vmem>>, %arg2: memref<512x128xbf16, #tpu.memory_space<vmem>>, %arg3: memref<1x128xf32, #tpu.memory_space<vmem>>, %arg4: memref<1x128xf32, #tpu.memory_space<vmem>>, %arg5: memref<2x128xf32, #tpu.memory_space<vmem>>) attributes {dimension_semantics = [#tpu.dimension_semantics<arbitrary>], iteration_bounds = array<i64: 1>, scalar_prefetch = 0 : i64, scratch_operands = 0 : i64, tpu.core_type = #tpu.core_type<tc>, window_params = [{pipeline_mode = #tpu.pipeline_mode<synchronous>, transform_indices = @transform_0, window_bounds = array<i64: 2, 512>}, {pipeline_mode = #tpu.pipeline_mode<synchronous>, transform_indices = @transform_1, window_bounds = array<i64: 512, 128>}, {pipeline_mode = #tpu.pipeline_mode<synchronous>, transform_indices = @transform_2, window_bounds = array<i64: 1, 128>}, {pipeline_mode = #tpu.pipeline_mode<synchronous>, transform_indices = @transform_3, window_bounds = array<i64: 1, 128>}, {pipeline_mode = #tpu.pipeline_mode<synchronous>, transform_indices = @transform_4, window_bounds = array<i64: 2, 128>}]} {
    %c0 = arith.constant 0 : index
    %c0_0 = arith.constant 0 : index
    %0 = vector.load %arg1[%c0, %c0_0] : memref<2x512xf32, #tpu.memory_space<vmem>>, vector<2x512xf32>
    %1 = arith.truncf %0 : vector<2x512xf32> to vector<2x512xbf16>
    %c0_1 = arith.constant 0 : index
    %c0_2 = arith.constant 0 : index
    %2 = vector.load %arg2[%c0_1, %c0_2] : memref<512x128xbf16, #tpu.memory_space<vmem>>, vector<512x128xbf16>
    %cst = arith.constant dense<0.000000e+00> : vector<2x128xf32>
    %3 = tpu.matmul %1, %2, %cst {dimension_numbers = #tpu.dot_dimension_numbers<[1], [0], [0], [1], [0, 0, 1, 1], [], []>} : vector<2x512xbf16>, vector<512x128xbf16>, vector<2x128xf32> -> vector<2x128xf32>
    %c0_3 = arith.constant 0 : index
    %c0_4 = arith.constant 0 : index
    %4 = vector.load %arg3[%c0_3, %c0_4] : memref<1x128xf32, #tpu.memory_space<vmem>>, vector<1x128xf32>
    %5 = vector.broadcast %4 : vector<1x128xf32> to vector<2x128xf32>
    %6 = arith.mulf %3, %5 : vector<2x128xf32>
    %c0_5 = arith.constant 0 : index
    %c0_6 = arith.constant 0 : index
    %7 = vector.load %arg4[%c0_5, %c0_6] : memref<1x128xf32, #tpu.memory_space<vmem>>, vector<1x128xf32>
    %8 = vector.broadcast %7 : vector<1x128xf32> to vector<2x128xf32>
    %9 = arith.addf %6, %8 : vector<2x128xf32>
    %c0_7 = arith.constant 0 : index
    %c0_8 = arith.constant 0 : index
    %10 = vector.load %arg5[%c0_7, %c0_8] : memref<2x128xf32, #tpu.memory_space<vmem>>, vector<2x128xf32>
    tpu.vector_store %arg5[%c0_7, %c0_8], %9 {strides = array<i32>} : memref<2x128xf32, #tpu.memory_space<vmem>>, vector<2x128xf32>,
    return
  }
  func.func @transform_0(%arg0: i32) -> (i32, i32) {
    %c0_i32 = arith.constant 0 : i32
    %c0_i32_0 = arith.constant 0 : i32
    %c0_i32_1 = arith.constant 0 : i32
    return %c0_i32, %c0_i32_0 : i32, i32
  }
  func.func @transform_1(%arg0: i32) -> (i32, i32) {
    %c0_i32 = arith.constant 0 : i32
    %c0_i32_0 = arith.constant 0 : i32
    %c0_i32_1 = arith.constant 0 : i32
    return %c0_i32, %c0_i32_0 : i32, i32
  }
  func.func @transform_2(%arg0: i32) -> (i32, i32) {
    %c0_i32 = arith.constant 0 : i32
    %c0_i32_0 = arith.constant 0 : i32
    %c0_i32_1 = arith.constant 0 : i32
    return %c0_i32, %c0_i32_0 : i32, i32
  }
  func.func @transform_3(%arg0: i32) -> (i32, i32) {
    %c0_i32 = arith.constant 0 : i32
    %c0_i32_0 = arith.constant 0 : i32
    %c0_i32_1 = arith.constant 0 : i32
    return %c0_i32, %c0_i32_0 : i32, i32
  }
  func.func @transform_4(%arg0: i32) -> (i32, i32) {
    %c0_i32 = arith.constant 0 : i32
    %c0_i32_0 = arith.constant 0 : i32
    %c0_i32_1 = arith.constant 0 : i32
    return %c0_i32, %c0_i32_0 : i32, i32
  }
}

</mosaic_0001>

<bundles_post_ra>
// kernel: itiny_resnet_forward.3
= control target key start
LH: loop header
LB: loop body
LE: loop exit
PB: predicated region body
PF: predicated region fallthrough
CT: control target
= control target key end

     0   :  { %s691_s0 = inlined_call_operand.vmem [shape: f32[2,512], index: 0, kind: input, shape index: {}]   ;;  %s692_s1 = inlined_call_operand.vmem [shape: bf16[512,128], index: 1, kind: input, shape index: {}]   ;;  %s693_s2 = inlined_call_operand.vmem [shape: f32[1,128], index: 2, kind: input, shape index: {}]   ;;  %s694_s3 = inlined_call_operand.vmem [shape: f32[1,128], index: 3, kind: input, shape index: {}]   ;;  %s695_s4 = inlined_call_operand.hbm [shape: f32[2,128], index: 4, kind: output, shape index: {}]  }
   0x1   :  { %v503_v0 = vld [vmem:[%s692_s1 + $0x38] sm:$0xff]  ;;  %v502_v4 = vld [vmem:[%s692_s1 + $0x30] sm:$0xff]  ;;  %v501_v8 = vld [vmem:[%s692_s1 + $0x28] sm:$0xff] }
   0x2   :  { %v511_v1 = vld [vmem:[%s692_s1 + $0x78] sm:$0xff]  ;;  %289 = vmatpush.bf16.msra.mxu0 %v503_v0  ;;  %v510_v5 = vld [vmem:[%s692_s1 + $0x70] sm:$0xff]  ;;  %v509_v9 = vld [vmem:[%s692_s1 + $0x68] sm:$0xff] }
   0x3   :  { %v519_v2 = vld [vmem:[%s692_s1 + $0xb8] sm:$0xff]  ;;  %302 = vmatpush.bf16.msra.mxu1 %v511_v1  ;;  %v518_v6 = vld [vmem:[%s692_s1 + $0xb0] sm:$0xff]  ;;  %v517_v10 = vld [vmem:[%s692_s1 + $0xa8] sm:$0xff] }
   0x4   :  { %v527_v3 = vld [vmem:[%s692_s1 + $0xf8] sm:$0xff]  ;;  %315 = vmatpush.bf16.msra.mxu2 %v519_v2  ;;  %v526_v7 = vld [vmem:[%s692_s1 + $0xf0] sm:$0xff]  ;;  %v525_v11 = vld [vmem:[%s692_s1 + $0xe8] sm:$0xff] }
   0x5   :  { %328 = vmatpush.bf16.msra.mxu3 %v527_v3  ;;  %v500_v12 = vld [vmem:[%s692_s1 + $0x20] sm:$0xff] }
   0x6   :  { %290 = vmatpush.bf16.msra.mxu0 %v502_v4  ;;  %v508_v13 = vld [vmem:[%s692_s1 + $0x60] sm:$0xff] }
   0x7   :  { %303 = vmatpush.bf16.msra.mxu1 %v510_v5  ;;  %v516_v14 = vld [vmem:[%s692_s1 + $0xa0] sm:$0xff] }
   0x8   :  { %316 = vmatpush.bf16.msra.mxu2 %v518_v6  ;;  %v524_v15 = vld [vmem:[%s692_s1 + $0xe0] sm:$0xff] }
   0x9   :  { %329 = vmatpush.bf16.msra.mxu3 %v526_v7  ;;  %v18_v16 = vld [vmem:[%s691_s0] sm:$0xff] }
   0xa   :  { %291 = vmatpush.bf16.msra.mxu0 %v501_v8  ;;  %20 = vst [vmem:[#allocation1] ss:$4 sm:$0xff] %v18_v16 }
   0xb   :  { %304 = vmatpush.bf16.msra.mxu1 %v509_v9 }
   0xc   :  { %317 = vmatpush.bf16.msra.mxu2 %v517_v10 }
   0xd   :  { %330 = vmatpush.bf16.msra.mxu3 %v525_v11 }
   0xe   :  { %9 = vsyncpa [#allocation3], 0  ;;  %292 = vmatpush.bf16.msra.mxu0 %v500_v12  ;;  %v499_v17 = vld [vmem:[%s692_s1 + $0x18] sm:$0xff]  ;;  %v498_v21 = vld [vmem:[%s692_s1 + $0x10] sm:$0xff]  ;;  %s557_s30 = smov [#allocation2]   ;;  %s359_s8 = sshll.u32 %s695_s4, 4  ;;  %s360_s8 = int_to_ptr.hbm [resolvable:$true] %s359_s8 }
   0xf   :  { %305 = vmatpush.bf16.msra.mxu1 %v508_v13  ;;  %v507_v18 = vld [vmem:[%s692_s1 + $0x58] sm:$0xff]  ;;  %v506_v22 = vld [vmem:[%s692_s1 + $0x50] sm:$0xff]  ;;  %v497_v25 = vld [vmem:[%s692_s1 + $0x8] sm:$0xff]  ;;  %s357_s5 = sshll.u32 %s557_s30, 4  ;;  %s358_s5 = int_to_ptr.vmem [resolvable:$true] %s357_s5 }
  0x10   :  { %318 = vmatpush.bf16.msra.mxu2 %v516_v14  ;;  %v515_v19 = vld [vmem:[%s692_s1 + $0x98] sm:$0xff]  ;;  %v514_v23 = vld [vmem:[%s692_s1 + $0x90] sm:$0xff]  ;;  %v505_v26 = vld [vmem:[%s692_s1 + $0x48] sm:$0xff] }
  0x11   :  { %331 = vmatpush.bf16.msra.mxu3 %v524_v15  ;;  %v523_v20 = vld [vmem:[%s692_s1 + $0xd8] sm:$0xff]  ;;  %v522_v24 = vld [vmem:[%s692_s1 + $0xd0] sm:$0xff]  ;;  %v513_v27 = vld [vmem:[%s692_s1 + $0x88] sm:$0xff] }
  0x12   :  { %293 = vmatpush.bf16.msra.mxu0 %v499_v17  ;;  %v521_v28 = vld [vmem:[%s692_s1 + $0xc8] sm:$0xff]  ;;  %v496_v29 = vld [vmem:[%s692_s1] sm:$0xff]  ;;  %v23_v35 = vld.sshfl [vmem:[#allocation1 + $0x10] sm:$0xff pattern:$0x73625140] }
  0x13   :  { %306 = vmatpush.bf16.msra.mxu1 %v507_v18  ;;  %v504_v30 = vld [vmem:[%s692_s1 + $0x40] sm:$0xff]  ;;  %v22_v34 = vld.sshfl [vmem:[#allocation1 + $0x8] sm:$0xff pattern:$0x73625140]  ;;  %v31_v39 = vpack.c.bf16 %v23_v35, %v23_v35 }
  0x14   :  { %319 = vmatpush.bf16.msra.mxu2 %v515_v19  ;;  %v512_v31 = vld [vmem:[%s692_s1 + $0x80] sm:$0xff]  ;;  %v24_v36 = vld.sshfl [vmem:[#allocation1 + $0x18] sm:$0xff pattern:$0x73625140]  ;;  %v30_v38 = vpack.c.bf16 %v22_v34, %v22_v34 }
  0x15   :  { %332 = vmatpush.bf16.msra.mxu3 %v523_v20  ;;  %v520_v32 = vld [vmem:[%s692_s1 + $0xc0] sm:$0xff]  ;;  %v32_v40 = vpack.c.bf16 %v24_v36, %v24_v36 }
  0x16   :  { %294 = vmatpush.bf16.msra.mxu0 %v498_v21  ;;  %v21_v33 = vld.sshfl [vmem:[#allocation1] sm:$0xff pattern:$0x73625140] }
  0x17   :  { %307 = vmatpush.bf16.msra.mxu1 %v506_v22  ;;  %v29_v37 = vpack.c.bf16 %v21_v33, %v21_v33  ;;  %v529_v47 = vld [vmem:[%s693_s2] ss:$0 sm:$0xff] }
  0x18   :  { %320 = vmatpush.bf16.msra.mxu2 %v514_v23  ;;  %v530_v51 = vld [vmem:[%s694_s3] ss:$0 sm:$0xff] }
  0x19   :  { %333 = vmatpush.bf16.msra.mxu3 %v522_v24 }
  0x1a   :  { %295 = vmatpush.bf16.msra.mxu0 %v497_v25 }
  0x1b   :  { %308 = vmatpush.bf16.msra.mxu1 %v505_v26 }
  0x1c   :  { %321 = vmatpush.bf16.msra.mxu2 %v513_v27 }
  0x1d   :  { %334 = vmatpush.bf16.msra.mxu3 %v521_v28 }
  0x1e   :  { %296 = vmatpush.bf16.msra.mxu0 %v496_v29 }
  0x1f   :  { %309 = vmatpush.bf16.msra.mxu1 %v504_v30 }
  0x20   :  { %322 = vmatpush.bf16.msra.mxu2 %v512_v31 }
  0x21   :  { %335 = vmatpush.bf16.msra.mxu3 %v520_v32  ;;  %297 = vmatmul.bf16.vlgmr.msra.gmra.mxu0 %v29_v37 }
  0x22   :  { %310 = vmatmul.bf16.vlgmr.msra.gmra.mxu1 %v30_v38 }
  0x23   :  { %323 = vmatmul.bf16.vlgmr.msra.gmra.mxu2 %v31_v39 }
  0x24   :  { %336 = vmatmul.bf16.vlgmr.msra.gmra.mxu3 %v32_v40 }
  0x9e   :  { %v298_v41 = vpop.f32.mrf.mxu0 }
  0x9f   :  { %v311_v42 = vpop.f32.mrf.mxu1 }
  0xa0   :  { %v312_v43 = vadd.f32 %v311_v42, %v298_v41 }
  0xa6   :  { %v324_v44 = vpop.f32.mrf.mxu2  ;;  %v300_v48 = vpop.f32.mrf.mxu0 }
  0xa7   :  { %v337_v45 = vpop.f32.mrf.mxu3  ;;  %v325_v46 = vadd.f32 %v324_v44, %v312_v43  ;;  %v313_v49 = vpop.f32.mrf.mxu1 }
  0xa9   :  { %v338_v50 = vadd.f32 %v337_v45, %v325_v46 }
  0xab   :  { %v345_v52 = vmul.f32 %v529_v47, %v338_v50 }
  0xad   :  { %v350_v53 = vadd.f32 %v530_v51, %v345_v52 }
  0xae   :  { %v326_v54 = vpop.f32.mrf.mxu2 }
  0xaf   :  { %v339_v55 = vpop.f32.mrf.mxu3  ;;  %351 = vst [vmem:[#allocation2] sm:$0x3] %v350_v53 }
  0xb0   :  { %362 = dma.vmem_to_hbm [thread:$0]  %s358_s5, 32, %s360_s8, [#allocation3]  }
  0xb1   :  { %555 = dma.done.wait [#allocation3], 32  }
  0xb2   :  { %556 = vsyncadd [#allocation3], 4294967264 }
  0xb3   :  { %367 = vsyncpa [#allocation3], 1 }

// kernel: itiny_resnet_forward.2
= control target key start
LH: loop header
LB: loop body
LE: loop exit
PB: predicated region body
PF: predicated region fallthrough
CT: control target
= control target key end

     0   :  { %s3744_s21 = smov 0   ;;  %s5657_s0 = inlined_call_operand.vmem [shape: bf16[128,128], index: 0, kind: input, shape index: {}]   ;;  %s5658_s1 = inlined_call_operand.vmem [shape: bf16[128,8], index: 1, kind: input, shape index: {}]   ;;  %s5659_s2 = inlined_call_operand.vmem [shape: f32[1,8], index: 2, kind: input, shape index: {}]   ;;  %s5660_s3 = inlined_call_operand.vmem [shape: f32[1,8], index: 3, kind: input, shape index: {}]   ;;  %s5661_s4 = inlined_call_operand.vmem [shape: bf16[2,72,8], index: 4, kind: input, shape index: {}]   ;;  %s5662_s5 = inlined_call_operand.vmem [shape: f32[2,1,8], index: 5, kind: input, shape index: {}]   ;;  %s5663_s6 = inlined_call_operand.vmem [shape: f32[2,1,8], index: 6, kind: input, shape index: {}]   ;;  %s5664_s7 = inlined_call_operand.vmem [shape: f32[2,1,8], index: 7, kind: input, shape index: {}]   ;;  %s5665_s8 = inlined_call_operand.vmem [shape: bf16[2,72,8], index: 8, kind: input, shape index: {}]   ;;  %s5666_s9 = inlined_call_operand.vmem [shape: f32[2,1,8], index: 9, kind: input, shape index: {}]   ;;  %s5667_s10 = inlined_call_operand.vmem [shape: f32[2,1,8], index: 10, kind: input, shape index: {}]   ;;  %s5668_s11 = inlined_call_operand.vmem [shape: f32[2,1,8], index: 11, kind: input, shape index: {}]   ;;  %s5669_s12 = inlined_call_operand.vmem [shape: f32[128,8], index: 12, kind: output, shape index: {}]  }
   0x1 LB: > { %5690 = sst [smem:[#allocation4_spill]] %s3668_s21  ;;  %s3750_s22 = sadd.s32 4294967295, %s3668_s21   ;;  %s3668_s21 = sphi %s3744_s21, %s22_s21  }
   0x2   : > { %p2819_p0 = scmp.ge.s32.totalorder %s3668_s21, 1  ;;  %p415_p1 = scmp.lt.s32.totalorder %s3668_s21, 3 }
   0x4   : > { %p416_p2 = pnand %p2819_p0, %p415_p1 }
   0x6   : > { %419 = sbr.rel (%p416_p2) target bundleno = 1084 (0x43c), region = 68 }
   0xb   : > { %p475_p3 = scmp.lt.s32.totalorder %s3750_s22, 1  ;;  %p2822_p4 = scmp.ne.s32.totalorder %s3750_s22, 0 }
   0xd   : > { %s3756_s23 = scalar_select %p475_p3, %s3750_s22, 1 }
   0xe   : > { %507 = sbr.rel (%p2822_p4) target bundleno = 216 (0xd8), region = 72 }
   0xf   : > { %s2996_s24 = smul.u32 36, %s3756_s23 }
  0x11   : > { %s3774_s18 = scalar_lea.vmem %s5661_s4, %s2996_s24  ;;  %s3779_s21 = scalar_lea.vmem %s5665_s8, %s2996_s24 }
  0x13   : > { %v2953_v0 = vld [vmem:[%s5658_s1 + $0x38] sm:$0xff]  ;;  %v2952_v1 = vld [vmem:[%s5658_s1 + $0x30] sm:$0xff]  ;;  %v2951_v2 = vld [vmem:[%s5658_s1 + $0x28] sm:$0xff]  ;;  %vm508_vm0 = vcmask 64512   ;;  %v3670_v6 = vmov 0.0   ;;  %vm510_vm1 = vcmask 58368  }
  0x14   : > { %718 = vmatpush.bf16.msra.mxu0 %v2953_v0  ;;  %2962 = vmatpush.bf16.msra.mxu1 %v2953_v0  ;;  %v2950_v3 = vld [vmem:[%s5658_s1 + $0x20] sm:$0xff]  ;;  %v2949_v4 = vld [vmem:[%s5658_s1 + $0x18] sm:$0xff]  ;;  %v2948_v5 = vld [vmem:[%s5658_s1 + $0x10] sm:$0xff]  ;;  %509 = vst.msk [vmem:[#allocation2] sm:$0xff] %vm508_vm0, %v3670_v6 }
  0x15   : > { %2963 = vmatpush.bf16.msra.mxu2 %v2953_v0  ;;  %2964 = vmatpush.bf16.msra.mxu3 %v2953_v0  ;;  %511 = vst.msk [vmem:[#allocation2 + $0x8] sm:$0x3] %vm510_vm1, %v3670_v6  ;;  %v2947_v7 = vld [vmem:[%s5658_s1 + $0x8] sm:$0xff]  ;;  %v2946_v8 = vld [vmem:[%s5658_s1] sm:$0xff]  ;;  %v2940_v10 = vld [vmem:[%s5657_s0 + $0x10] sm:$0xff] }
  0x16   : > { %512 = vst.msk [vmem:[#allocation2 + $0x10] sm:$0xff] %vm508_vm0, %v3670_v6  ;;  %v2938_v9 = vld [vmem:[%s5657_s0] sm:$0xff]  ;;  %v2944_v12 = vld [vmem:[%s5657_s0 + $0x30] sm:$0xff]  ;;  %v2939_v13 = vld [vmem:[%s5657_s0 + $0x8] sm:$0xff] }
  0x17   : > { %513 = vst.msk [vmem:[#allocation2 + $0x18] sm:$0x3] %vm510_vm1, %v3670_v6  ;;  %v2942_v11 = vld [vmem:[%s5657_s0 + $0x20] sm:$0xff]  ;;  %v2941_v14 = vld [vmem:[%s5657_s0 + $0x18] sm:$0xff]  ;;  %v2943_v15 = vld [vmem:[%s5657_s0 + $0x28] sm:$0xff] }
  0x18   : > { %719 = vmatpush.bf16.msra.mxu0 %v2952_v1  ;;  %2965 = vmatpush.bf16.msra.mxu1 %v2952_v1  ;;  %528 = vst.msk [vmem:[#allocation2 + $0x90] sm:$0xff] %vm508_vm0, %v3670_v6  ;;  %v2945_v16 = vld [vmem:[%s5657_s0 + $0x38] sm:$0xff]  ;;  %v4005_v17 = vld [vmem:[%s5659_s2] ss:$0 sm:$0xff] }
  0x19   : > { %2966 = vmatpush.bf16.msra.mxu2 %v2952_v1  ;;  %2967 = vmatpush.bf16.msra.mxu3 %v2952_v1  ;;  %529 = vst.msk [vmem:[#allocation2 + $0x98] sm:$0x3] %vm510_vm1, %v3670_v6  ;;  %v4010_v18 = vld [vmem:[%s5660_s3] ss:$0 sm:$0xff] }
  0x1a   : > { %530 = vst.msk [vmem:[#allocation2 + $0xa0] sm:$0xff] %vm508_vm0, %v3670_v6 }
  0x1b   : > { %531 = vst.msk [vmem:[#allocation2 + $0xa8] sm:$0x3] %vm510_vm1, %v3670_v6 }
  0x1c   : > { %720 = vmatpush.bf16.msra.mxu0 %v2951_v2  ;;  %2968 = vmatpush.bf16.msra.mxu1 %v2951_v2  ;;  %548 = vst.msk [vmem:[#allocation2 + $0x130] sm:$0xff] %vm508_vm0, %v3670_v6 }
  0x1d   : > { %2969 = vmatpush.bf16.msra.mxu2 %v2951_v2  ;;  %2970 = vmatpush.bf16.msra.mxu3 %v2951_v2  ;;  %549 = vst.msk [vmem:[#allocation2 + $0x138] sm:$0x3] %vm510_vm1, %v3670_v6 }
  0x1e   : > { %550 = vst.msk [vmem:[#allocation3] sm:$0xff] %vm508_vm0, %v3670_v6 }
  0x1f   : > { %551 = vst.msk [vmem:[#allocation3 + $0x8] sm:$0x3] %vm510_vm1, %v3670_v6 }
  0x20   : > { %721 = vmatpush.bf16.msra.mxu0 %v2950_v3  ;;  %2971 = vmatpush.bf16.msra.mxu1 %v2950_v3  ;;  %552 = vst.msk [vmem:[#allocation3 + $0x10] sm:$0xff] %vm508_vm0, %v3670_v6 }
  0x21   : > { %2972 = vmatpush.bf16.msra.mxu2 %v2950_v3  ;;  %2973 = vmatpush.bf16.msra.mxu3 %v2950_v3  ;;  %553 = vst.msk [vmem:[#allocation3 + $0x18] sm:$0x3] %vm510_vm1, %v3670_v6 }
  0x22   : > { %554 = vst.msk [vmem:[#allocation3 + $0x20] sm:$0xff] %vm508_vm0, %v3670_v6 }
  0x23   : > { %555 = vst.msk [vmem:[#allocation3 + $0x28] sm:$0x3] %vm510_vm1, %v3670_v6 }
  0x24   : > { %722 = vmatpush.bf16.msra.mxu0 %v2949_v4  ;;  %2974 = vmatpush.bf16.msra.mxu1 %v2949_v4  ;;  %556 = vst.msk [vmem:[#allocation3 + $0x30] sm:$0xff] %vm508_vm0, %v3670_v6 }
  0x25   : > { %2975 = vmatpush.bf16.msra.mxu2 %v2949_v4  ;;  %2976 = vmatpush.bf16.msra.mxu3 %v2949_v4  ;;  %557 = vst.msk [vmem:[#allocation3 + $0x38] sm:$0x3] %vm510_vm1, %v3670_v6 }
  0x26   : > { %558 = vst.msk [vmem:[#allocation3 + $0x40] sm:$0xff] %vm508_vm0, %v3670_v6 }
  0x27   : > { %559 = vst.msk [vmem:[#allocation3 + $0x48] sm:$0x3] %vm510_vm1, %v3670_v6 }
  0x28   : > { %723 = vmatpush.bf16.msra.mxu0 %v2948_v5  ;;  %2977 = vmatpush.bf16.msra.mxu1 %v2948_v5  ;;  %560 = vst.msk [vmem:[#allocation3 + $0x50] sm:$0xff] %vm508_vm0, %v3670_v6 }
  0x29   : > { %2978 = vmatpush.bf16.msra.mxu2 %v2948_v5  ;;  %2979 = vmatpush.bf16.msra.mxu3 %v2948_v5  ;;  %561 = vst.msk [vmem:[#allocation3 + $0x58] sm:$0x3] %vm510_vm1, %v3670_v6 }
  0x2a   : > { %562 = vst.msk [vmem:[#allocation3 + $0x60] sm:$0xff] %vm508_vm0, %v3670_v6 }
  0x2b   : > { %563 = vst.msk [vmem:[#allocation3 + $0x68] sm:$0x3] %vm510_vm1, %v3670_v6 }
  0x2c   : > { %724 = vmatpush.bf16.msra.mxu0 %v2947_v7  ;;  %2980 = vmatpush.bf16.msra.mxu1 %v2947_v7  ;;  %564 = vst.msk [vmem:[#allocation3 + $0x70] sm:$0xff] %vm508_vm0, %v3670_v6 }
  0x2d   : > { %2981 = vmatpush.bf16.msra.mxu2 %v2947_v7  ;;  %2982 = vmatpush.bf16.msra.mxu3 %v2947_v7  ;;  %565 = vst.msk [vmem:[#allocation3 + $0x78] sm:$0x3] %vm510_vm1, %v3670_v6 }
  0x2e   : > { %566 = vst.msk [vmem:[#allocation3 + $0x80] sm:$0xff] %vm508_vm0, %v3670_v6 }
  0x2f   : > { %567 = vst.msk [vmem:[#allocation3 + $0x88] sm:$0x3] %vm510_vm1, %v3670_v6 }
  0x30   : > { %725 = vmatpush.bf16.msra.mxu0 %v2946_v8  ;;  %2983 = vmatpush.bf16.msra.mxu1 %v2946_v8  ;;  %568 = vst.msk [vmem:[#allocation3 + $0x90] sm:$0xff] %vm508_vm0, %v3670_v6 }
  0x31   : > { %2984 = vmatpush.bf16.msra.mxu2 %v2946_v8  ;;  %2985 = vmatpush.bf16.msra.mxu3 %v2946_v8  ;;  %569 = vst.msk [vmem:[#allocation3 + $0x98] sm:$0x3] %vm510_vm1, %v3670_v6 }
  0x32   : > { %570 = vst.msk [vmem:[#allocation3 + $0xa0] sm:$0xff] %vm508_vm0, %v3670_v6 }
  0x33   : > { %726 = vmatmul.bf16.vlgmr.msra.gmra.mxu0 %v2938_v9  ;;  %736 = vmatmul.bf16.vlgmr.msra.gmra.mxu1 %v2940_v10  ;;  %571 = vst.msk [vmem:[#allocation3 + $0xa8] sm:$0x3] %vm510_vm1, %v3670_v6 }
  0x34   : > { %746 = vmatmul.bf16.vlgmr.msra.gmra.mxu2 %v2942_v11  ;;  %756 = vmatmul.bf16.vlgmr.msra.gmra.mxu3 %v2944_v12  ;;  %572 = vst.msk [vmem:[#allocation3 + $0xb0] sm:$0xff] %vm508_vm0, %v3670_v6 }
  0x35   : > { %573 = vst.msk [vmem:[#allocation3 + $0xb8] sm:$0x3] %vm510_vm1, %v3670_v6 }
  0x36   : > { %574 = vst.msk [vmem:[#allocation3 + $0xc0] sm:$0xff] %vm508_vm0, %v3670_v6 }
  0x37   : > { %575 = vst.msk [vmem:[#allocation3 + $0xc8] sm:$0x3] %vm510_vm1, %v3670_v6 }
  0x38   : > { %576 = vst.msk [vmem:[#allocation3 + $0xd0] sm:$0xff] %vm508_vm0, %v3670_v6 }
  0x39   : > { %577 = vst.msk [vmem:[#allocation3 + $0xd8] sm:$0x3] %vm510_vm1, %v3670_v6 }
  0x3a   : > { %578 = vst.msk [vmem:[#allocation3 + $0xe0] sm:$0xff] %vm508_vm0, %v3670_v6 }
  0x3b   : > { %579 = vst.msk [vmem:[#allocation3 + $0xe8] sm:$0x3] %vm510_vm1, %v3670_v6 }
  0x3c   : > { %580 = vst.msk [vmem:[#allocation3 + $0xf0] sm:$0xff] %vm508_vm0, %v3670_v6 }
  0x3d   : > { %581 = vst.msk [vmem:[#allocation3 + $0xf8] sm:$0x3] %vm510_vm1, %v3670_v6 }
  0x3e   : > { %582 = vst.msk [vmem:[#allocation3 + $0x100] sm:$0xff] %vm508_vm0, %v3670_v6 }
  0x3f   : > { %583 = vst.msk [vmem:[#allocation3 + $0x108] sm:$0x3] %vm510_vm1, %v3670_v6 }
  0x40   : > { %584 = vst.msk [vmem:[#allocation3 + $0x110] sm:$0xff] %vm508_vm0, %v3670_v6 }
  0x41   : > { %585 = vst.msk [vmem:[#allocation3 + $0x118] sm:$0x3] %vm510_vm1, %v3670_v6 }
  0x42   : > { %586 = vst.msk [vmem:[#allocation3 + $0x120] sm:$0xff] %vm508_vm0, %v3670_v6 }
  0x43   : > { %731 = vmatmul.bf16.gmra.mxu0 %v2939_v13  ;;  %741 = vmatmul.bf16.gmra.mxu1 %v2941_v14  ;;  %587 = vst.msk [vmem:[#allocation3 + $0x128] sm:$0x3] %vm510_vm1, %v3670_v6 }
  0x44   : > { %751 = vmatmul.bf16.gmra.mxu2 %v2943_v15  ;;  %761 = vmatmul.bf16.gmra.mxu3 %v2945_v16  ;;  %588 = vst.msk [vmem:[#allocation3 + $0x130] sm:$0xff] %vm508_vm0, %v3670_v6 }
  0x45   : > { %589 = vst.msk [vmem:[#allocation3 + $0x138] sm:$0x3] %vm510_vm1, %v3670_v6 }
  0x46   : > { %514 = vst.msk [vmem:[#allocation2 + $0x20] sm:$0xff] %vm508_vm0, %v3670_v6 }
  0x47   : > { %515 = vst.msk [vmem:[#allocation2 + $0x28] sm:$0x3] %vm510_vm1, %v3670_v6 }
  0x48   : > { %516 = vst.msk [vmem:[#allocation2 + $0x30] sm:$0xff] %vm508_vm0, %v3670_v6 }
  0x49   : > { %517 = vst.msk [vmem:[#allocation2 + $0x38] sm:$0x3] %vm510_vm1, %v3670_v6 }
  0x4a   : > { %518 = vst.msk [vmem:[#allocation2 + $0x40] sm:$0xff] %vm508_vm0, %v3670_v6 }
  0x4b   : > { %519 = vst.msk [vmem:[#allocation2 + $0x48] sm:$0x3] %vm510_vm1, %v3670_v6 }
  0x4c   : > { %520 = vst.msk [vmem:[#allocation2 + $0x50] sm:$0xff] %vm508_vm0, %v3670_v6 }
  0x4d   : > { %521 = vst.msk [vmem:[#allocation2 + $0x58] sm:$0x3] %vm510_vm1, %v3670_v6 }
  0x4e   : > { %522 = vst.msk [vmem:[#allocation2 + $0x60] sm:$0xff] %vm508_vm0, %v3670_v6 }
  0x4f   : > { %523 = vst.msk [vmem:[#allocation2 + $0x68] sm:$0x3] %vm510_vm1, %v3670_v6 }
  0x50   : > { %524 = vst.msk [vmem:[#allocation2 + $0x70] sm:$0xff] %vm508_vm0, %v3670_v6 }
  0x51   : > { %525 = vst.msk [vmem:[#allocation2 + $0x78] sm:$0x3] %vm510_vm1, %v3670_v6 }
  0x52   : > { %526 = vst.msk [vmem:[#allocation2 + $0x80] sm:$0xff] %vm508_vm0, %v3670_v6 }
  0x53   : > { %527 = vst.msk [vmem:[#allocation2 + $0x88] sm:$0x3] %vm510_vm1, %v3670_v6 }
  0x54   : > { %532 = vst.msk [vmem:[#allocation2 + $0xb0] sm:$0xff] %vm508_vm0, %v3670_v6 }
  0x55   : > { %533 = vst.msk [vmem:[#allocation2 + $0xb8] sm:$0x3] %vm510_vm1, %v3670_v6 }
  0x56   : > { %534 = vst.msk [vmem:[#allocation2 + $0xc0] sm:$0xff] %vm508_vm0, %v3670_v6 }
  0x57   : > { %535 = vst.msk [vmem:[#allocation2 + $0xc8] sm:$0x3] %vm510_vm1, %v3670_v6 }
  0x58   : > { %536 = vst.msk [vmem:[#allocation2 + $0xd0] sm:$0xff] %vm508_vm0, %v3670_v6 }
  0x59   : > { %537 = vst.msk [vmem:[#allocation2 + $0xd8] sm:$0x3] %vm510_vm1, %v3670_v6 }
  0x5a   : > { %538 = vst.msk [vmem:[#allocation2 + $0xe0] sm:$0xff] %vm508_vm0, %v3670_v6 }
  0x5b   : > { %539 = vst.msk [vmem:[#allocation2 + $0xe8] sm:$0x3] %vm510_vm1, %v3670_v6 }
  0x5c   : > { %540 = vst.msk [vmem:[#allocation2 + $0xf0] sm:$0xff] %vm508_vm0, %v3670_v6 }
  0x5d   : > { %541 = vst.msk [vmem:[#allocation2 + $0xf8] sm:$0x3] %vm510_vm1, %v3670_v6 }
  0x5e   : > { %542 = vst.msk [vmem:[#allocation2 + $0x100] sm:$0xff] %vm508_vm0, %v3670_v6 }
  0x5f   : > { %543 = vst.msk [vmem:[#allocation2 + $0x108] sm:$0x3] %vm510_vm1, %v3670_v6 }
  0x60   : > { %544 = vst.msk [vmem:[#allocation2 + $0x110] sm:$0xff] %vm508_vm0, %v3670_v6 }
  0x61   : > { %545 = vst.msk [vmem:[#allocation2 + $0x118] sm:$0x3] %vm510_vm1, %v3670_v6 }
  0x62   : > { %546 = vst.msk [vmem:[#allocation2 + $0x120] sm:$0xff] %vm508_vm0, %v3670_v6 }
  0x63   : > { %547 = vst.msk [vmem:[#allocation2 + $0x128] sm:$0x3] %vm510_vm1, %v3670_v6 }
  0xb0   : > { %v727_v19 = vpop.f32.mrf.mxu0  ;;  %v737_v20 = vpop.f32.mrf.mxu1 }
  0xb1   : > { %v771_v21 = vmul.f32 %v4005_v17, %v727_v19  ;;  %v775_v22 = vmul.f32 %v4005_v17, %v737_v20 }
  0xb3   : > { %v791_v23 = vadd.f32 %v4010_v18, %v771_v21  ;;  %v795_v24 = vadd.f32 %v4010_v18, %v775_v22 }
  0xb5   : > { %v807_v25 = vmax.f32 %v791_v23, 0.0  ;;  %v811_v26 = vmax.f32 %v795_v24, 0.0 }
  0xb7   : > { %824 = vst.msk [vmem:[#allocation2 + $0x11] sm:$0xff] %vm508_vm0, %v807_v25  ;;  %v747_v27 = vpop.f32.mrf.mxu2  ;;  %v757_v28 = vpop.f32.mrf.mxu3 }
  0xb8   : > { %828 = vst.msk [vmem:[#allocation2 + $0x51] sm:$0xff] %vm508_vm0, %v811_v26  ;;  %v779_v29 = vmul.f32 %v4005_v17, %v747_v27  ;;  %v783_v30 = vmul.f32 %v4005_v17, %v757_v28  ;;  %v729_v31 = vpop.f32.mrf.mxu0  ;;  %v739_v32 = vpop.f32.mrf.mxu1 }
  0xb9   : > { %v772_v33 = vmul.f32 %v4005_v17, %v729_v31  ;;  %v776_v34 = vmul.f32 %v4005_v17, %v739_v32 }
  0xba   : > { %v799_v35 = vadd.f32 %v4010_v18, %v779_v29  ;;  %v803_v36 = vadd.f32 %v4010_v18, %v783_v30 }
  0xbb   : > { %v792_v37 = vadd.f32 %v4010_v18, %v772_v33  ;;  %v796_v38 = vadd.f32 %v4010_v18, %v776_v34 }
  0xbc   : > { %v815_v39 = vmax.f32 %v799_v35, 0.0  ;;  %v819_v40 = vmax.f32 %v803_v36, 0.0 }
  0xbd   : > { %v808_v41 = vmax.f32 %v792_v37, 0.0  ;;  %v812_v42 = vmax.f32 %v796_v38, 0.0 }
  0xbe   : > { %832 = vst.msk [vmem:[#allocation2 + $0xb1] sm:$0xff] %vm508_vm0, %v815_v39 }
  0xbf   : > { %836 = vst.msk [vmem:[#allocation2 + $0xf1] sm:$0xff] %vm508_vm0, %v819_v40  ;;  %v749_v43 = vpop.f32.mrf.mxu2  ;;  %v759_v44 = vpop.f32.mrf.mxu3 }
  0xc0   : > { %825 = vst.msk [vmem:[#allocation2 + $0x21] sm:$0xff] %vm508_vm0, %v808_v41  ;;  %v780_v45 = vmul.f32 %v4005_v17, %v749_v43  ;;  %v784_v46 = vmul.f32 %v4005_v17, %v759_v44  ;;  %v732_v47 = vpop.f32.mrf.mxu0  ;;  %v742_v48 = vpop.f32.mrf.mxu1 }
  0xc1   : > { %829 = vst.msk [vmem:[#allocation2 + $0x61] sm:$0xff] %vm508_vm0, %v812_v42  ;;  %v773_v49 = vmul.f32 %v4005_v17, %v732_v47  ;;  %v777_v50 = vmul.f32 %v4005_v17, %v742_v48 }
  0xc2   : > { %v800_v51 = vadd.f32 %v4010_v18, %v780_v45  ;;  %v804_v52 = vadd.f32 %v4010_v18, %v784_v46 }
  0xc3   : > { %v793_v53 = vadd.f32 %v4010_v18, %v773_v49  ;;  %v797_v54 = vadd.f32 %v4010_v18, %v777_v50 }
  0xc4   : > { %v816_v55 = vmax.f32 %v800_v51, 0.0  ;;  %v820_v56 = vmax.f32 %v804_v52, 0.0 }
  0xc5   : > { %v809_v57 = vmax.f32 %v793_v53, 0.0  ;;  %v813_v58 = vmax.f32 %v797_v54, 0.0 }
  0xc6   : > { %833 = vst.msk [vmem:[#allocation2 + $0xc1] sm:$0xff] %vm508_vm0, %v816_v55 }
  0xc7   : > { %837 = vst.msk [vmem:[#allocation2 + $0x101] sm:$0xff] %vm508_vm0, %v820_v56  ;;  %v752_v59 = vpop.f32.mrf.mxu2  ;;  %v762_v60 = vpop.f32.mrf.mxu3 }
  0xc8   : > { %826 = vst.msk [vmem:[#allocation2 + $0x31] sm:$0xff] %vm508_vm0, %v809_v57  ;;  %v781_v61 = vmul.f32 %v4005_v17, %v752_v59  ;;  %v785_v62 = vmul.f32 %v4005_v17, %v762_v60  ;;  %v734_v63 = vpop.f32.mrf.mxu0  ;;  %v744_v0 = vpop.f32.mrf.mxu1 }
  0xc9   : > { %830 = vst.msk [vmem:[#allocation2 + $0x71] sm:$0xff] %vm508_vm0, %v813_v58  ;;  %v774_v1 = vmul.f32 %v4005_v17, %v734_v63  ;;  %v778_v2 = vmul.f32 %v4005_v17, %v744_v0 }
  0xca   : > { %v801_v3 = vadd.f32 %v4010_v18, %v781_v61  ;;  %v805_v4 = vadd.f32 %v4010_v18, %v785_v62 }
  0xcb   : > { %v794_v5 = vadd.f32 %v4010_v18, %v774_v1  ;;  %v798_v6 = vadd.f32 %v4010_v18, %v778_v2 }
  0xcc   : > { %v817_v7 = vmax.f32 %v801_v3, 0.0  ;;  %v821_v8 = vmax.f32 %v805_v4, 0.0 }
  0xcd   : > { %v810_v9 = vmax.f32 %v794_v5, 0.0  ;;  %v814_v10 = vmax.f32 %v798_v6, 0.0 }
  0xce   : > { %834 = vst.msk [vmem:[#allocation2 + $0xd1] sm:$0xff] %vm508_vm0, %v817_v7 }
  0xcf   : > { %838 = vst.msk [vmem:[#allocation2 + $0x111] sm:$0xff] %vm508_vm0, %v821_v8  ;;  %v754_v11 = vpop.f32.mrf.mxu2  ;;  %v764_v12 = vpop.f32.mrf.mxu3 }
  0xd0   : > { %827 = vst.msk [vmem:[#allocation2 + $0x41] sm:$0xff] %vm508_vm0, %v810_v9  ;;  %v782_v13 = vmul.f32 %v4005_v17, %v754_v11  ;;  %v786_v14 = vmul.f32 %v4005_v17, %v764_v12 }
  0xd1   : > { %831 = vst.msk [vmem:[#allocation2 + $0x81] sm:$0xff] %vm508_vm0, %v814_v10 }
  0xd2   : > { %v802_v15 = vadd.f32 %v4010_v18, %v782_v13  ;;  %v806_v16 = vadd.f32 %v4010_v18, %v786_v14 }
  0xd4   : > { %v818_v19 = vmax.f32 %v802_v15, 0.0  ;;  %v822_v20 = vmax.f32 %v806_v16, 0.0 }
  0xd6   : > { %835 = vst.msk [vmem:[#allocation2 + $0xe1] sm:$0xff] %vm508_vm0, %v818_v19 }
  0xd7   : > { %839 = vst.msk [vmem:[#allocation2 + $0x121] sm:$0xff] %vm508_vm0, %v822_v20 }
  0xd8 PF: > { %v4060_v21 = vld [vmem:[#allocation2 + $0x40] sm:$0xff]  ;;  %v4062_v22 = vld [vmem:[#allocation2 + $0x48] sm:$0x3]  ;;  %v4064_v23 = vld [vmem:[#allocation2 + $0x50] sm:$0xff]  ;;  %vm912_vm2 = vcmask 1046528   ;;  %s3671_s19 = smov 8   ;;  %s5708_s17 = scalar_lea.vmem %s5662_s5, %s3756_s23 }
  0xd9   : > { %v4066_v17 = vld [vmem:[#allocation2 + $0x58] sm:$0x3]  ;;  %v925_v24 = vrot.slane %v4060_v21, 1  ;;  %v926_v18 = vrot.slane %v4062_v22, 1  ;;  %v928_v25 = vrot.slane %v4064_v23, 1  ;;  %v4071_v26 = vld [vmem:[#allocation2] sm:$0xff]  ;;  %s5709_s30 = scalar_lea.vmem %s5663_s6, %s3756_s23 }
  0xda   : > { %v929_v27 = vrot.slane %v4066_v17, 1  ;;  %v4074_v28 = vld [vmem:[#allocation2 + $0x8] sm:$0x3]  ;;  %v4076_v29 = vld [vmem:[#allocation2 + $0x10] sm:$0xff]  ;;  %v4078_v30 = vld [vmem:[#allocation2 + $0x18] sm:$0x3] }
  0xdb   : > { %v4081_v31 = vsel %vm912_vm2, %v925_v24, %v926_v18  ;;  %v913_v32 = vrot.slane %v4071_v26, 1  ;;  %v914_v33 = vrot.slane %v4074_v28, 1  ;;  %v916_v34 = vrot.slane %v4076_v29, 1  ;;  %v4086_v35 = vld [vmem:[#allocation2 + $0x60] sm:$0xff]  ;;  %v4088_v36 = vld [vmem:[#allocation2 + $0x68] sm:$0x3] }
  0xdc   : > { %5691 = vst [vmem:[#allocation5_spill] sm:$0xff] %v4081_v31  ;;  %v4091_v37 = vsel %vm912_vm2, %v928_v25, %v929_v27  ;;  %v917_v38 = vrot.slane %v4078_v30, 1  ;;  %v4094_v39 = vld [vmem:[#allocation2 + $0x70] sm:$0xff]  ;;  %v4096_v40 = vld [vmem:[#allocation2 + $0x78] sm:$0x3]  ;;  %v931_v41 = vrot.slane %v4086_v35, 1 }
  0xdd   : > { %5692 = vst [vmem:[#allocation6_spill] sm:$0xff] %v4091_v37  ;;  %v4101_v42 = vpack.i.bf16 %v4091_v37, %v4081_v31  ;;  %v915_v43 = vsel %vm912_vm2, %v913_v32, %v914_v33  ;;  %v932_v44 = vrot.slane %v4088_v36, 1  ;;  %v934_v45 = vrot.slane %v4094_v39, 1  ;;  %v4106_v46 = vld [vmem:[#allocation2 + $0x20] sm:$0xff]  ;;  %v4108_v47 = vld [vmem:[#allocation2 + $0x28] sm:$0x3] }
  0xde   : > { %v4110_v48 = vld [vmem:[#allocation2 + $0x30] sm:$0xff]  ;;  %v4113_v49 = vsel %vm912_vm2, %v916_v34, %v917_v38  ;;  %v935_v50 = vrot.slane %v4096_v40, 1  ;;  %v4116_v51 = vld [vmem:[#allocation2 + $0x38] sm:$0x3]  ;;  %v919_v52 = vrot.slane %v4106_v46, 1  ;;  %v920_v53 = vrot.slane %v4108_v47, 1 }
  0xdf   : > { %5693 = vst [vmem:[#allocation7_spill] sm:$0xff] %v4113_v49  ;;  %v4120_v54 = vld [vmem:[#allocation2 + $0xa0] sm:$0xff]  ;;  %3027 = vrot.lane.b32.xlu1 %v4101_v42, %s3671_s19  ;;  %v3016_v55 = vpack.i.bf16 %v4113_v49, %v915_v43  ;;  %v4126_v56 = vsel %vm912_vm2, %v931_v41, %v932_v44  ;;  %v922_v57 = vrot.slane %v4110_v48, 1  ;;  %v923_v58 = vrot.slane %v4116_v51, 1  ;;  %v4130_v59 = vld [vmem:[#allocation2 + $0xa8] sm:$0x3] }
  0xe0   : > { %5694 = vst [vmem:[#allocation8_spill] sm:$0xff] %v4126_v56  ;;  %v4132_v60 = vld [vmem:[#allocation2 + $0xb0] sm:$0xff]  ;;  %v4134_v61 = vld [vmem:[#allocation2 + $0x100] sm:$0xff]  ;;  %v4137_v62 = vsel %vm912_vm2, %v934_v45, %v935_v50  ;;  %v4140_v63 = vsel %vm912_vm2, %v919_v52, %v920_v53  ;;  %v4142_v0 = vld [vmem:[#allocation2 + $0xb8] sm:$0x3]  ;;  %v937_v1 = vrot.slane %v4120_v54, 1 }
  0xe1   : > { %5695 = vst [vmem:[#allocation9_spill] sm:$0xff] %v4137_v62  ;;  %v938_v2 = vrot.slane %v4130_v59, 1  ;;  %v4146_v3 = vld [vmem:[#allocation2 + $0x108] sm:$0x3]  ;;  %3017 = vrot.lane.b32.xlu0 %v3016_v55, %s3671_s19  ;;  %v4150_v4 = vsel %vm912_vm2, %v922_v57, %v923_v58  ;;  %v940_v5 = vrot.slane %v4132_v60, 1  ;;  %v941_v6 = vrot.slane %v4142_v0, 1 }
  0xe2   : > { %5696 = vst [vmem:[#allocation10_spill] sm:$0xff] %v4140_v63  ;;  %v4154_v7 = vld [vmem:[#allocation2 + $0x110] sm:$0xff]  ;;  %v4156_v8 = vld [vmem:[#allocation2 + $0x118] sm:$0x3]  ;;  %v4158_v9 = vld [vmem:[#allocation2 + $0xe0] sm:$0xff]  ;;  %v4162_v10 = vpack.i.bf16 %v4137_v62, %v4126_v56  ;;  %v4173_v15 = vpack.i.bf16 %v4150_v4, %v4140_v63  ;;  %v955_v19 = vrot.slane %v4134_v61, 1 }
  0xe3   : > { %5697 = vst [vmem:[#allocation11_spill] sm:$0xff] %v4150_v4  ;;  %v939_v11 = vsel %vm912_vm2, %v937_v1, %v938_v2  ;;  %v4165_v12 = vld [vmem:[#allocation2 + $0xe8] sm:$0x3]  ;;  %v4167_v13 = vld [vmem:[#allocation2 + $0xf0] sm:$0xff]  ;;  %v4169_v14 = vld [vmem:[#allocation2 + $0xc0] sm:$0xff]  ;;  %v4176_v16 = vsel %vm912_vm2, %v940_v5, %v941_v6  ;;  %v956_v20 = vrot.slane %v4146_v3, 1 }
  0xe4   : > { %v4180_v24 = vld [vmem:[#allocation2 + $0xf8] sm:$0x3]  ;;  %v4182_v18 = vld [vmem:[#allocation2 + $0xd0] sm:$0xff]  ;;  %v3036_v25 = vpack.i.bf16 %v4176_v16, %v939_v11  ;;  %v958_v27 = vrot.slane %v4154_v7, 1  ;;  %v959_v32 = vrot.slane %v4156_v8, 1  ;;  %v949_v33 = vrot.slane %v4158_v9, 1 }
  0xe5   : > { %v4188_v34 = vld [vmem:[#allocation2 + $0xc8] sm:$0x3]  ;;  %v950_v38 = vrot.slane %v4165_v12, 1  ;;  %v952_v41 = vrot.slane %v4167_v13, 1  ;;  %v953_v43 = vrot.slane %v4180_v24, 1  ;;  %v943_v45 = vrot.slane %v4169_v14, 1 }
  0xe6   : > { %v867_v44 = vld [vmem:[#allocation2 + $0xd8] sm:$0x3]  ;;  %3037 = vrot.lane.b32.xlu2 %v3036_v25, %s3671_s19  ;;  %v944_v50 = vrot.slane %v4188_v34, 1  ;;  %v946_v52 = vrot.slane %v4182_v18, 1  ;;  %v963_v55 = vrot.slane %v4074_v28, 2  ;;  %v4201_v57 = vsel %vm912_vm2, %v955_v19, %v956_v20  ;;  %s3672_s20 = smov 16  }
  0xe7   : > { %3032 = vrot.lane.b32.xlu1 %v4162_v10, %s3671_s19  ;;  %v947_v53 = vrot.slane %v867_v44, 1  ;;  %5698 = vst [vmem:[#allocation12_spill] sm:$0xff] %v4201_v57  ;;  %v4204_v58 = vsel %vm912_vm2, %v958_v27, %v959_v32  ;;  %v4212_v2 = vsel %vm912_vm2, %v949_v33, %v950_v38  ;;  %v4215_v5 = vsel %vm912_vm2, %v952_v41, %v953_v43  ;;  %s3673_s25 = smov 24   ;;  %s3674_s26 = smov 32  }
  0xe8   : > { %5699 = vst [vmem:[#allocation13_spill] sm:$0xff] %v4204_v58  ;;  %v4207_v1 = vsel %vm912_vm2, %v943_v45, %v944_v50  ;;  %v974_v6 = vrot.slane %v4060_v21, 2  ;;  %v975_v19 = vrot.slane %v4062_v22, 2  ;;  %v977_v20 = vrot.slane %v4064_v23, 2  ;;  %s3675_s28 = smov 40   ;;  %s3676_s29 = smov 48  }
  0xe9   : > { %3022 = vrot.lane.b32.xlu0 %v4173_v15, %s3671_s19  ;;  %5700 = vst [vmem:[#allocation14_spill] sm:$0xff] %v4212_v2  ;;  %v4218_v28 = vsel %vm912_vm2, %v946_v52, %v947_v53  ;;  %v978_v25 = vrot.slane %v4066_v17, 2  ;;  %v4230_v27 = vpack.i.bf16 %v4204_v58, %v4201_v57  ;;  %vm961_vm3 = vcmask 1045504   ;;  %s5679_s13 = smov 56   ;;  %s5677_s14 = smov 64  }
  0xea   : > { %5701 = vst [vmem:[#allocation15_spill] sm:$0xff] %v4215_v5  ;;  %v4223_v11 = vpack.i.bf16 %v4218_v28, %v4207_v1  ;;  %v962_v32 = vrot.slane %v4071_v26, 2  ;;  %v965_v33 = vrot.slane %v4076_v29, 2  ;;  %v4236_v38 = vpack.i.bf16 %v4215_v5, %v4212_v2  ;;  %s5711_s27 = smov 56   ;;  %p2935_p5 = scmp.ne.s32.totalorder %s3750_s22, 1 }
  0xeb   : > { %5702 = vst [vmem:[#allocation16_spill] sm:$0xff] %v4230_v27  ;;  %v966_v41 = vrot.slane %v4078_v30, 2  ;;  %v968_v22 = vrot.slane %v4106_v46, 2  ;;  %v969_v43 = vrot.slane %v4108_v47, 2  ;;  %v971_v17 = vrot.slane %v4110_v48, 2 }
  0xec   : > { %v972_v45 = vrot.slane %v4116_v51, 2  ;;  %v4246_v50 = vsel %vm961_vm3, %v974_v6, %v975_v19  ;;  %v4249_v52 = vsel %vm961_vm3, %v977_v20, %v978_v25  ;;  %v964_v30 = vsel %vm961_vm3, %v962_v32, %v963_v55 }
  0xed   : > { %v4255_v47 = vsel %vm961_vm3, %v965_v33, %v966_v41  ;;  %v4261_v51 = vpack.i.bf16 %v4249_v52, %v4246_v50  ;;  %v4264_v53 = vsel %vm961_vm3, %v968_v22, %v969_v43  ;;  %v992_v19 = vrot.slane %v4169_v14, 2 }
  0xee   : > { %3042 = vrot.lane.b32.xlu2 %v4223_v11, %s3671_s19  ;;  %v4267_v6 = vsel %vm961_vm3, %v971_v17, %v972_v45  ;;  %v3056_v55 = vpack.i.bf16 %v4255_v47, %v964_v30  ;;  %v993_v20 = vrot.slane %v4188_v34, 2  ;;  %v995_v25 = vrot.slane %v4182_v18, 2 }
  0xef   : > { %3052 = vrot.lane.b32.xlu1 %v4230_v27, %s3671_s19  ;;  %v996_v32 = vrot.slane %v867_v44, 2  ;;  %v980_v33 = vrot.slane %v4086_v35, 2  ;;  %v981_v41 = vrot.slane %v4088_v36, 2  ;;  %v983_v27 = vrot.slane %v4094_v39, 2 }
  0xf0   : > { %v984_v22 = vrot.slane %v4096_v40, 2  ;;  %v4279_v43 = vpack.i.bf16 %v4267_v6, %v4264_v53  ;;  %v987_v17 = vrot.slane %v4130_v59, 2  ;;  %v986_v34 = vrot.slane %v4120_v54, 2 }
  0xf1   : > { %3047 = vrot.lane.b32.xlu0 %v4236_v38, %s3671_s19  ;;  %v989_v44 = vrot.slane %v4132_v60, 2  ;;  %v990_v45 = vrot.slane %v4142_v0, 2  ;;  %v4289_v36 = vsel %vm961_vm3, %v992_v19, %v993_v20  ;;  %v4292_v40 = vsel %vm961_vm3, %v995_v25, %v996_v32 }
  0xf2   : > { %v4295_v59 = vsel %vm961_vm3, %v980_v33, %v981_v41  ;;  %v4298_v30 = vsel %vm961_vm3, %v983_v27, %v984_v22  ;;  %v4304_v0 = vpack.i.bf16 %v4292_v40, %v4289_v36  ;;  %v998_v25 = vrot.slane %v4158_v9, 2 }
  0xf3   : > { %v4308_v19 = vsel %vm961_vm3, %v989_v44, %v990_v45  ;;  %v4312_v20 = vpack.i.bf16 %v4298_v30, %v4295_v59  ;;  %v999_v27 = vrot.slane %v4165_v12, 2  ;;  %v1001_v32 = vrot.slane %v4167_v13, 2 }
  0xf4   : > { %v1002_v33 = vrot.slane %v4180_v24, 2  ;;  %v1004_v22 = vrot.slane %v4134_v61, 2  ;;  %v1008_v44 = vrot.slane %v4156_v8, 2  ;;  %vm1442_vm4 = vcmask 64512  }
  0xf5   : > { %5703 = vst [vmem:[#allocation17_spill] sm:$0xff] %v4312_v20  ;;  %v4328_v12 = vsel %vm961_vm3, %v998_v25, %v999_v27  ;;  %v4353_v27 = vld [vmem:[#allocation2 + $0x80] sm:$0xff]  ;;  %vm1459_vm5 = vcmask 130048   ;;  %vm1476_vm6 = vcmask 195584   ;;  %vm1493_vm7 = vcmask 261120  }
  0xf6   : > { %3057 = vrot.lane.b32.xlu2 %v3056_v55, %s3672_s20  ;;  %v988_v55 = vsel %vm961_vm3, %v986_v34, %v987_v17  ;;  %v1005_v17 = vrot.slane %v4146_v3, 2  ;;  %v1007_v34 = vrot.slane %v4154_v7, 2  ;;  %v4331_v24 = vsel %vm961_vm3, %v1001_v32, %v1002_v33 }
  0xf7   : > { %3067 = vrot.lane.b32.xlu1 %v4261_v51, %s3672_s20  ;;  %v3076_v41 = vpack.i.bf16 %v4308_v19, %v988_v55  ;;  %v4342_v8 = vpack.i.bf16 %v4331_v24, %v4328_v12  ;;  %v3096_v55 = vpack.i.bf16 %v4106_v46, %v4076_v29  ;;  %v3101_v32 = vpack.i.bf16 %v4060_v21, %v4110_v48 }
  0xf8   : > { %v4335_v45 = vsel %vm961_vm3, %v1004_v22, %v1005_v17  ;;  %v4338_v3 = vsel %vm961_vm3, %v1007_v34, %v1008_v44  ;;  %v3111_v33 = vpack.i.bf16 %v4353_v27, %v4094_v39  ;;  %v3116_v22 = vpack.i.bf16 %v4169_v14, %v4132_v60  ;;  %v4374_v44 = vld [vmem:[#allocation2 + $0x120] sm:$0xff] }
  0xf9   : > { %3062 = vrot.lane.b32.xlu0 %v4279_v43, %s3672_s20  ;;  %v4348_v25 = vpack.i.bf16 %v4338_v3, %v4335_v45  ;;  %v3126_v17 = vpack.i.bf16 %v4134_v61, %v4167_v13  ;;  %v3121_v34 = vpack.i.bf16 %v4158_v9, %v4182_v18  ;;  %vm1510_vm8 = vcmask 326656  }
  0xfa   : > { %vm1651_vm9 = vcmask 1043456   ;;  %vm1527_vm10 = vcmask 392192   ;;  %vm1561_vm11 = vcmask 523264   ;;  %vm1544_vm12 = vcmask 457728  }
  0xfb   : > { %vm1626_vm13 = vcmask 588800  }
  0xfe   : > { %3072 = vrot.lane.b32.xlu2 %v4312_v20, %s3672_s20 }
  0xff   : > { %3082 = vrot.lane.b32.xlu1 %v4304_v0, %s3672_s20 }
 0x101   : > { %3077 = vrot.lane.b32.xlu0 %v3076_v41, %s3672_s20  ;;  %v3106_v41 = vpack.i.bf16 %v4086_v35, %v4064_v23 }
 0x106   : > { %3087 = vrot.lane.b32.xlu2 %v4342_v8, %s3672_s20 }
 0x107   : > { %3097 = vrot.lane.b32.xlu1 %v3096_v55, %s3673_s25  ;;  %v3131_v55 = vpack.i.bf16 %v4374_v44, %v4154_v7 }
 0x109   : > { %3092 = vrot.lane.b32.xlu0 %v4348_v25, %s3672_s20 }
 0x10e   : > { %3102 = vrot.lane.b32.xlu2 %v3101_v32, %s3673_s25  ;;  %v3141_v32 = vpack.i.bf16 %v4081_v31, %v4150_v4  ;;  %v3146_v31 = vpack.i.bf16 %v4126_v56, %v4091_v37  ;;  %v3156_v4 = vpack.i.bf16 %v4207_v1, %v4176_v16 }
 0x10f   : > { %3112 = vrot.lane.b32.xlu1 %v3111_v33, %s3673_s25  ;;  %v857_v33 = vld [vmem:[#allocation2 + $0x88] sm:$0x3] }
 0x110   : > { %v1015_v20 = vrot.slane %v857_v33, 1 }
 0x111   : > { %3107 = vrot.lane.b32.xlu0 %v3106_v41, %s3673_s25  ;;  %v3136_v41 = vpack.i.bf16 %v4140_v63, %v4113_v49 }
 0x116   : > { %3117 = vrot.lane.b32.xlu2 %v3116_v22, %s3673_s25  ;;  %v1014_v22 = vrot.slane %v4353_v27, 1 }
 0x117   : > { %3127 = vrot.lane.b32.xlu1 %v3126_v17, %s3673_s25  ;;  %v877_v17 = vld [vmem:[#allocation2 + $0x128] sm:$0x3] }
 0x118   : > { %v1018_v63 = vrot.slane %v877_v17, 1 }
 0x119   : > { %3122 = vrot.lane.b32.xlu0 %v3121_v34, %s3673_s25  ;;  %v4388_v34 = vsel %vm912_vm2, %v1014_v22, %v1015_v20  ;;  %v3161_v20 = vpack.i.bf16 %v4212_v2, %v4218_v28  ;;  %v3166_v22 = vpack.i.bf16 %v4201_v57, %v4215_v5 }
 0x11a   : > { %5704 = vst [vmem:[#allocation18_spill] sm:$0xff] %v4388_v34  ;;  %v3151_v49 = vpack.i.bf16 %v4388_v34, %v4137_v62 }
 0x11e   : > { %3132 = vrot.lane.b32.xlu2 %v3131_v55, %s3673_s25  ;;  %v1017_v55 = vrot.slane %v4374_v44, 1 }
 0x11f   : > { %3142 = vrot.lane.b32.xlu1 %v3141_v32, %s3674_s26 }
 0x120   : > { %v4400_v32 = vsel %vm912_vm2, %v1017_v55, %v1018_v63  ;;  %v1036_v63 = vrot.slane %v4353_v27, 2  ;;  %v3181_v55 = vpack.i.bf16 %v4246_v50, %v4267_v6  ;;  %v1039_v50 = vrot.slane %v4374_v44, 2 }
 0x121   : > { %3137 = vrot.lane.b32.xlu0 %v3136_v41, %s3674_s26  ;;  %5705 = vst [vmem:[#allocation19_spill] sm:$0xff] %v4400_v32  ;;  %v3171_v41 = vpack.i.bf16 %v4400_v32, %v4204_v58  ;;  %v1040_v6 = vrot.slane %v877_v17, 2 }
 0x126   : > { %3147 = vrot.lane.b32.xlu2 %v3146_v31, %s3674_s26  ;;  %v3176_v31 = vpack.i.bf16 %v4264_v53, %v4255_v47  ;;  %v3196_v53 = vpack.i.bf16 %v4289_v36, %v4308_v19  ;;  %v3216_v36 = vpack.i.bf16 %v4110_v48, %v4106_v46 }
 0x127   : > { %3157 = vrot.lane.b32.xlu1 %v3156_v4, %s3674_s26  ;;  %v1037_v4 = vrot.slane %v857_v33, 2  ;;  %v4438_v33 = vsel %vm961_vm3, %v1039_v50, %v1040_v6 }
 0x129   : > { %3152 = vrot.lane.b32.xlu0 %v3151_v49, %s3674_s26  ;;  %v3186_v49 = vpack.i.bf16 %v4295_v59, %v4249_v52  ;;  %v3201_v52 = vpack.i.bf16 %v4328_v12, %v4292_v40  ;;  %v3206_v40 = vpack.i.bf16 %v4335_v45, %v4331_v24  ;;  %v4450_v12 = vld [vmem:[#allocation2 + $0x90] sm:$0xff]  ;;  %v3221_v24 = vpack.i.bf16 %v4064_v23, %v4060_v21 }
 0x12a   : > { %v3231_v45 = vpack.i.bf16 %v4450_v12, %v4353_v27  ;;  %v3246_v27 = vpack.i.bf16 %v4154_v7, %v4134_v61 }
 0x12e   : > { %3162 = vrot.lane.b32.xlu2 %v3161_v20, %s3674_s26  ;;  %v4422_v20 = vsel %vm961_vm3, %v1036_v63, %v1037_v4 }
 0x12f   : > { %3172 = vrot.lane.b32.xlu1 %v3171_v41, %s3674_s26  ;;  %v3191_v47 = vpack.i.bf16 %v4422_v20, %v4298_v30  ;;  %v3211_v30 = vpack.i.bf16 %v4438_v33, %v4338_v3  ;;  %v3226_v3 = vpack.i.bf16 %v4094_v39, %v4086_v35 }
 0x131   : > { %3167 = vrot.lane.b32.xlu0 %v3166_v22, %s3674_s26  ;;  %v3236_v22 = vpack.i.bf16 %v4182_v18, %v4169_v14 }
 0x136   : > { %3177 = vrot.lane.b32.xlu2 %v3176_v31, %s3675_s28 }
 0x137   : > { %3187 = vrot.lane.b32.xlu1 %v3186_v49, %s3675_s28 }
 0x139   : > { %3182 = vrot.lane.b32.xlu0 %v3181_v55, %s3675_s28 }
 0x13e   : > { %3192 = vrot.lane.b32.xlu2 %v3191_v47, %s3675_s28  ;;  %v3241_v47 = vpack.i.bf16 %v4167_v13, %v4158_v9 }
 0x13f   : > { %3202 = vrot.lane.b32.xlu1 %v3201_v52, %s3675_s28 }
 0x140   : > { %v4434_v59 = vpop.permute.xlu2 %3037 }
 0x141   : > { %3197 = vrot.lane.b32.xlu0 %v3196_v53, %s3675_s28 }
 0x146   : > { %3207 = vrot.lane.b32.xlu2 %v3206_v40, %s3675_s28  ;;  %v4482_v40 = vld [vmem:[#allocation2 + $0x130] sm:$0xff] }
 0x147   : > { %3217 = vrot.lane.b32.xlu1 %v3216_v36, %s3676_s29 }
 0x148   : > { %v4448_v19 = vpop.permute.xlu2 %3042 }
 0x149   : > { %3212 = vrot.lane.b32.xlu0 %v3211_v30, %s3675_s28 }
 0x14e   : > { %3222 = vrot.lane.b32.xlu2 %v3221_v24, %s3676_s29 }
 0x14f   : > { %3232 = vrot.lane.b32.xlu1 %v3231_v45, %s3676_s29 }
 0x150   : > { %v3058_v17 = vpop.permute.xlu2 %3057 }
 0x151   : > { %3227 = vrot.lane.b32.xlu0 %v3226_v3, %s3676_s29  ;;  %v4462_v41 = vpop.permute.xlu1 %3027  ;;  %v3060_v49 = vunpack.i.h.bf16 %v3058_v17  ;;  %v3059_v63 = vunpack.i.l.bf16 %v3058_v17  ;;  %v3251_v3 = vpack.i.bf16 %v4482_v40, %v4374_v44 }
 0x153   : > { %v3018_v31 = vpop.permute.xlu0 %3017 }
 0x154   : > { %v3020_v4 = vunpack.i.h.bf16 %v3018_v31  ;;  %v3019_v55 = vunpack.i.l.bf16 %v3018_v31 }
 0x156   : > { %v1444_v52 = vsel %vm1442_vm4, %v4076_v29, %v3020_v4  ;;  %v1443_v53 = vsel %vm1442_vm4, %v4071_v26, %v3019_v55  ;;  %3237 = vrot.lane.b32.xlu2 %v3236_v22, %s3676_s29  ;;  %v4487_v22 = vld [vmem:[#allocation2 + $0x98] sm:$0x3]  ;;  %v1046_v4 = vrot.slane %v4450_v12, 1 }
 0x157   : > { %v4476_v50 = vsel %vm1459_vm5, %v1443_v53, %v3059_v63  ;;  %v4479_v6 = vsel %vm1459_vm5, %v1444_v52, %v3060_v49  ;;  %3247 = vrot.lane.b32.xlu1 %v3246_v27, %s3676_s29  ;;  %v1047_v44 = vrot.slane %v4487_v22, 1 }
 0x158   : > { %v3073_v36 = vpop.permute.xlu2 %3072 }
 0x159   : > { %3242 = vrot.lane.b32.xlu0 %v3241_v47, %s3676_s29  ;;  %v3033_v29 = vpop.permute.xlu1 %3032  ;;  %v3075_v30 = vunpack.i.h.bf16 %v3073_v36  ;;  %v3074_v24 = vunpack.i.l.bf16 %v3073_v36  ;;  %v1048_v55 = vsel %vm912_vm2, %v1046_v4, %v1047_v44 }
 0x15a   : > { %v3035_v26 = vunpack.i.h.bf16 %v3033_v29  ;;  %v3034_v45 = vunpack.i.l.bf16 %v3033_v29 }
 0x15b   : > { %v3023_v17 = vpop.permute.xlu0 %3022 }
 0x15c   : > { %v1450_v31 = vsel %vm1442_vm4, %v4094_v39, %v3035_v26  ;;  %v1449_v49 = vsel %vm1442_vm4, %v4086_v35, %v3034_v45  ;;  %v3029_v26 = vunpack.i.l.bf16 %v4462_v41  ;;  %v3025_v45 = vunpack.i.h.bf16 %v3023_v17 }
 0x15d   : > { %v4494_v63 = vsel %vm1459_vm5, %v1450_v31, %v3075_v30  ;;  %v4497_v27 = vsel %vm1459_vm5, %v1449_v49, %v3074_v24  ;;  %v3030_v30 = vunpack.i.h.bf16 %v4462_v41  ;;  %v3271_v24 = vpack.i.bf16 %v1048_v55, %v4388_v34 }
 0x15e   : > { %3252 = vrot.lane.b32.xlu2 %v3251_v3, %s3676_s29  ;;  %v3024_v3 = vunpack.i.l.bf16 %v3023_v17  ;;  %v1446_v44 = vsel %vm1442_vm4, %v4110_v48, %v3025_v45 }
 0x15f   : > { %3262 = vrot.lane.b32.xlu1 %v4101_v42, %s5679_s13 }
 0x160   : > { %v3088_v39 = vpop.permute.xlu2 %3087 }
 0x161   : > { %3257 = vrot.lane.b32.xlu0 %v4173_v15, %s5679_s13  ;;  %v4506_v35 = vpop.permute.xlu1 %3052  ;;  %v3090_v52 = vunpack.i.h.bf16 %v3088_v39  ;;  %v3089_v53 = vunpack.i.l.bf16 %v3088_v39  ;;  %v1445_v39 = vsel %vm1442_vm4, %v4106_v46, %v3024_v3  ;;  %v3044_v46 = vunpack.i.l.bf16 %v4448_v19 }
 0x163   : > { %v3048_v47 = vpop.permute.xlu0 %3047 }
 0x164   : > { %v3050_v36 = vunpack.i.h.bf16 %v3048_v47  ;;  %v3049_v29 = vunpack.i.l.bf16 %v3048_v47 }
 0x166   : > { %v1456_v42 = vsel %vm1442_vm4, %v4167_v13, %v3050_v36  ;;  %v1455_v15 = vsel %vm1442_vm4, %v4158_v9, %v3049_v29  ;;  %3267 = vrot.lane.b32.xlu2 %v4162_v10, %s5679_s13  ;;  %v1448_v13 = vsel %vm1442_vm4, %v4064_v23, %v3030_v30  ;;  %v1447_v10 = vsel %vm1442_vm4, %v4060_v21, %v3029_v26 }
 0x167   : > { %v4519_v31 = vsel %vm1459_vm5, %v1455_v15, %v3089_v53  ;;  %v4522_v49 = vsel %vm1459_vm5, %v1456_v42, %v3090_v52  ;;  %3277 = vrot.lane.b32.xlu1 %v4223_v11, %s5679_s13  ;;  %v3045_v21 = vunpack.i.h.bf16 %v4448_v19  ;;  %v3040_v42 = vunpack.i.h.bf16 %v4434_v59 }
 0x168   : > { %v3103_v41 = vpop.permute.xlu2 %3102  ;;  %v3039_v15 = vunpack.i.l.bf16 %v4434_v59 }
 0x169   : > { %3272 = vrot.lane.b32.xlu0 %v3271_v24, %s5679_s13  ;;  %v3068_v9 = vpop.permute.xlu1 %3067  ;;  %v3105_v55 = vunpack.i.h.bf16 %v3103_v41  ;;  %v3104_v47 = vunpack.i.l.bf16 %v3103_v41  ;;  %v1454_v19 = vsel %vm1442_vm4, %v4182_v18, %v3045_v21  ;;  %v1453_v41 = vsel %vm1442_vm4, %v4169_v14, %v3044_v46 }
 0x16a   : > { %v3070_v17 = vunpack.i.h.bf16 %v3068_v9  ;;  %v3069_v4 = vunpack.i.l.bf16 %v3068_v9  ;;  %v1452_v18 = vsel %vm1442_vm4, %v4132_v60, %v3040_v42  ;;  %v1049_v14 = vrot.slane %v4482_v40, 1 }
 0x16b   : > { %v3063_v11 = vpop.permute.xlu0 %3062  ;;  %v1055_v60 = vrot.slane %v4482_v40, 2  ;;  %v3054_v21 = vunpack.i.l.bf16 %v4506_v35 }
 0x16c   : > { %v4536_v23 = vsel %vm1459_vm5, %v1447_v10, %v3069_v4  ;;  %v4539_v52 = vsel %vm1459_vm5, %v1448_v13, %v3070_v17  ;;  %v3065_v53 = vunpack.i.h.bf16 %v3063_v11  ;;  %v3064_v36 = vunpack.i.l.bf16 %v3063_v11  ;;  %v879_v10 = vld [vmem:[#allocation2 + $0x138] sm:$0x3] }
 0x16e   : > { %v1462_v29 = vsel %vm1459_vm5, %v1445_v39, %v3064_v36  ;;  %v1463_v48 = vsel %vm1459_vm5, %v1446_v44, %v3065_v53  ;;  %3282 = vrot.lane.b32.xlu2 %v4304_v0, %s5677_s14  ;;  %v1451_v44 = vsel %vm1442_vm4, %v4120_v54, %v3039_v15  ;;  %v3055_v36 = vunpack.i.h.bf16 %v4506_v35 }
 0x16f   : > { %v4548_v30 = vsel %vm1476_vm6, %v1462_v29, %v3104_v47  ;;  %v4551_v24 = vsel %vm1476_vm6, %v1463_v48, %v3105_v55  ;;  %3292 = vrot.lane.b32.xlu1 %v4279_v43, %s5677_s14  ;;  %v1050_v55 = vrot.slane %v879_v10, 1  ;;  %v5706_v29 = vld [vmem:[#allocation16_spill] sm:$0xff] }
 0x170   : > { %v3118_v26 = vpop.permute.xlu2 %3117 }
 0x171   : > { %3287 = vrot.lane.b32.xlu0 %v4236_v38, %s5679_s13  ;;  %v3083_v0 = vpop.permute.xlu1 %3082  ;;  %v3120_v9 = vunpack.i.h.bf16 %v3118_v26  ;;  %v3119_v43 = vunpack.i.l.bf16 %v3118_v26  ;;  %v1051_v26 = vsel %vm912_vm2, %v1049_v14, %v1050_v55 }
 0x172   : > { %v3085_v45 = vunpack.i.h.bf16 %v3083_v0  ;;  %v3084_v3 = vunpack.i.l.bf16 %v3083_v0 }
 0x173   : > { %v3078_v13 = vpop.permute.xlu0 %3077 }
 0x174   : > { %v4564_v17 = vsel %vm1459_vm5, %v1454_v19, %v3085_v45  ;;  %v4567_v59 = vsel %vm1459_vm5, %v1453_v41, %v3084_v3  ;;  %v3080_v38 = vunpack.i.h.bf16 %v3078_v13  ;;  %v3079_v4 = vunpack.i.l.bf16 %v3078_v13 }
 0x175   : > { %v1056_v19 = vrot.slane %v879_v10, 2  ;;  %v1458_v3 = vsel %vm1442_vm4, %v4154_v7, %v3055_v36  ;;  %v1457_v41 = vsel %vm1442_vm4, %v4134_v61, %v3054_v21  ;;  %v3316_v13 = vpack.i.bf16 %v1051_v26, %v4400_v32  ;;  %v5707_v61 = vld [vmem:[#allocation17_spill] sm:$0xff] }
 0x176   : > { %v1469_v39 = vsel %vm1459_vm5, %v1452_v18, %v3080_v38  ;;  %v1468_v11 = vsel %vm1459_vm5, %v1451_v44, %v3079_v4  ;;  %3297 = vrot.lane.b32.xlu2 %v4342_v8, %s5677_s14  ;;  %v1053_v10 = vrot.slane %v4487_v22, 2 }
 0x177   : > { %v4579_v47 = vsel %vm1476_vm6, %v1468_v11, %v3119_v43  ;;  %v4582_v53 = vsel %vm1476_vm6, %v1469_v39, %v3120_v9  ;;  %3307 = vrot.lane.b32.xlu1 %v4261_v51, %s5677_s14  ;;  %v1052_v9 = vrot.slane %v4450_v12, 2  ;;  %v1057_v12 = vsel %vm961_vm3, %v1055_v60, %v1056_v19 }
 0x178   : > { %v3133_v54 = vpop.permute.xlu2 %3132 }
 0x179   : > { %3302 = vrot.lane.b32.xlu0 %v5706_v29, %s5679_s13  ;;  %v3098_v8 = vpop.permute.xlu1 %3097  ;;  %v3135_v15 = vunpack.i.h.bf16 %v3133_v54  ;;  %v3134_v0 = vunpack.i.l.bf16 %v3133_v54  ;;  %v1054_v44 = vsel %vm961_vm3, %v1052_v9, %v1053_v10 }
 0x17a   : > { %v3100_v48 = vunpack.i.h.bf16 %v3098_v8  ;;  %v3099_v46 = vunpack.i.l.bf16 %v3098_v8  ;;  %v3331_v21 = vpack.i.bf16 %v1054_v44, %v4422_v20 }
 0x17b   : > { %v3093_v42 = vpop.permute.xlu0 %3092 }
 0x17c   : > { %v4594_v51 = vsel %vm1476_vm6, %v4476_v50, %v3099_v46  ;;  %v4598_v40 = vsel %vm1476_vm6, %v4479_v6, %v3100_v48  ;;  %v3095_v35 = vunpack.i.h.bf16 %v3093_v42  ;;  %v3094_v45 = vunpack.i.l.bf16 %v3093_v42 }
 0x17e   : > { %v1475_v43 = vsel %vm1459_vm5, %v1458_v3, %v3095_v35  ;;  %v1474_v50 = vsel %vm1459_vm5, %v1457_v41, %v3094_v45  ;;  %3312 = vrot.lane.b32.xlu2 %v4348_v25, %s5677_s14  ;;  %v3326_v25 = vpack.i.bf16 %v1057_v12, %v4438_v33 }
 0x17f   : > { %v4612_v6 = vsel %vm1476_vm6, %v1474_v50, %v3134_v0  ;;  %v4615_v7 = vsel %vm1476_vm6, %v1475_v43, %v3135_v15  ;;  %3322 = vrot.lane.b32.xlu1 %v5707_v61, %s5677_s14 }
 0x180   : > { %v3148_v38 = vpop.permute.xlu2 %3147 }
 0x181   : > { %3317 = vrot.lane.b32.xlu0 %v3316_v13, %s5679_s13  ;;  %v3113_v4 = vpop.permute.xlu1 %3112  ;;  %v3150_v39 = vunpack.i.h.bf16 %v3148_v38  ;;  %v3149_v11 = vunpack.i.l.bf16 %v3148_v38  ;;  %s5710_s13 = scalar_lea.vmem %s5664_s7, %s3756_s23 }
 0x182   : > { %v3115_v18 = vunpack.i.h.bf16 %v3113_v4  ;;  %v3114_v22 = vunpack.i.l.bf16 %v3113_v4 }
 0x183   : > { %v3108_v14 = vpop.permute.xlu0 %3107 }
 0x184   : > { %v1483_v55 = vsel %vm1476_vm6, %v4497_v27, %v3114_v22  ;;  %v1484_v54 = vsel %vm1476_vm6, %v4494_v63, %v3115_v18  ;;  %v3110_v60 = vunpack.i.h.bf16 %v3108_v14  ;;  %v3109_v36 = vunpack.i.l.bf16 %v3108_v14 }
 0x186   : > { %v1482_v29 = vsel %vm1476_vm6, %v4539_v52, %v3110_v60  ;;  %v1481_v33 = vsel %vm1476_vm6, %v4536_v23, %v3109_v36  ;;  %3327 = vrot.lane.b32.xlu2 %v3326_v25, %s5677_s14 }
 0x187   : > { %v4634_v8 = vsel %vm1493_vm7, %v1481_v33, %v3149_v11  ;;  %v4637_v27 = vsel %vm1493_vm7, %v1482_v29, %v3150_v39 }
 0x188   : > { %v3163_v48 = vpop.permute.xlu2 %3162 }
 0x189   : > { %3332 = vrot.lane.b32.xlu0 %v3331_v21, %s5677_s14  ;;  %v3128_v63 = vpop.permute.xlu1 %3127  ;;  %v3165_v42 = vunpack.i.h.bf16 %v3163_v48  ;;  %v3164_v52 = vunpack.i.l.bf16 %v3163_v48 }
 0x18a   : > { %v3130_v46 = vunpack.i.h.bf16 %v3128_v63  ;;  %v3129_v20 = vunpack.i.l.bf16 %v3128_v63 }
 0x18b   : > { %v3123_v26 = vpop.permute.xlu0 %3122 }
 0x18c   : > { %v1489_v23 = vsel %vm1476_vm6, %v4519_v31, %v3129_v20  ;;  %v1490_v15 = vsel %vm1476_vm6, %v4522_v49, %v3130_v46  ;;  %v3125_v0 = vunpack.i.h.bf16 %v3123_v26  ;;  %v3124_v19 = vunpack.i.l.bf16 %v3123_v26 }
 0x18e   : > { %v1488_v35 = vsel %vm1476_vm6, %v4564_v17, %v3125_v0  ;;  %v1487_v45 = vsel %vm1476_vm6, %v4567_v59, %v3124_v19  ;;  %v1594_v0 = vld [vmem:[%s3774_s18 + $0x20] sm:$0xf] }
 0x18f   : > { %v4649_v3 = vsel %vm1493_vm7, %v1487_v45, %v3164_v52  ;;  %v4652_v41 = vsel %vm1493_vm7, %v1488_v35, %v3165_v42  ;;  %v1616_v35 = vunpack.c.l.b16 %v1594_v0 }
 0x190   : > { %v4654_v13 = vpop.permute.xlu2 %3177 }
 0x191   : > { %v3143_v31 = vpop.permute.xlu1 %3142 }
 0x192   : > { %v3145_v9 = vunpack.i.h.bf16 %v3143_v31  ;;  %v3144_v43 = vunpack.i.l.bf16 %v3143_v31  ;;  %v1621_v31 = vpack.c.b16 %v1616_v35, %v1616_v35 }
 0x193   : > { %v3138_v49 = vpop.permute.xlu0 %3137 }
 0x194   : > { %v4658_v50 = vsel %vm1493_vm7, %v4548_v30, %v3144_v43  ;;  %v4662_v17 = vsel %vm1493_vm7, %v4551_v24, %v3145_v9  ;;  %v3140_v59 = vunpack.i.h.bf16 %v3138_v49  ;;  %v3139_v10 = vunpack.i.l.bf16 %v3138_v49  ;;  %v2957_v43 = vld [vmem:[%s3774_s18 + $0x18] sm:$0xff] }
 0x195   : > { %v1653_v9 = vsel %vm1651_vm9, %v1621_v31, 0 }
 0x196   : > { %v4666_v61 = vsel %vm1493_vm7, %v4594_v51, %v3139_v10  ;;  %v4670_v12 = vsel %vm1493_vm7, %v4598_v40, %v3140_v59  ;;  %2986 = vmatpush.bf16.msra.mxu2 %v1653_v9  ;;  %1658 = vmatpush.bf16.msra.mxu0 %v1653_v9 }
 0x198   : > { %v3193_v38 = vpop.permute.xlu2 %3192 }
 0x199   : > { %v4672_v4 = vpop.permute.xlu1 %3157  ;;  %v3195_v30 = vunpack.i.h.bf16 %v3193_v38  ;;  %v3194_v22 = vunpack.i.l.bf16 %v3193_v38 }
 0x19a   : > { %2987 = vmatpush.bf16.msra.mxu2 %v2957_v43  ;;  %1659 = vmatpush.bf16.msra.mxu0 %v2957_v43 }
 0x19b   : > { %v3153_v18 = vpop.permute.xlu0 %3152 }
 0x19c   : > { %v3155_v44 = vunpack.i.h.bf16 %v3153_v18  ;;  %v3154_v25 = vunpack.i.l.bf16 %v3153_v18 }
 0x19e   : > { %v1501_v24 = vsel %vm1493_vm7, %v1484_v54, %v3155_v44  ;;  %v1500_v14 = vsel %vm1493_vm7, %v1483_v55, %v3154_v25  ;;  %v2954_v44 = vld [vmem:[%s3774_s18] sm:$0xff] }
 0x19f   : > { %v1517_v51 = vsel %vm1510_vm8, %v1500_v14, %v3194_v22  ;;  %v1518_v39 = vsel %vm1510_vm8, %v1501_v24, %v3195_v30 }
 0x1a0   : > { %v3208_v11 = vpop.permute.xlu2 %3207 }
 0x1a1   : > { %v3173_v40 = vpop.permute.xlu1 %3172  ;;  %v3210_v29 = vunpack.i.h.bf16 %v3208_v11  ;;  %v3209_v33 = vunpack.i.l.bf16 %v3208_v11 }
 0x1a2   : > { %v3175_v60 = vunpack.i.h.bf16 %v3173_v40  ;;  %v3174_v36 = vunpack.i.l.bf16 %v3173_v40 }
 0x1a3   : > { %v3168_v21 = vpop.permute.xlu0 %3167 }
 0x1a4   : > { %v1508_v48 = vsel %vm1493_vm7, %v4612_v6, %v3174_v36  ;;  %v1509_v54 = vsel %vm1493_vm7, %v4615_v7, %v3175_v60  ;;  %v3170_v63 = vunpack.i.h.bf16 %v3168_v21  ;;  %v3169_v55 = vunpack.i.l.bf16 %v3168_v21 }
 0x1a6   : > { %v1506_v46 = vsel %vm1493_vm7, %v1489_v23, %v3169_v55  ;;  %v1507_v20 = vsel %vm1493_vm7, %v1490_v15, %v3170_v63 }
 0x1a7   : > { %v4685_v26 = vsel %vm1510_vm8, %v1506_v46, %v3209_v33  ;;  %v4688_v42 = vsel %vm1510_vm8, %v1507_v20, %v3210_v29  ;;  %v3160_v46 = vunpack.i.h.bf16 %v4672_v4  ;;  %v3159_v20 = vunpack.i.l.bf16 %v4672_v4 }
 0x1a8   : > { %v4701_v45 = vpop.permute.xlu2 %3222 }
 0x1a9   : > { %v3188_v52 = vpop.permute.xlu1 %3187 }
 0x1aa   : > { %v3190_v19 = vunpack.i.h.bf16 %v3188_v52  ;;  %v3189_v6 = vunpack.i.l.bf16 %v3188_v52 }
 0x1ab   : > { %v4691_v7 = vpop.permute.xlu0 %3182 }
 0x1ac   : > { %v4695_v23 = vsel %vm1510_vm8, %v4634_v8, %v3189_v6  ;;  %v4699_v15 = vsel %vm1510_vm8, %v4637_v27, %v3190_v19  ;;  %v2956_v8 = vld [vmem:[%s3774_s18 + $0x10] sm:$0xff]  ;;  %v2955_v27 = vld [vmem:[%s3774_s18 + $0x8] sm:$0xff]  ;;  %v1503_v19 = vsel %vm1493_vm7, %v4582_v53, %v3160_v46 }
 0x1ad   : > { %2988 = vmatpush.bf16.msra.mxu2 %v2956_v8  ;;  %1660 = vmatpush.bf16.msra.mxu0 %v2956_v8 }
 0x1b0   : > { %v3238_v10 = vpop.permute.xlu2 %3237 }
 0x1b1   : > { %v4705_v49 = vpop.permute.xlu1 %3202  ;;  %2989 = vmatpush.bf16.msra.mxu2 %v2955_v27  ;;  %1661 = vmatpush.bf16.msra.mxu0 %v2955_v27  ;;  %v3240_v6 = vunpack.i.h.bf16 %v3238_v10  ;;  %v3239_v35 = vunpack.i.l.bf16 %v3238_v10  ;;  %v3180_v10 = vunpack.i.h.bf16 %v4654_v13 }
 0x1b3   : > { %v3198_v59 = vpop.permute.xlu0 %3197 }
 0x1b4   : > { %v3200_v0 = vunpack.i.h.bf16 %v3198_v59 }
 0x1b5   : > { %2990 = vmatpush.bf16.msra.mxu2 %v2954_v44  ;;  %1662 = vmatpush.bf16.msra.mxu0 %v2954_v44 }
 0x1b6   : > { %v1520_v9 = vsel %vm1510_vm8, %v1503_v19, %v3200_v0 }
 0x1b8   : > { %v4718_v14 = vpop.permute.xlu2 %3252 }
 0x1b9   : > { %v4709_v38 = vpop.permute.xlu1 %3217 }
 0x1ba   : > { %v3219_v0 = vunpack.i.l.bf16 %v4709_v38 }
 0x1bb   : > { %v3213_v18 = vpop.permute.xlu0 %3212 }
 0x1bc   : > { %v3215_v30 = vunpack.i.h.bf16 %v3213_v18  ;;  %v3214_v22 = vunpack.i.l.bf16 %v3213_v18 }
 0x1be   : > { %v4713_v25 = vsel %vm1510_vm8, %v1508_v48, %v3214_v22  ;;  %v4716_v24 = vsel %vm1510_vm8, %v1509_v54, %v3215_v30  ;;  %v3205_v22 = vunpack.i.h.bf16 %v4705_v49 }
 0x1c0   : > { %v4730_v48 = vpop.permute.xlu2 %3267 }
 0x1c1   : > { %v3233_v11 = vpop.permute.xlu1 %3232 }
 0x1c2   : > { %v3235_v40 = vunpack.i.h.bf16 %v3233_v11  ;;  %v3234_v60 = vunpack.i.l.bf16 %v3233_v11 }
 0x1c3   : > { %v4720_v36 = vpop.permute.xlu0 %3227 }
 0x1c4   : > { %v4723_v21 = vsel %vm1527_vm10, %v1517_v51, %v3234_v60  ;;  %v4726_v29 = vsel %vm1527_vm10, %v1518_v39, %v3235_v40  ;;  %v3199_v51 = vunpack.i.l.bf16 %v3198_v59  ;;  %v1502_v39 = vsel %vm1493_vm7, %v4579_v47, %v3159_v20 }
 0x1c5   : > { %v3179_v59 = vunpack.i.l.bf16 %v4654_v13  ;;  %v1537_v47 = vsel %vm1527_vm10, %v1520_v9, %v3240_v6  ;;  %v3204_v60 = vunpack.i.l.bf16 %v4705_v49  ;;  %v3220_v20 = vunpack.i.h.bf16 %v4709_v38 }
 0x1c6   : > { %v1519_v31 = vsel %vm1510_vm8, %v1502_v39, %v3199_v51  ;;  %v1512_v6 = vsel %vm1510_vm8, %v4670_v12, %v3180_v10  ;;  %v3185_v49 = vunpack.i.h.bf16 %v4691_v7  ;;  %v1522_v9 = vsel %vm1510_vm8, %v4652_v41, %v3205_v22 }
 0x1c7   : > { %v1536_v30 = vsel %vm1527_vm10, %v1519_v31, %v3239_v35  ;;  %v1511_v13 = vsel %vm1510_vm8, %v4666_v61, %v3179_v59  ;;  %v3184_v35 = vunpack.i.l.bf16 %v4691_v7  ;;  %v3225_v31 = vunpack.i.h.bf16 %v4701_v45 }
 0x1c8   : > { %v3283_v55 = vpop.permute.xlu2 %3282  ;;  %v1521_v38 = vsel %vm1510_vm8, %v4649_v3, %v3204_v60  ;;  %v1528_v12 = vsel %vm1527_vm10, %v1511_v13, %v3219_v0  ;;  %v3224_v22 = vunpack.i.l.bf16 %v4701_v45 }
 0x1c9   : > { %v4728_v33 = vpop.permute.xlu1 %3247  ;;  %v3285_v8 = vunpack.i.h.bf16 %v3283_v55  ;;  %v3284_v27 = vunpack.i.l.bf16 %v3283_v55 }
 0x1cb   : > { %v4732_v54 = vpop.permute.xlu0 %3242 }
 0x1cc   : > { %v3245_v61 = vunpack.i.h.bf16 %v4732_v54 }
 0x1d0   : > { %v3298_v40 = vpop.permute.xlu2 %3297 }
 0x1d1   : > { %v4734_v63 = vpop.permute.xlu1 %3262  ;;  %v3300_v3 = vunpack.i.h.bf16 %v3298_v40 }
 0x1d2   : > { %v3264_v45 = vunpack.i.l.bf16 %v4734_v63 }
 0x1d3   : > { %v3258_v52 = vpop.permute.xlu0 %3257 }
 0x1d4   : > { %v3260_v39 = vunpack.i.h.bf16 %v3258_v52  ;;  %v3259_v19 = vunpack.i.l.bf16 %v3258_v52  ;;  %v3244_v52 = vunpack.i.l.bf16 %v4732_v54 }
 0x1d8   : > { %v3313_v0 = vpop.permute.xlu2 %3312 }
 0x1d9   : > { %v3278_v43 = vpop.permute.xlu1 %3277 }
 0x1da   : > { %v3280_v18 = vunpack.i.h.bf16 %v3278_v43  ;;  %v3279_v4 = vunpack.i.l.bf16 %v3278_v43 }
 0x1db   : > { %v4747_v53 = vpop.permute.xlu0 %3272 }
 0x1dc   : > { %v1553_v44 = vsel %vm1544_vm12, %v1536_v30, %v3279_v4  ;;  %v1554_v11 = vsel %vm1544_vm12, %v1537_v47, %v3280_v18  ;;  %v1545_v18 = vsel %vm1544_vm12, %v1528_v12, %v3259_v19  ;;  %v3299_v30 = vunpack.i.l.bf16 %v3298_v40 }
 0x1dd   : > { %v1570_v55 = vsel %vm1561_vm11, %v1553_v44, %v3284_v27  ;;  %v1571_v46 = vsel %vm1561_vm11, %v1554_v11, %v3285_v8  ;;  %v1529_v8 = vsel %vm1527_vm10, %v1512_v6, %v3220_v20  ;;  %v1538_v44 = vsel %vm1527_vm10, %v1521_v38, %v3244_v52 }
 0x1de   : > { %v1582_v51 = vpack.c.bf16 %v1571_v46, %v1570_v55  ;;  %v1546_v4 = vsel %vm1544_vm12, %v1529_v8, %v3260_v39  ;;  %v1539_v11 = vsel %vm1527_vm10, %v1522_v9, %v3245_v61  ;;  %v1513_v55 = vsel %vm1510_vm8, %v4658_v50, %v3184_v35 }
 0x1df   : > { %v1514_v46 = vsel %vm1510_vm8, %v4662_v17, %v3185_v49  ;;  %v1530_v50 = vsel %vm1527_vm10, %v1513_v55, %v3224_v22  ;;  %v3250_v6 = vunpack.i.h.bf16 %v4728_v33  ;;  %v3249_v49 = vunpack.i.l.bf16 %v4728_v33 }
 0x1e0   : > { %2907 = vmatmul.msk.bf16.vlgmr.msra.gmra.mxu2 %vm1626_vm13, %v1582_v51  ;;  %v3265_v51 = vunpack.i.h.bf16 %v4734_v63  ;;  %v1531_v17 = vsel %vm1527_vm10, %v1514_v46, %v3225_v31  ;;  %v3230_v38 = vunpack.i.h.bf16 %v4720_v36  ;;  %v3229_v63 = vunpack.i.l.bf16 %v4720_v36 }
 0x1e1   : > { %v3293_v43 = vpop.permute.xlu1 %3292  ;;  %v1547_v52 = vsel %vm1544_vm12, %v1530_v50, %v3264_v45  ;;  %v3315_v8 = vunpack.i.h.bf16 %v3313_v0  ;;  %v1541_v36 = vsel %vm1527_vm10, %v4688_v42, %v3250_v6  ;;  %v3328_v42 = vpop.permute.xlu2 %3327 }
 0x1e2   : > { %v3295_v7 = vunpack.i.h.bf16 %v3293_v43  ;;  %v3294_v27 = vunpack.i.l.bf16 %v3293_v43  ;;  %v1548_v43 = vsel %vm1544_vm12, %v1531_v17, %v3265_v51  ;;  %v1532_v22 = vsel %vm1527_vm10, %v4695_v23, %v3229_v63 }
 0x1e3   : > { %v3288_v59 = vpop.permute.xlu0 %3287  ;;  %v3330_v23 = vunpack.i.h.bf16 %v3328_v42  ;;  %v3329_v51 = vunpack.i.l.bf16 %v3328_v42  ;;  %v3275_v63 = vunpack.i.h.bf16 %v4747_v53  ;;  %v1778_v42 = vld [vmem:[#allocation3 + $0x8] sm:$0x3] }
 0x1e4   : > { %v3290_v47 = vunpack.i.h.bf16 %v3288_v59  ;;  %v3289_v41 = vunpack.i.l.bf16 %v3288_v59  ;;  %v1562_v10 = vsel %vm1561_vm11, %v1545_v18, %v3294_v27  ;;  %v1563_v54 = vsel %vm1561_vm11, %v1546_v4, %v3295_v7 }
 0x1e5   : > { %v1578_v60 = vpack.c.bf16 %v1563_v54, %v1562_v10  ;;  %v3314_v7 = vunpack.i.l.bf16 %v3313_v0  ;;  %v1540_v4 = vsel %vm1527_vm10, %v4685_v26, %v3249_v49  ;;  %v1533_v26 = vsel %vm1527_vm10, %v4699_v15, %v3230_v38 }
 0x1e6   : > { %v1555_v40 = vsel %vm1544_vm12, %v1538_v44, %v3289_v41  ;;  %v1556_v20 = vsel %vm1544_vm12, %v1539_v11, %v3290_v47  ;;  %v3270_v47 = vunpack.i.h.bf16 %v4730_v48  ;;  %v3269_v41 = vunpack.i.l.bf16 %v4730_v48 }
 0x1e7   : > { %2903 = vmatmul.msk.bf16.vlgmr.msra.gmra.mxu0 %vm1626_vm13, %v1578_v60  ;;  %v1572_v13 = vsel %vm1561_vm11, %v1555_v40, %v3299_v30  ;;  %v1573_v39 = vsel %vm1561_vm11, %v1556_v20, %v3300_v3  ;;  %v3255_v11 = vunpack.i.h.bf16 %v4718_v14  ;;  %v3254_v60 = vunpack.i.l.bf16 %v4718_v14 }
 0x1e8   : > { %v1583_v19 = vpack.c.bf16 %v1573_v39, %v1572_v13  ;;  %v1549_v40 = vsel %vm1544_vm12, %v1532_v22, %v3269_v41  ;;  %v1550_v20 = vsel %vm1544_vm12, %v1533_v26, %v3270_v47  ;;  %v4875_v26 = vld [vmem:[#allocation3] sm:$0xff] }
 0x1e9   : > { %v3308_v35 = vpop.permute.xlu1 %3307  ;;  %v1543_v14 = vsel %vm1527_vm10, %v4716_v24, %v3255_v11 }
 0x1ea   : > { %v3310_v9 = vunpack.i.h.bf16 %v3308_v35  ;;  %v3309_v61 = vunpack.i.l.bf16 %v3308_v35 }
 0x1eb   : > { %v3303_v12 = vpop.permute.xlu0 %3302 }
 0x1ec   : > { %v3305_v27 = vunpack.i.h.bf16 %v3303_v12  ;;  %v3304_v31 = vunpack.i.l.bf16 %v3303_v12  ;;  %v1564_v18 = vsel %vm1561_vm11, %v1547_v52, %v3309_v61  ;;  %v1565_v33 = vsel %vm1561_vm11, %v1548_v43, %v3310_v9 }
 0x1ed   : > { %v1579_v59 = vpack.c.bf16 %v1565_v33, %v1564_v18  ;;  %v1552_v43 = vsel %vm1544_vm12, %v4726_v29, %v3275_v63  ;;  %v4856_v29 = vld [vmem:[%s5709_s30] ss:$0 sm:$0xff]  ;;  %s5712_s30 = smov 64  }
 0x1ee   : > { %v1557_v3 = vsel %vm1544_vm12, %v1540_v4, %v3304_v31  ;;  %v1558_v30 = vsel %vm1544_vm12, %v1541_v36, %v3305_v27  ;;  %v4864_v31 = vld [vmem:[%s5710_s13] ss:$0 sm:$0xff]  ;;  %s5715_s13 = scalar_lea.vmem %s5668_s11, %s3756_s23 }
 0x1ef   : > { %v1574_v10 = vsel %vm1561_vm11, %v1557_v3, %v3314_v7  ;;  %v1575_v54 = vsel %vm1561_vm11, %v1558_v30, %v3315_v8 }
 0x1f0   : > { %2908 = vmatmul.msk.bf16.gmra.mxu2 %vm1626_vm13, %v1583_v19  ;;  %v1584_v44 = vpack.c.bf16 %v1575_v54, %v1574_v10  ;;  %v1542_v19 = vsel %vm1527_vm10, %v4713_v25, %v3254_v60  ;;  %v3274_v25 = vunpack.i.l.bf16 %v4747_v53 }
 0x1f1   : > { %v3323_v55 = vpop.permute.xlu1 %3322 }
 0x1f2   : > { %v3325_v48 = vunpack.i.h.bf16 %v3323_v55  ;;  %v3324_v46 = vunpack.i.l.bf16 %v3323_v55  ;;  %v1551_v52 = vsel %vm1544_vm12, %v4723_v21, %v3274_v25  ;;  %v4849_v21 = vld [vmem:[%s5708_s17] ss:$0 sm:$0xff]  ;;  %v1897_v55 = vrot.slane %v4875_v26, 2 }
 0x1f3   : > { %v3318_v0 = vpop.permute.xlu0 %3317 }
 0x1f4   : > { %v3320_v45 = vunpack.i.h.bf16 %v3318_v0  ;;  %v3319_v15 = vunpack.i.l.bf16 %v3318_v0  ;;  %v1566_v13 = vsel %vm1561_vm11, %v1549_v40, %v3324_v46  ;;  %v1567_v39 = vsel %vm1561_vm11, %v1550_v20, %v3325_v48 }
 0x1f5   : > { %v1580_v50 = vpack.c.bf16 %v1567_v39, %v1566_v13  ;;  %v1898_v48 = vrot.slane %v1778_v42, 2  ;;  %v1849_v20 = vrot.slane %v4875_v26, 1  ;;  %v1850_v0 = vrot.slane %v1778_v42, 1 }
 0x1f6   : > { %v1559_v17 = vsel %vm1544_vm12, %v1542_v19, %v3319_v15  ;;  %v1560_v6 = vsel %vm1544_vm12, %v1543_v14, %v3320_v45  ;;  %v4888_v14 = vld [vmem:[#allocation3 + $0xa0] sm:$0xff] }
 0x1f7   : > { %2904 = vmatmul.msk.bf16.gmra.mxu0 %vm1626_vm13, %v1579_v59  ;;  %v1576_v49 = vsel %vm1561_vm11, %v1559_v17, %v3329_v51  ;;  %v1577_v35 = vsel %vm1561_vm11, %v1560_v6, %v3330_v23  ;;  %v1899_v19 = vsel %vm961_vm3, %v1897_v55, %v1898_v48  ;;  %v1851_v63 = vsel %vm912_vm2, %v1849_v20, %v1850_v0 }
 0x1f8   : > { %v1585_v38 = vpack.c.bf16 %v1577_v35, %v1576_v49  ;;  %v1798_v35 = vld [vmem:[#allocation3 + $0xa8] sm:$0x3] }
 0x1f9   : > { %v1874_v42 = vrot.slane %v1798_v35, 1 }
 0x1fb   : > { %v3333_v9 = vpop.permute.xlu0 %3332 }
 0x1fc   : > { %v3335_v24 = vunpack.i.h.bf16 %v3333_v9  ;;  %v3334_v61 = vunpack.i.l.bf16 %v3333_v9 }
 0x1fe   : > { %v1568_v12 = vsel %vm1561_vm11, %v1551_v52, %v3334_v61  ;;  %v1569_v8 = vsel %vm1561_vm11, %v1552_v43, %v3335_v24  ;;  %v1921_v43 = vrot.slane %v4888_v14, 2 }
 0x1ff   : > { %v1581_v7 = vpack.c.bf16 %v1569_v8, %v1568_v12 }
 0x200   : > { %2909 = vmatmul.msk.bf16.gmra.mxu2 %vm1626_vm13, %v1584_v44 }
 0x207   : > { %2905 = vmatmul.msk.bf16.gmra.mxu0 %vm1626_vm13, %v1580_v50 }
 0x210   : > { %2910 = vmatmul.msk.bf16.gmra.mxu2 %vm1626_vm13, %v1585_v38 }
 0x217   : > { %2906 = vmatmul.msk.bf16.gmra.mxu0 %vm1626_vm13, %v1581_v7 }
 0x263   : > { %v1684_v53 = vpop.f32.mrf.mxu2 }
 0x264   : > { %v1685_v27 = vadd.f32 %v4849_v21, %v1684_v53  ;;  %v1664_v18 = vpop.f32.mrf.mxu0  ;;  %v1922_v53 = vrot.slane %v1798_v35, 2 }
 0x265   : > { %v1665_v33 = vadd.f32 %v4849_v21, %v1664_v18 }
 0x266   : > { %v1716_v4 = vmul.f32 %v4856_v29, %v1685_v27 }
 0x267   : > { %v1708_v36 = vmul.f32 %v4856_v29, %v1665_v33 }
 0x268   : > { %v1736_v59 = vadd.f32 %v4864_v31, %v1716_v4 }
 0x269   : > { %v1728_v3 = vadd.f32 %v4864_v31, %v1708_v36 }
 0x26a   : > { %v1752_v30 = vmax.f32 %v1736_v59, 0.0 }
 0x26b   : > { %v1744_v47 = vmax.f32 %v1728_v3, 0.0  ;;  %v1686_v41 = vpop.f32.mrf.mxu2 }
 0x26c   : > { %1769 = vst.msk [vmem:[#allocation3 + $0xb1] sm:$0xff] %vm1442_vm4, %v1752_v30  ;;  %v1687_v10 = vadd.f32 %v4849_v21, %v1686_v41  ;;  %v1666_v54 = vpop.f32.mrf.mxu0 }
 0x26d   : > { %1761 = vst.msk [vmem:[#allocation3 + $0x11] sm:$0xff] %vm1442_vm4, %v1744_v47  ;;  %v1667_v22 = vadd.f32 %v4849_v21, %v1666_v54  ;;  %v1923_v54 = vsel %vm961_vm3, %v1921_v43, %v1922_v53 }
 0x26e   : > { %v1717_v44 = vmul.f32 %v4856_v29, %v1687_v10 }
 0x26f   : > { %v1709_v11 = vmul.f32 %v4856_v29, %v1667_v22  ;;  %v1873_v22 = vrot.slane %v4888_v14, 1 }
 0x270   : > { %v1737_v60 = vadd.f32 %v4864_v31, %v1717_v44 }
 0x271   : > { %v1729_v46 = vadd.f32 %v4864_v31, %v1709_v11 }
 0x272   : > { %v1753_v40 = vmax.f32 %v1737_v60, 0.0 }
 0x273   : > { %v1745_v23 = vmax.f32 %v1729_v46, 0.0  ;;  %v1689_v51 = vpop.f32.mrf.mxu2  ;;  %v4900_v61 = vld [vmem:[#allocation3 + $0xb0] sm:$0xff]  ;;  %v1800_v52 = vld [vmem:[#allocation3 + $0xb8] sm:$0x3] }
 0x274   : > { %1770 = vst.msk [vmem:[#allocation3 + $0xc1] sm:$0xff] %vm1442_vm4, %v1753_v40  ;;  %v1690_v45 = vadd.f32 %v4849_v21, %v1689_v51  ;;  %v1669_v15 = vpop.f32.mrf.mxu0  ;;  %v4885_v13 = vld [vmem:[#allocation3 + $0x10] sm:$0xff]  ;;  %v1780_v39 = vld [vmem:[#allocation3 + $0x18] sm:$0x3]  ;;  %v1924_v4 = vrot.slane %v4900_v61, 2  ;;  %v1925_v36 = vrot.slane %v1800_v52, 2 }
 0x275   : > { %1762 = vst.msk [vmem:[#allocation3 + $0x21] sm:$0xff] %vm1442_vm4, %v1745_v23  ;;  %v1670_v50 = vadd.f32 %v4849_v21, %v1669_v15  ;;  %v1900_v17 = vrot.slane %v4885_v13, 2  ;;  %v1901_v6 = vrot.slane %v1780_v39, 2  ;;  %v1852_v49 = vrot.slane %v4885_v13, 1 }
 0x276   : > { %v1718_v38 = vmul.f32 %v4856_v29, %v1690_v45  ;;  %v1853_v25 = vrot.slane %v1780_v39, 1  ;;  %v4923_v46 = vsel %vm961_vm3, %v1924_v4, %v1925_v36  ;;  %v1876_v40 = vrot.slane %v4900_v61, 1 }
 0x277   : > { %v1710_v9 = vmul.f32 %v4856_v29, %v1670_v50  ;;  %v4898_v24 = vsel %vm961_vm3, %v1900_v17, %v1901_v6  ;;  %v1877_v20 = vrot.slane %v1800_v52, 1  ;;  %v3356_v39 = vpack.i.bf16 %v4923_v46, %v1923_v54 }
 0x278   : > { %v1738_v12 = vadd.f32 %v4864_v31, %v1718_v38  ;;  %v3341_v8 = vpack.i.bf16 %v4898_v24, %v1899_v19  ;;  %v1854_v7 = vsel %vm912_vm2, %v1852_v49, %v1853_v25  ;;  %v1875_v19 = vsel %vm912_vm2, %v1873_v22, %v1874_v42 }
 0x279   : > { %v1730_v27 = vadd.f32 %v4864_v31, %v1710_v9  ;;  %v3336_v18 = vpack.i.bf16 %v1854_v7, %v1851_v63  ;;  %v1878_v17 = vsel %vm912_vm2, %v1876_v40, %v1877_v20 }
 0x27a   : > { %v1754_v33 = vmax.f32 %v1738_v12, 0.0  ;;  %3342 = vrot.lane.b32.xlu0 %v3341_v8, %s3672_s20  ;;  %v3351_v52 = vpack.i.bf16 %v1878_v17, %v1875_v19 }
 0x27b   : > { %v1746_v59 = vmax.f32 %v1730_v27, 0.0  ;;  %3337 = vrot.lane.b32.xlu1 %v3336_v18, %s3671_s19  ;;  %v1691_v3 = vpop.f32.mrf.mxu2  ;;  %v4941_v43 = vld [vmem:[#allocation3 + $0xc0] sm:$0xff]  ;;  %v1802_v18 = vld [vmem:[#allocation3 + $0xc8] sm:$0x3] }
 0x27c   : > { %1771 = vst.msk [vmem:[#allocation3 + $0xd1] sm:$0xff] %vm1442_vm4, %v1754_v33  ;;  %v1692_v30 = vadd.f32 %v4849_v21, %v1691_v3  ;;  %v1671_v47 = vpop.f32.mrf.mxu0  ;;  %v4912_v41 = vld [vmem:[#allocation3 + $0x20] sm:$0xff]  ;;  %v1782_v10 = vld [vmem:[#allocation3 + $0x28] sm:$0x3]  ;;  %v3371_v4 = vpack.i.bf16 %v4941_v43, %v4900_v61  ;;  %v1880_v54 = vrot.slane %v1802_v18, 1  ;;  %v1927_v20 = vrot.slane %v4941_v43, 2 }
 0x27d   : > { %1763 = vst.msk [vmem:[#allocation3 + $0x31] sm:$0xff] %vm1442_vm4, %v1746_v59  ;;  %v1672_v44 = vadd.f32 %v4849_v21, %v1671_v47  ;;  %v3346_v11 = vpack.i.bf16 %v4912_v41, %v4885_v13  ;;  %v1855_v60 = vrot.slane %v4912_v41, 1  ;;  %v1856_v55 = vrot.slane %v1782_v10, 1 }
 0x27e   : > { %v1719_v48 = vmul.f32 %v4856_v29, %v1692_v30  ;;  %v1903_v6 = vrot.slane %v4912_v41, 2  ;;  %v1904_v49 = vrot.slane %v1782_v10, 2  ;;  %v1879_v10 = vrot.slane %v4941_v43, 1 }
 0x27f   : > { %v1711_v0 = vmul.f32 %v4856_v29, %v1672_v44  ;;  %3347 = vrot.lane.b32.xlu2 %v3346_v11, %s3673_s25  ;;  %v1857_v23 = vsel %vm912_vm2, %v1855_v60, %v1856_v55 }
 0x280   : > { %v1739_v51 = vadd.f32 %v4864_v31, %v1719_v48  ;;  %v3361_v45 = vpack.i.bf16 %v1857_v23, %v1854_v7  ;;  %v1905_v8 = vsel %vm961_vm3, %v1903_v6, %v1904_v49  ;;  %v4969_v40 = vsel %vm912_vm2, %v1879_v10, %v1880_v54 }
 0x281   : > { %v1731_v15 = vadd.f32 %v4864_v31, %v1711_v0  ;;  %v3366_v59 = vpack.i.bf16 %v1905_v8, %v4898_v24  ;;  %v1928_v0 = vrot.slane %v1802_v18, 2  ;;  %v3381_v19 = vpack.i.bf16 %v4969_v40, %v1878_v17 }
 0x282   : > { %v1755_v50 = vmax.f32 %v1739_v51, 0.0  ;;  %3362 = vrot.lane.b32.xlu0 %v3361_v45, %s3674_s26 }
 0x283   : > { %v1747_v35 = vmax.f32 %v1731_v15, 0.0  ;;  %3357 = vrot.lane.b32.xlu1 %v3356_v39, %s3672_s20  ;;  %v1694_v38 = vpop.f32.mrf.mxu2  ;;  %v1929_v6 = vsel %vm961_vm3, %v1927_v20, %v1928_v0 }
 0x284   : > { %1772 = vst.msk [vmem:[#allocation3 + $0xe1] sm:$0xff] %vm1442_vm4, %v1755_v50  ;;  %v1695_v63 = vadd.f32 %v4849_v21, %v1694_v38  ;;  %v1674_v25 = vpop.f32.mrf.mxu0  ;;  %v4945_v7 = vld [vmem:[#allocation3 + $0x30] sm:$0xff]  ;;  %v1784_v53 = vld [vmem:[#allocation3 + $0x38] sm:$0x3] }
 0x285   : > { %1764 = vst.msk [vmem:[#allocation3 + $0x41] sm:$0xff] %vm1442_vm4, %v1747_v35  ;;  %v1675_v9 = vadd.f32 %v4849_v21, %v1674_v25  ;;  %v1858_v3 = vrot.slane %v4945_v7, 1  ;;  %v1859_v30 = vrot.slane %v1784_v53, 1  ;;  %v3376_v60 = vpack.i.bf16 %v4945_v7, %v4912_v41 }
 0x286   : > { %v1720_v12 = vmul.f32 %v4856_v29, %v1695_v63  ;;  %v1906_v49 = vrot.slane %v4945_v7, 2  ;;  %v1907_v35 = vrot.slane %v1784_v53, 2 }
 0x287   : > { %v1712_v27 = vmul.f32 %v4856_v29, %v1675_v9  ;;  %3352 = vrot.lane.b32.xlu2 %v3351_v52, %s3671_s19  ;;  %v4965_v55 = vsel %vm912_vm2, %v1858_v3, %v1859_v30  ;;  %v3386_v9 = vpack.i.bf16 %v1929_v6, %v4923_v46  ;;  %v4987_v52 = vld [vmem:[#allocation3 + $0xd0] sm:$0xff]  ;;  %v1804_v30 = vld [vmem:[#allocation3 + $0xd8] sm:$0x3] }
 0x288   : > { %v1740_v33 = vadd.f32 %v4864_v31, %v1720_v12  ;;  %v3401_v15 = vpack.i.bf16 %v4965_v55, %v1857_v23  ;;  %v4991_v53 = vsel %vm961_vm3, %v1906_v49, %v1907_v35  ;;  %v1883_v20 = vrot.slane %v1804_v30, 1 }
 0x289   : > { %v1732_v36 = vadd.f32 %v4864_v31, %v1712_v27  ;;  %v3396_v46 = vpack.i.bf16 %v4991_v53, %v1905_v8 }
 0x28a   : > { %v1756_v47 = vmax.f32 %v1740_v33, 0.0  ;;  %3372 = vrot.lane.b32.xlu0 %v3371_v4, %s3673_s25  ;;  %v3411_v33 = vpack.i.bf16 %v4987_v52, %v4941_v43 }
 0x28b   : > { %v1748_v22 = vmax.f32 %v1732_v36, 0.0  ;;  %3367 = vrot.lane.b32.xlu1 %v3366_v59, %s3675_s28  ;;  %v1696_v42 = vpop.f32.mrf.mxu2 }
 0x28c   : > { %1773 = vst.msk [vmem:[#allocation3 + $0xf1] sm:$0xff] %vm1442_vm4, %v1756_v47  ;;  %v1697_v44 = vadd.f32 %v4849_v21, %v1696_v42  ;;  %v1676_v11 = vpop.f32.mrf.mxu0  ;;  %v1930_v42 = vrot.slane %v4987_v52, 2 }
 0x28d   : > { %1765 = vst.msk [vmem:[#allocation3 + $0x51] sm:$0xff] %vm1442_vm4, %v1748_v22  ;;  %v1677_v24 = vadd.f32 %v4849_v21, %v1676_v11  ;;  %v5006_v22 = vld [vmem:[#allocation3 + $0x40] sm:$0xff] }
 0x28e   : > { %v1721_v48 = vmul.f32 %v4856_v29, %v1697_v44  ;;  %v1931_v44 = vrot.slane %v1804_v30, 2 }
 0x28f   : > { %v1713_v51 = vmul.f32 %v4856_v29, %v1677_v24  ;;  %3377 = vrot.lane.b32.xlu2 %v3376_v60, %s3676_s29  ;;  %v3416_v60 = vpack.i.bf16 %v5006_v22, %v4945_v7 }
 0x290   : > { %v1741_v45 = vadd.f32 %v4864_v31, %v1721_v48 }
 0x291   : > { %v1733_v39 = vadd.f32 %v4864_v31, %v1713_v51  ;;  %v1932_v51 = vsel %vm961_vm3, %v1930_v42, %v1931_v44 }
 0x292   : > { %v1757_v50 = vmax.f32 %v1741_v45, 0.0  ;;  %3402 = vrot.lane.b32.xlu0 %v3401_v15, %s5711_s27 }
 0x293   : > { %v1749_v38 = vmax.f32 %v1733_v39, 0.0  ;;  %3382 = vrot.lane.b32.xlu1 %v3381_v19, %s3674_s26  ;;  %v1699_v63 = vpop.f32.mrf.mxu2  ;;  %v1861_v19 = vrot.slane %v5006_v22, 1  ;;  %v1808_v42 = vld [vmem:[#allocation3 + $0xf8] sm:$0x3] }
 0x294   : > { %1774 = vst.msk [vmem:[#allocation3 + $0x101] sm:$0xff] %vm1442_vm4, %v1757_v50  ;;  %v1700_v23 = vadd.f32 %v4849_v21, %v1699_v63  ;;  %v1679_v25 = vpop.f32.mrf.mxu0  ;;  %v5028_v49 = vld [vmem:[#allocation3 + $0x50] sm:$0xff]  ;;  %v5032_v63 = vld [vmem:[#allocation3 + $0xe0] sm:$0xff] }
 0x295   : > { %1766 = vst.msk [vmem:[#allocation3 + $0x61] sm:$0xff] %vm1442_vm4, %v1749_v38  ;;  %v1680_v17 = vadd.f32 %v4849_v21, %v1679_v25 }
 0x296   : > { %v1722_v12 = vmul.f32 %v4856_v29, %v1700_v23  ;;  %v1806_v23 = vld [vmem:[#allocation3 + $0xe8] sm:$0x3] }
 0x297   : > { %v1714_v27 = vmul.f32 %v4856_v29, %v1680_v17  ;;  %3387 = vrot.lane.b32.xlu2 %v3386_v9, %s3675_s28  ;;  %v1933_v17 = vrot.slane %v5032_v63, 2  ;;  %v1934_v9 = vrot.slane %v1806_v23, 2 }
 0x298   : > { %v1742_v18 = vadd.f32 %v4864_v31, %v1722_v12 }
 0x299   : > { %v1734_v4 = vadd.f32 %v4864_v31, %v1714_v27 }
 0x29a   : > { %v1758_v36 = vmax.f32 %v1742_v18, 0.0  ;;  %3412 = vrot.lane.b32.xlu0 %v3411_v33, %s3676_s29  ;;  %v1935_v18 = vsel %vm961_vm3, %v1933_v17, %v1934_v9  ;;  %v1885_v33 = vrot.slane %v5032_v63, 1 }
 0x29b   : > { %v1750_v59 = vmax.f32 %v1734_v4, 0.0  ;;  %3397 = vrot.lane.b32.xlu1 %v3396_v46, %s3672_s20  ;;  %v1701_v3 = vpop.f32.mrf.mxu2  ;;  %v1886_v4 = vrot.slane %v1806_v23, 1 }
 0x29c   : > { %1775 = vst.msk [vmem:[#allocation3 + $0x111] sm:$0xff] %vm1442_vm4, %v1758_v36  ;;  %v1702_v47 = vadd.f32 %v4849_v21, %v1701_v3  ;;  %v1681_v10 = vpop.f32.mrf.mxu0  ;;  %v3451_v36 = vpack.i.bf16 %v5032_v63, %v4987_v52 }
 0x29d   : > { %1767 = vst.msk [vmem:[#allocation3 + $0x71] sm:$0xff] %vm1442_vm4, %v1750_v59  ;;  %v1682_v54 = vadd.f32 %v4849_v21, %v1681_v10  ;;  %v1882_v21 = vrot.slane %v4987_v52, 1  ;;  %v1864_v59 = vrot.slane %v5028_v49, 1  ;;  %v1887_v30 = vsel %vm912_vm2, %v1885_v33, %v1886_v4 }
 0x29e   : > { %v1723_v8 = vmul.f32 %v4856_v29, %v1702_v47  ;;  %v1912_v10 = vrot.slane %v5028_v49, 2 }
 0x29f   : > { %v1715_v11 = vmul.f32 %v4856_v29, %v1682_v54  ;;  %3392 = vrot.lane.b32.xlu2 %v3401_v15, %s3671_s19  ;;  %v3426_v29 = vpack.i.bf16 %v1932_v51, %v1929_v6  ;;  %v1884_v15 = vsel %vm912_vm2, %v1882_v21, %v1883_v20  ;;  %v1909_v6 = vrot.slane %v5006_v22, 2 }
 0x2a0   : > { %v1743_v24 = vadd.f32 %v4864_v31, %v1723_v8  ;;  %v3421_v39 = vpack.i.bf16 %v1884_v15, %v4969_v40  ;;  %v3456_v40 = vpack.i.bf16 %v5028_v49, %v5006_v22  ;;  %v5054_v8 = vld [vmem:[#allocation3 + $0xf0] sm:$0xff] }
 0x2a1   : > { %v1735_v48 = vadd.f32 %v4864_v31, %v1715_v11  ;;  %v1786_v31 = vld [vmem:[#allocation3 + $0x48] sm:$0x3]  ;;  %v1936_v11 = vrot.slane %v5054_v8, 2 }
 0x2a2   : > { %v1759_v0 = vmax.f32 %v1743_v24, 0.0  ;;  %3417 = vrot.lane.b32.xlu0 %v3416_v60, %s3673_s25  ;;  %v1862_v50 = vrot.slane %v1786_v31, 1  ;;  %v1910_v38 = vrot.slane %v1786_v31, 2  ;;  %v1937_v24 = vrot.slane %v1808_v42, 2 }
 0x2a3   : > { %v1751_v45 = vmax.f32 %v1735_v48, 0.0  ;;  %3407 = vrot.lane.b32.xlu1 %v3396_v46, %s5712_s30  ;;  %v1788_v46 = vld [vmem:[#allocation3 + $0x58] sm:$0x3] }
 0x2a4   : > { %1776 = vst.msk [vmem:[#allocation3 + $0x121] sm:$0xff] %vm1442_vm4, %v1759_v0  ;;  %v1863_v35 = vsel %vm912_vm2, %v1861_v19, %v1862_v50  ;;  %v1911_v12 = vsel %vm961_vm3, %v1909_v6, %v1910_v38  ;;  %v1865_v3 = vrot.slane %v1788_v46, 1  ;;  %v1913_v54 = vrot.slane %v1788_v46, 2  ;;  %v5089_v46 = vld [vmem:[#allocation3 + $0x70] sm:$0xff] }
 0x2a5   : > { %1768 = vst.msk [vmem:[#allocation3 + $0x81] sm:$0xff] %vm1442_vm4, %v1751_v45  ;;  %v3441_v25 = vpack.i.bf16 %v1863_v35, %v4965_v55  ;;  %v3446_v27 = vpack.i.bf16 %v1911_v12, %v4991_v53  ;;  %v3466_v55 = vpack.i.bf16 %v1935_v18, %v1932_v51  ;;  %v3461_v53 = vpack.i.bf16 %v1887_v30, %v1884_v15  ;;  %v5067_v51 = vld [vmem:[#allocation3 + $0x60] sm:$0xff]  ;;  %v1790_v15 = vld [vmem:[#allocation3 + $0x68] sm:$0x3] }
 0x2a6   : > { %v1866_v47 = vsel %vm912_vm2, %v1864_v59, %v1865_v3  ;;  %v1914_v60 = vsel %vm961_vm3, %v1912_v10, %v1913_v54  ;;  %v1938_v21 = vsel %vm961_vm3, %v1936_v11, %v1937_v24  ;;  %v3491_v0 = vpack.i.bf16 %v5054_v8, %v5032_v63 }
 0x2a7   : > { %3427 = vrot.lane.b32.xlu2 %v3426_v29, %s3672_s20  ;;  %v3471_v44 = vpack.i.bf16 %v1866_v47, %v1863_v35  ;;  %v3476_v48 = vpack.i.bf16 %v1914_v60, %v1911_v12  ;;  %v3506_v20 = vpack.i.bf16 %v1938_v21, %v1935_v18  ;;  %v1888_v45 = vrot.slane %v5054_v8, 1 }
 0x2a8   : > { %v3496_v31 = vpack.i.bf16 %v5067_v51, %v5028_v49  ;;  %v1916_v19 = vrot.slane %v1790_v15, 2  ;;  %v1867_v38 = vrot.slane %v5067_v51, 1  ;;  %v1868_v23 = vrot.slane %v1790_v15, 1 }
 0x2a9   : > { %v3536_v3 = vpack.i.bf16 %v5089_v46, %v5067_v51  ;;  %v1870_v11 = vrot.slane %v5089_v46, 1 }
 0x2aa   : > { %3422 = vrot.lane.b32.xlu0 %v3421_v39, %s3671_s19  ;;  %v1869_v18 = vsel %vm912_vm2, %v1867_v38, %v1868_v23 }
 0x2ab   : > { %3432 = vrot.lane.b32.xlu1 %v3421_v39, %s5711_s27  ;;  %v1915_v39 = vrot.slane %v5067_v51, 2  ;;  %v3521_v33 = vpack.i.bf16 %v1869_v18, %v1866_v47 }
 0x2ad   : > { %v1917_v6 = vsel %vm961_vm3, %v1915_v39, %v1916_v19 }
 0x2ae   : > { %v3526_v17 = vpack.i.bf16 %v1917_v6, %v1914_v60 }
 0x2af   : > { %3437 = vrot.lane.b32.xlu2 %v3426_v29, %s5712_s30  ;;  %v1889_v29 = vrot.slane %v1808_v42, 1 }
 0x2b1   : > { %v1890_v50 = vsel %vm912_vm2, %v1888_v45, %v1889_v29 }
 0x2b2   : > { %3457 = vrot.lane.b32.xlu0 %v3456_v40, %s3676_s29  ;;  %v3511_v35 = vpack.i.bf16 %v1890_v50, %v1887_v30  ;;  %v5079_v40 = vld [vmem:[#allocation3 + $0x100] sm:$0xff]  ;;  %v1918_v30 = vrot.slane %v5089_v46, 2 }
 0x2b3   : > { %3442 = vrot.lane.b32.xlu1 %v3441_v25, %s3674_s26  ;;  %v1810_v25 = vld [vmem:[#allocation3 + $0x108] sm:$0x3]  ;;  %v1891_v12 = vrot.slane %v5079_v40, 1  ;;  %v1939_v47 = vrot.slane %v5079_v40, 2  ;;  %v3531_v54 = vpack.i.bf16 %v5079_v40, %v5054_v8 }
 0x2b4   : > { %v1940_v10 = vrot.slane %v1810_v25, 2 }
 0x2b7   : > { %3447 = vrot.lane.b32.xlu2 %v3446_v27, %s3675_s28  ;;  %v1892_v27 = vrot.slane %v1810_v25, 1 }
 0x2b9   : > { %v1893_v4 = vsel %vm912_vm2, %v1891_v12, %v1892_v27  ;;  %v2960_v27 = vld [vmem:[%s3779_s21 + $0x10] sm:$0xff] }
 0x2ba   : > { %3467 = vrot.lane.b32.xlu0 %v3466_v55, %s3675_s28  ;;  %v1792_v55 = vld [vmem:[#allocation3 + $0x78] sm:$0x3] }
 0x2bb   : > { %3452 = vrot.lane.b32.xlu1 %v3451_v36, %s3673_s25  ;;  %v3541_v36 = vpack.i.bf16 %v1893_v4, %v1890_v50  ;;  %v1871_v24 = vrot.slane %v1792_v55, 1 }
 0x2bd   : > { %v1872_v29 = vsel %vm912_vm2, %v1870_v11, %v1871_v24 }
 0x2be   : > { %v3561_v19 = vpack.i.bf16 %v1872_v29, %v1869_v18 }
 0x2bf   : > { %3462 = vrot.lane.b32.xlu2 %v3461_v53, %s3674_s26  ;;  %v1919_v53 = vrot.slane %v1792_v55, 2 }
 0x2c1   : > { %v5103_v42 = vsel %vm961_vm3, %v1918_v30, %v1919_v53  ;;  %v5143_v30 = vld [vmem:[#allocation3 + $0x80] sm:$0xff]  ;;  %v1794_v53 = vld [vmem:[#allocation3 + $0x88] sm:$0x3] }
 0x2c2   : > { %3472 = vrot.lane.b32.xlu0 %v3471_v44, %s3671_s19  ;;  %v3556_v60 = vpack.i.bf16 %v5103_v42, %v1917_v6  ;;  %v1812_v6 = vld [vmem:[#allocation3 + $0x118] sm:$0x3]  ;;  %v1949_v24 = vrot.slane %v5143_v30, 1 }
 0x2c3   : > { %3482 = vrot.lane.b32.xlu1 %v3471_v44, %s5711_s27  ;;  %v1941_v44 = vsel %vm961_vm3, %v1939_v47, %v1940_v10  ;;  %v1895_v25 = vrot.slane %v1812_v6, 1  ;;  %v1943_v12 = vrot.slane %v1812_v6, 2  ;;  %v2959_v47 = vld [vmem:[%s3779_s21 + $0x8] sm:$0xff]  ;;  %v1956_v6 = vrot.slane %v1794_v53, 2 }
 0x2c7   : > { %3477 = vrot.lane.b32.xlu2 %v3476_v48, %s3672_s20 }
 0x2ca   : > { %3507 = vrot.lane.b32.xlu0 %v3506_v20, %s3672_s20 }
 0x2cb   : > { %3492 = vrot.lane.b32.xlu1 %v3491_v0, %s3676_s29  ;;  %v3546_v0 = vpack.i.bf16 %v1941_v44, %v1938_v21  ;;  %v2961_v21 = vld [vmem:[%s3779_s21 + $0x18] sm:$0xff] }
 0x2cf   : > { %3487 = vrot.lane.b32.xlu2 %v3476_v48, %s5712_s30  ;;  %v2505_v48 = vld [vmem:[%s3779_s21 + $0x20] sm:$0xf] }
 0x2d0   : > { %v2527_v45 = vunpack.c.l.b16 %v2505_v48  ;;  %v2958_v48 = vld [vmem:[%s3779_s21] sm:$0xff] }
 0x2d2   : > { %3517 = vrot.lane.b32.xlu0 %v3506_v20, %s5712_s30  ;;  %v2532_v15 = vpack.c.b16 %v2527_v45, %v2527_v45 }
 0x2d3   : > { %3497 = vrot.lane.b32.xlu1 %v3496_v31, %s3673_s25 }
 0x2d4   : > { %v2562_v50 = vsel %vm1651_vm9, %v2532_v15, 0 }
 0x2d5   : > { %2567 = vmatpush.bf16.msra.mxu1 %v2562_v50  ;;  %2991 = vmatpush.bf16.msra.mxu3 %v2562_v50  ;;  %v1955_v50 = vrot.slane %v5143_v30, 2 }
 0x2d7   : > { %3512 = vrot.lane.b32.xlu2 %v3511_v35, %s5711_s27 }
 0x2d9   : > { %v5082_v9 = vpop.permute.xlu2 %3347  ;;  %2568 = vmatpush.bf16.msra.mxu1 %v2961_v21  ;;  %2992 = vmatpush.bf16.msra.mxu3 %v2961_v21  ;;  %v1813_v21 = vld [vmem:[#allocation3 + $0x120] sm:$0xff] }
 0x2da   : > { %3527 = vrot.lane.b32.xlu0 %v3526_v17, %s3675_s28 }
 0x2db   : > { %3502 = vrot.lane.b32.xlu1 %v3511_v35, %s3671_s19  ;;  %v5120_v35 = vld [vmem:[#allocation3 + $0x110] sm:$0xff] }
 0x2dc   : > { %v1894_v23 = vrot.slane %v5120_v35, 1  ;;  %v1942_v17 = vrot.slane %v5120_v35, 2  ;;  %v3571_v55 = vpack.i.bf16 %v5120_v35, %v5079_v40 }
 0x2dd   : > { %2569 = vmatpush.bf16.msra.mxu1 %v2960_v27  ;;  %2993 = vmatpush.bf16.msra.mxu3 %v2960_v27  ;;  %v1816_v27 = vld [vmem:[#allocation3 + $0x138] sm:$0x3] }
 0x2de   : > { %v1969_v37 = vrot.slane %v1816_v27, 1 }
 0x2df   : > { %3522 = vrot.lane.b32.xlu2 %v3521_v33, %s3674_s26 }
 0x2e1   : > { %v5092_v59 = vpop.permute.xlu2 %3352  ;;  %2570 = vmatpush.bf16.msra.mxu1 %v2959_v47  ;;  %2994 = vmatpush.bf16.msra.mxu3 %v2959_v47  ;;  %v1958_v47 = vrot.slane %v1813_v21, 2 }
 0x2e2   : > { %3542 = vrot.lane.b32.xlu0 %v3541_v36, %s3674_s26  ;;  %v5138_v36 = vsel %vm912_vm2, %v1894_v23, %v1895_v25  ;;  %v1814_v23 = vld [vmem:[#allocation3 + $0x128] sm:$0x3] }
 0x2e3   : > { %3537 = vrot.lane.b32.xlu1 %v3536_v3, %s3676_s29  ;;  %v5141_v3 = vsel %vm961_vm3, %v1942_v17, %v1943_v12  ;;  %v3591_v10 = vpack.i.bf16 %v5138_v36, %v1893_v4  ;;  %v3576_v4 = vpack.i.bf16 %v5143_v30, %v5089_v46  ;;  %v1815_v12 = vld [vmem:[#allocation3 + $0x130] sm:$0xff]  ;;  %v1953_v62 = vrot.slane %v1814_v23, 1 }
 0x2e4   : > { %v3586_v11 = vpack.i.bf16 %v5141_v3, %v1941_v44 }
 0x2e5   : > { %2571 = vmatpush.bf16.msra.mxu1 %v2958_v48  ;;  %2995 = vmatpush.bf16.msra.mxu3 %v2958_v48  ;;  %v3611_v48 = vpack.i.bf16 %v1813_v21, %v5120_v35 }
 0x2e7   : > { %3532 = vrot.lane.b32.xlu2 %v3531_v54, %s3673_s25 }
 0x2e9   : > { %v5110_v20 = vpop.permute.xlu2 %3377 }
 0x2ea   : > { %3557 = vrot.lane.b32.xlu0 %v3556_v60, %s3672_s20 }
 0x2eb   : > { %3547 = vrot.lane.b32.xlu1 %v3546_v0, %s3675_s28 }
 0x2ec   : > { %v5115_v31 = vpop.permute.xlu0 %3342 }
 0x2ed   : > { %v5117_v39 = vpop.permute.xlu1 %3337  ;;  %v3345_v57 = vunpack.i.h.bf16 %v5115_v31 }
 0x2ef   : > { %3562 = vrot.lane.b32.xlu2 %v3561_v19, %s5711_s27 }
 0x2f1   : > { %v5124_v38 = vpop.permute.xlu2 %3387 }
 0x2f2   : > { %3567 = vrot.lane.b32.xlu0 %v3556_v60, %s5712_s30  ;;  %v1950_v60 = vrot.slane %v1794_v53, 1  ;;  %v3340_v53 = vunpack.i.h.bf16 %v5117_v39 }
 0x2f3   : > { %3552 = vrot.lane.b32.xlu1 %v3561_v19, %s3671_s19 }
 0x2f4   : > { %v5131_v18 = vpop.permute.xlu0 %3362  ;;  %v5162_v15 = vsel %vm912_vm2, %v1949_v24, %v1950_v60  ;;  %v1959_v24 = vrot.slane %v1814_v23, 2  ;;  %v5180_v60 = vld [vmem:[#allocation3 + $0x98] sm:$0x3]  ;;  %v2362_v5 = vsel %vm1442_vm4, %v4885_v13, %v3340_v53  ;;  %v1968_v23 = vrot.slane %v1815_v12, 1 }
 0x2f5   : > { %v5133_v33 = vpop.permute.xlu1 %3357  ;;  %v3601_v44 = vpack.i.bf16 %v5162_v15, %v1872_v29  ;;  %v5178_v29 = vsel %vm961_vm3, %v1955_v50, %v1956_v6  ;;  %v1952_v6 = vrot.slane %v1813_v21, 1  ;;  %v1966_v58 = vrot.slane %v5180_v60, 1 }
 0x2f6   : > { %v3606_v50 = vpack.i.bf16 %v5178_v29, %v5103_v42  ;;  %v3365_v53 = vunpack.i.h.bf16 %v5131_v18 }
 0x2f7   : > { %3572 = vrot.lane.b32.xlu2 %v3571_v55, %s3676_s29  ;;  %v5175_v55 = vld [vmem:[#allocation3 + $0x90] sm:$0xff] }
 0x2f8   : > { %v1965_v34 = vrot.slane %v5175_v55, 1 }
 0x2f9   : > { %v5148_v54 = vpop.permute.xlu2 %3392 }
 0x2fa   : > { %3592 = vrot.lane.b32.xlu0 %v3591_v10, %s5711_s27  ;;  %v1967_v13 = vsel %vm912_vm2, %v1965_v34, %v1966_v58  ;;  %v1970_v58 = vsel %vm912_vm2, %v1968_v23, %v1969_v37 }
 0x2fb   : > { %3587 = vrot.lane.b32.xlu1 %v3586_v11, %s3672_s20 }
 0x2fc   : > { %v5155_v0 = vpop.permute.xlu0 %3372 }
 0x2fd   : > { %v5157_v45 = vpop.permute.xlu1 %3367 }
 0x2ff   : > { %3577 = vrot.lane.b32.xlu2 %v3576_v4, %s3673_s25  ;;  %v1974_v4 = vrot.slane %v1815_v12, 2 }
 0x301   : > { %v5166_v19 = vpop.permute.xlu2 %3427 }
 0x302   : > { %3602 = vrot.lane.b32.xlu0 %v3601_v44, %s3674_s26  ;;  %v1975_v44 = vrot.slane %v1816_v27, 2  ;;  %v3350_v27 = vunpack.i.h.bf16 %v5082_v9 }
 0x303   : > { %3597 = vrot.lane.b32.xlu1 %v3586_v11, %s5712_s30  ;;  %v3339_v11 = vunpack.i.l.bf16 %v5117_v39  ;;  %v3344_v39 = vunpack.i.l.bf16 %v5115_v31 }
 0x304   : > { %v5171_v25 = vpop.permute.xlu0 %3402 }
 0x305   : > { %v5173_v17 = vpop.permute.xlu1 %3382  ;;  %v2361_v56 = vsel %vm1442_vm4, %v4875_v26, %v3339_v11  ;;  %v3364_v11 = vunpack.i.l.bf16 %v5131_v18  ;;  %v1972_v18 = vrot.slane %v5180_v60, 2  ;;  %v3404_v23 = vunpack.i.l.bf16 %v5171_v25 }
 0x306   : > { %v2377_v26 = vsel %vm1459_vm5, %v2361_v56, %v3344_v39  ;;  %v3405_v39 = vunpack.i.h.bf16 %v5171_v25  ;;  %v3354_v60 = vunpack.i.l.bf16 %v5092_v59  ;;  %v3374_v25 = vunpack.i.l.bf16 %v5155_v0 }
 0x307   : > { %3582 = vrot.lane.b32.xlu2 %v3591_v10, %s3671_s19  ;;  %v1960_v10 = vsel %vm961_vm3, %v1958_v47, %v1959_v24  ;;  %v1976_v47 = vsel %vm961_vm3, %v1974_v4, %v1975_v44  ;;  %v2378_v24 = vsel %vm1459_vm5, %v2362_v5, %v3345_v57  ;;  %v3616_v4 = vpack.i.bf16 %v1815_v12, %v1813_v21  ;;  %s5713_s19 = scalar_lea.vmem %s5666_s9, %s3756_s23 }
 0x308   : > { %v3626_v31 = vpack.i.bf16 %v1960_v10, %v5141_v3  ;;  %v3370_v3 = vunpack.i.h.bf16 %v5157_v45  ;;  %v1971_v57 = vrot.slane %v5175_v55, 2  ;;  %v2394_v5 = vsel %vm1476_vm6, %v2378_v24, %v3350_v27 }
 0x309   : > { %v5187_v32 = vpop.permute.xlu2 %3437  ;;  %v2410_v44 = vsel %vm1493_vm7, %v2394_v5, %v3365_v53  ;;  %v3636_v37 = vpack.i.bf16 %v1976_v47, %v1960_v10  ;;  %v3646_v21 = vpack.i.bf16 %v1967_v13, %v5162_v15  ;;  %v3379_v10 = vunpack.i.l.bf16 %v5110_v20 }
 0x30a   : > { %3612 = vrot.lane.b32.xlu0 %v3611_v48, %s3673_s25  ;;  %v5207_v48 = vsel %vm912_vm2, %v1952_v6, %v1953_v62  ;;  %v3369_v62 = vunpack.i.l.bf16 %v5157_v45  ;;  %v2426_v6 = vsel %vm1510_vm8, %v2410_v44, %v3370_v3  ;;  %v3360_v15 = vunpack.i.h.bf16 %v5133_v33 }
 0x30b   : > { %3607 = vrot.lane.b32.xlu1 %v3606_v50, %s3675_s28  ;;  %v3349_v50 = vunpack.i.l.bf16 %v5082_v9  ;;  %v3621_v9 = vpack.i.bf16 %v5207_v48, %v5138_v36  ;;  %v3355_v36 = vunpack.i.h.bf16 %v5092_v59  ;;  %v3359_v13 = vunpack.i.l.bf16 %v5133_v33 }
 0x30c   : > { %v5201_v42 = vpop.permute.xlu0 %3412  ;;  %v3375_v24 = vunpack.i.h.bf16 %v5155_v0  ;;  %v3385_v3 = vunpack.i.h.bf16 %v5173_v17  ;;  %v2369_v0 = vsel %vm1442_vm4, %v4888_v14, %v3354_v60  ;;  %v1973_v60 = vsel %vm961_vm3, %v1971_v57, %v1972_v18 }
 0x30d   : > { %v5203_v2 = vpop.permute.xlu1 %3397  ;;  %v2393_v56 = vsel %vm1476_vm6, %v2377_v26, %v3349_v50  ;;  %v2370_v33 = vsel %vm1442_vm4, %v4900_v61, %v3355_v36  ;;  %v3651_v57 = vpack.i.bf16 %v1973_v60, %v5178_v29 }
 0x30e   : > { %v2409_v45 = vsel %vm1493_vm7, %v2393_v56, %v3364_v11  ;;  %v2386_v5 = vsel %vm1459_vm5, %v2370_v33, %v3360_v15  ;;  %v3399_v29 = vunpack.i.l.bf16 %v5203_v2 }
 0x30f   : > { %3627 = vrot.lane.b32.xlu2 %v3626_v31, %s3675_s28  ;;  %v2425_v12 = vsel %vm1510_vm8, %v2409_v45, %v3369_v62  ;;  %v3380_v31 = vunpack.i.h.bf16 %v5110_v20  ;;  %v3384_v62 = vunpack.i.l.bf16 %v5173_v17  ;;  %v3631_v17 = vpack.i.bf16 %v1970_v58, %v5207_v48 }
 0x310   : > { %v2441_v53 = vsel %vm1527_vm10, %v2425_v12, %v3379_v10  ;;  %v2402_v61 = vsel %vm1476_vm6, %v2386_v5, %v3375_v24  ;;  %v3390_v48 = vunpack.i.h.bf16 %v5124_v38  ;;  %v3389_v58 = vunpack.i.l.bf16 %v5124_v38 }
 0x311   : > { %v5224_v34 = vpop.permute.xlu2 %3447  ;;  %v2442_v11 = vsel %vm1527_vm10, %v2426_v6, %v3380_v31  ;;  %v2457_v50 = vsel %vm1544_vm12, %v2441_v53, %v3404_v23  ;;  %v2418_v12 = vsel %vm1493_vm7, %v2402_v61, %v3385_v3  ;;  %v3415_v6 = vunpack.i.h.bf16 %v5201_v42 }
 0x312   : > { %3617 = vrot.lane.b32.xlu0 %v3616_v4, %s3676_s29  ;;  %v2458_v20 = vsel %vm1544_vm12, %v2442_v11, %v3405_v39  ;;  %v3414_v39 = vunpack.i.l.bf16 %v5201_v42  ;;  %v2434_v10 = vsel %vm1510_vm8, %v2418_v12, %v3390_v48  ;;  %v3439_v24 = vunpack.i.l.bf16 %v5187_v32 }
 0x313   : > { %3622 = vrot.lane.b32.xlu1 %v3621_v9, %s3674_s26  ;;  %v2385_v9 = vsel %vm1459_vm5, %v2369_v0, %v3359_v13  ;;  %v3440_v13 = vunpack.i.h.bf16 %v5187_v32  ;;  %v2450_v38 = vsel %vm1527_vm10, %v2434_v10, %v3415_v6  ;;  %v3449_v12 = vunpack.i.l.bf16 %v5224_v34  ;;  %s5714_s26 = scalar_lea.vmem %s5667_s10, %s3756_s23 }
 0x314   : > { %v5242_v47 = vpop.permute.xlu0 %3417 }
 0x315   : > { %v3408_v26 = vpop.permute.xlu1 %3407  ;;  %v3420_v3 = vunpack.i.h.bf16 %v5242_v47 }
 0x316   : > { %v3410_v59 = vunpack.i.h.bf16 %v3408_v26  ;;  %v3409_v27 = vunpack.i.l.bf16 %v3408_v26 }
 0x317   : > { %3637 = vrot.lane.b32.xlu2 %v3636_v37, %s5712_s30  ;;  %v2401_v37 = vsel %vm1476_vm6, %v2385_v9, %v3374_v25 }
 0x318   : > { %v2473_v4 = vsel %vm1561_vm11, %v2457_v50, %v3409_v27  ;;  %v2474_v56 = vsel %vm1561_vm11, %v2458_v20, %v3410_v59  ;;  %v2417_v14 = vsel %vm1493_vm7, %v2401_v37, %v3384_v62  ;;  %v3395_v27 = vunpack.i.h.bf16 %v5148_v54 }
 0x319   : > { %v5263_v45 = vpop.permute.xlu2 %3462  ;;  %v2489_v44 = vpack.c.bf16 %v2474_v56, %v2473_v4  ;;  %v2433_v31 = vsel %vm1510_vm8, %v2417_v14, %v3389_v58  ;;  %v3394_v50 = vunpack.i.l.bf16 %v5148_v54  ;;  %v3400_v20 = vunpack.i.h.bf16 %v5203_v2 }
 0x31a   : > { %3647 = vrot.lane.b32.xlu0 %v3646_v21, %s5711_s27  ;;  %v3641_v21 = vpack.i.bf16 %v5175_v55, %v5143_v30  ;;  %v2449_v25 = vsel %vm1527_vm10, %v2433_v31, %v3414_v39  ;;  %v3419_v62 = vunpack.i.l.bf16 %v5242_v47  ;;  %v2364_v9 = vsel %vm1442_vm4, %v4945_v7, %v3395_v27 }
 0x31b   : > { %3632 = vrot.lane.b32.xlu1 %v3631_v17, %s5711_s27  ;;  %2927 = vmatmul.msk.bf16.vlgmr.msra.gmra.mxu1 %vm1626_vm13, %v2489_v44  ;;  %v2363_v17 = vsel %vm1442_vm4, %v4912_v41, %v3394_v50  ;;  %v2380_v54 = vsel %vm1459_vm5, %v2364_v9, %v3400_v20  ;;  %v3450_v14 = vunpack.i.h.bf16 %v5224_v34  ;;  %v3465_v20 = vunpack.i.h.bf16 %v5263_v45 }
 0x31c   : > { %v3423_v23 = vpop.permute.xlu0 %3422  ;;  %v2379_v44 = vsel %vm1459_vm5, %v2363_v17, %v3399_v29  ;;  %v2396_v37 = vsel %vm1476_vm6, %v2380_v54, %v3420_v3 }
 0x31d   : > { %v3433_v36 = vpop.permute.xlu1 %3432  ;;  %v2395_v2 = vsel %vm1476_vm6, %v2379_v44, %v3419_v62  ;;  %v3425_v7 = vunpack.i.h.bf16 %v3423_v23  ;;  %v3424_v6 = vunpack.i.l.bf16 %v3423_v23 }
 0x31e   : > { %v3435_v42 = vunpack.i.h.bf16 %v3433_v36  ;;  %v3434_v15 = vunpack.i.l.bf16 %v3433_v36 }
 0x31f   : > { %3642 = vrot.lane.b32.xlu2 %v3641_v21, %s3676_s29  ;;  %v2372_v60 = vsel %vm1442_vm4, %v4987_v52, %v3425_v7  ;;  %v2371_v31 = vsel %vm1442_vm4, %v4941_v43, %v3424_v6  ;;  %v3430_v52 = vunpack.i.h.bf16 %v5166_v19 }
 0x320   : > { %v2465_v30 = vsel %vm1544_vm12, %v2449_v25, %v3434_v15  ;;  %v2466_v55 = vsel %vm1544_vm12, %v2450_v38, %v3435_v42 }
 0x321   : > { %v2481_v18 = vsel %vm1561_vm11, %v2465_v30, %v3439_v24  ;;  %v2482_v26 = vsel %vm1561_vm11, %v2466_v55, %v3440_v13  ;;  %v5292_v11 = vpop.permute.xlu2 %3477 }
 0x322   : > { %v2493_v53 = vpack.c.bf16 %v2482_v26, %v2481_v18 }
 0x323   : > { %3652 = vrot.lane.b32.xlu1 %v3651_v57, %s5712_s30  ;;  %v3429_v57 = vunpack.i.l.bf16 %v5166_v19  ;;  %v3464_v19 = vunpack.i.l.bf16 %v5263_v45 }
 0x324   : > { %2931 = vmatmul.msk.bf16.vlgmr.msra.gmra.mxu3 %vm1626_vm13, %v2493_v53  ;;  %v3458_v32 = vpop.permute.xlu0 %3457 }
 0x325   : > { %v3443_v59 = vpop.permute.xlu1 %3442  ;;  %v3460_v58 = vunpack.i.h.bf16 %v3458_v32  ;;  %v3459_v36 = vunpack.i.l.bf16 %v3458_v32  ;;  %v2387_v53 = vsel %vm1459_vm5, %v2371_v31, %v3429_v57  ;;  %v2388_v32 = vsel %vm1459_vm5, %v2372_v60, %v3430_v52 }
 0x326   : > { %v3445_v0 = vunpack.i.h.bf16 %v3443_v59  ;;  %v3444_v4 = vunpack.i.l.bf16 %v3443_v59 }
 0x328   : > { %v2411_v47 = vsel %vm1493_vm7, %v2395_v2, %v3444_v4  ;;  %v2412_v61 = vsel %vm1493_vm7, %v2396_v37, %v3445_v0 }
 0x329   : > { %v3488_v56 = vpop.permute.xlu2 %3487  ;;  %v2427_v41 = vsel %vm1510_vm8, %v2411_v47, %v3449_v12  ;;  %v2428_v39 = vsel %vm1510_vm8, %v2412_v61, %v3450_v14 }
 0x32a   : > { %v3490_v34 = vunpack.i.h.bf16 %v3488_v56  ;;  %v3489_v15 = vunpack.i.l.bf16 %v3488_v56  ;;  %v2443_v13 = vsel %vm1527_vm10, %v2427_v41, %v3459_v36  ;;  %v2444_v24 = vsel %vm1527_vm10, %v2428_v39, %v3460_v58 }
 0x32c   : > { %v3468_v33 = vpop.permute.xlu0 %3467 }
 0x32d   : > { %v3453_v5 = vpop.permute.xlu1 %3452  ;;  %v3470_v56 = vunpack.i.h.bf16 %v3468_v33 }
 0x32e   : > { %v3455_v25 = vunpack.i.h.bf16 %v3453_v5  ;;  %v3454_v38 = vunpack.i.l.bf16 %v3453_v5  ;;  %v3469_v5 = vunpack.i.l.bf16 %v3468_v33 }
 0x330   : > { %v2404_v59 = vsel %vm1476_vm6, %v2388_v32, %v3455_v25  ;;  %v2403_v27 = vsel %vm1476_vm6, %v2387_v53, %v3454_v38  ;;  %v3480_v25 = vunpack.i.h.bf16 %v5292_v11  ;;  %v3479_v38 = vunpack.i.l.bf16 %v5292_v11 }
 0x331   : > { %v3513_v23 = vpop.permute.xlu2 %3512  ;;  %v2420_v3 = vsel %vm1493_vm7, %v2404_v59, %v3465_v20  ;;  %v2419_v62 = vsel %vm1493_vm7, %v2403_v27, %v3464_v19 }
 0x332   : > { %v2435_v17 = vsel %vm1510_vm8, %v2419_v62, %v3469_v5  ;;  %v2436_v54 = vsel %vm1510_vm8, %v2420_v3, %v3470_v56  ;;  %v3515_v37 = vunpack.i.h.bf16 %v3513_v23  ;;  %v3514_v45 = vunpack.i.l.bf16 %v3513_v23 }
 0x334   : > { %v5316_v48 = vpop.permute.xlu0 %3472 }
 0x335   : > { %v3483_v21 = vpop.permute.xlu1 %3482 }
 0x336   : > { %v3485_v10 = vunpack.i.h.bf16 %v3483_v21  ;;  %v3484_v42 = vunpack.i.l.bf16 %v3483_v21 }
 0x338   : > { %v2459_v30 = vsel %vm1544_vm12, %v2443_v13, %v3484_v42  ;;  %v2460_v55 = vsel %vm1544_vm12, %v2444_v24, %v3485_v10  ;;  %v3475_v42 = vunpack.i.h.bf16 %v5316_v48 }
 0x339   : > { %v2475_v43 = vsel %vm1561_vm11, %v2459_v30, %v3489_v15  ;;  %v2476_v18 = vsel %vm1561_vm11, %v2460_v55, %v3490_v34  ;;  %v3523_v9 = vpop.permute.xlu2 %3522  ;;  %v3474_v34 = vunpack.i.l.bf16 %v5316_v48 }
 0x33a   : > { %v2490_v26 = vpack.c.bf16 %v2476_v18, %v2475_v43  ;;  %v2366_v15 = vsel %vm1442_vm4, %v5028_v49, %v3475_v42 }
 0x33b   : > { %v2365_v23 = vsel %vm1442_vm4, %v5006_v22, %v3474_v34  ;;  %v2382_v52 = vsel %vm1459_vm5, %v2366_v15, %v3480_v25  ;;  %v3525_v22 = vunpack.i.h.bf16 %v3523_v9 }
 0x33c   : > { %2928 = vmatmul.msk.bf16.gmra.mxu1 %vm1626_vm13, %v2490_v26  ;;  %v5335_v50 = vpop.permute.xlu0 %3507  ;;  %v2381_v55 = vsel %vm1459_vm5, %v2365_v23, %v3479_v38  ;;  %v3524_v26 = vunpack.i.l.bf16 %v3523_v9 }
 0x33d   : > { %v3493_v29 = vpop.permute.xlu1 %3492 }
 0x33e   : > { %v3495_v0 = vunpack.i.h.bf16 %v3493_v29  ;;  %v3494_v4 = vunpack.i.l.bf16 %v3493_v29 }
 0x340   : > { %v2451_v44 = vsel %vm1527_vm10, %v2435_v17, %v3494_v4  ;;  %v2452_v2 = vsel %vm1527_vm10, %v2436_v54, %v3495_v0 }
 0x341   : > { %v2467_v7 = vsel %vm1544_vm12, %v2451_v44, %v3514_v45  ;;  %v2468_v6 = vsel %vm1544_vm12, %v2452_v2, %v3515_v37  ;;  %v5350_v58 = vpop.permute.xlu2 %3532 }
 0x344   : > { %v3518_v47 = vpop.permute.xlu0 %3517 }
 0x345   : > { %v3520_v61 = vunpack.i.h.bf16 %v3518_v47  ;;  %v3519_v14 = vunpack.i.l.bf16 %v3518_v47  ;;  %v3498_v12 = vpop.permute.xlu1 %3497 }
 0x346   : > { %v3500_v13 = vunpack.i.h.bf16 %v3498_v12  ;;  %v3499_v24 = vunpack.i.l.bf16 %v3498_v12 }
 0x347   : > { %v2483_v33 = vsel %vm1561_vm11, %v2467_v7, %v3519_v14  ;;  %v2484_v41 = vsel %vm1561_vm11, %v2468_v6, %v3520_v61  ;;  %v3510_v7 = vunpack.i.h.bf16 %v5335_v50  ;;  %v3509_v6 = vunpack.i.l.bf16 %v5335_v50 }
 0x348   : > { %v2494_v39 = vpack.c.bf16 %v2484_v41, %v2483_v33  ;;  %v2398_v48 = vsel %vm1476_vm6, %v2382_v52, %v3500_v13  ;;  %v2397_v49 = vsel %vm1476_vm6, %v2381_v55, %v3499_v24 }
 0x349   : > { %v3563_v31 = vpop.permute.xlu2 %3562  ;;  %v2413_v11 = vsel %vm1493_vm7, %v2397_v49, %v3524_v26  ;;  %v2414_v27 = vsel %vm1493_vm7, %v2398_v48, %v3525_v22 }
 0x34a   : > { %2932 = vmatmul.msk.bf16.gmra.mxu3 %vm1626_vm13, %v2494_v39  ;;  %v3565_v62 = vunpack.i.h.bf16 %v3563_v31  ;;  %v3564_v0 = vunpack.i.l.bf16 %v3563_v31 }
 0x34c   : > { %v3528_v36 = vpop.permute.xlu0 %3527 }
 0x34d   : > { %v3503_v21 = vpop.permute.xlu1 %3502  ;;  %v3530_v43 = vunpack.i.h.bf16 %v3528_v36  ;;  %v3529_v18 = vunpack.i.l.bf16 %v3528_v36 }
 0x34e   : > { %v3505_v44 = vunpack.i.h.bf16 %v3503_v21  ;;  %v3504_v2 = vunpack.i.l.bf16 %v3503_v21 }
 0x34f   : > { %v2429_v20 = vsel %vm1510_vm8, %v2413_v11, %v3529_v18  ;;  %v2430_v19 = vsel %vm1510_vm8, %v2414_v27, %v3530_v43 }
 0x350   : > { %v2374_v14 = vsel %vm1442_vm4, %v5054_v8, %v3505_v44  ;;  %v2373_v12 = vsel %vm1442_vm4, %v5032_v63, %v3504_v2  ;;  %v3534_v8 = vunpack.i.l.bf16 %v5350_v58 }
 0x351   : > { %v3573_v53 = vpop.permute.xlu2 %3572  ;;  %v2390_v39 = vsel %vm1459_vm5, %v2374_v14, %v3510_v7  ;;  %v2389_v36 = vsel %vm1459_vm5, %v2373_v12, %v3509_v6 }
 0x352   : > { %v2405_v34 = vsel %vm1476_vm6, %v2389_v36, %v3534_v8  ;;  %v3575_v55 = vunpack.i.h.bf16 %v3573_v53  ;;  %v3574_v52 = vunpack.i.l.bf16 %v3573_v53 }
 0x354   : > { %v5352_v60 = vpop.permute.xlu0 %3542 }
 0x355   : > { %v3538_v10 = vpop.permute.xlu1 %3537  ;;  %v3545_v21 = vunpack.i.h.bf16 %v5352_v60  ;;  %v3544_v31 = vunpack.i.l.bf16 %v5352_v60 }
 0x356   : > { %v3540_v32 = vunpack.i.h.bf16 %v3538_v10  ;;  %v3539_v59 = vunpack.i.l.bf16 %v3538_v10  ;;  %v3535_v10 = vunpack.i.h.bf16 %v5350_v58 }
 0x357   : > { %v2421_v15 = vsel %vm1493_vm7, %v2405_v34, %v3544_v31 }
 0x358   : > { %v2445_v29 = vsel %vm1527_vm10, %v2429_v20, %v3539_v59  ;;  %v2446_v3 = vsel %vm1527_vm10, %v2430_v19, %v3540_v32  ;;  %v2406_v50 = vsel %vm1476_vm6, %v2390_v39, %v3535_v10 }
 0x359   : > { %v2461_v17 = vsel %vm1544_vm12, %v2445_v29, %v3564_v0  ;;  %v2462_v54 = vsel %vm1544_vm12, %v2446_v3, %v3565_v62  ;;  %v5380_v61 = vpop.permute.xlu2 %3577  ;;  %v2422_v23 = vsel %vm1493_vm7, %v2406_v50, %v3545_v21 }
 0x35a   : > { %v3580_v31 = vunpack.i.h.bf16 %v5380_v61  ;;  %v3579_v10 = vunpack.i.l.bf16 %v5380_v61 }
 0x35c   : > { %v5362_v30 = vpop.permute.xlu0 %3557 }
 0x35d   : > { %v3548_v57 = vpop.permute.xlu1 %3547  ;;  %v3559_v39 = vunpack.i.l.bf16 %v5362_v30 }
 0x35e   : > { %v3550_v42 = vunpack.i.h.bf16 %v3548_v57  ;;  %v3549_v63 = vunpack.i.l.bf16 %v3548_v57 }
 0x360   : > { %v2437_v13 = vsel %vm1510_vm8, %v2421_v15, %v3549_v63  ;;  %v2438_v24 = vsel %vm1510_vm8, %v2422_v23, %v3550_v42 }
 0x361   : > { %v3583_v25 = vpop.permute.xlu2 %3582  ;;  %v2453_v48 = vsel %vm1527_vm10, %v2437_v13, %v3574_v52  ;;  %v2454_v49 = vsel %vm1527_vm10, %v2438_v24, %v3575_v55 }
 0x362   : > { %v3585_v19 = vunpack.i.h.bf16 %v3583_v25  ;;  %v3584_v29 = vunpack.i.l.bf16 %v3583_v25 }
 0x364   : > { %v3568_v4 = vpop.permute.xlu0 %3567  ;;  %v2375_v44 = vsel %vm1442_vm4, %v5079_v40, %v3584_v29 }
 0x365   : > { %v3570_v56 = vunpack.i.h.bf16 %v3568_v4  ;;  %v3569_v5 = vunpack.i.l.bf16 %v3568_v4  ;;  %v5374_v9 = vpop.permute.xlu1 %3552 }
 0x367   : > { %v2477_v37 = vsel %vm1561_vm11, %v2461_v17, %v3569_v5  ;;  %v2478_v45 = vsel %vm1561_vm11, %v2462_v54, %v3570_v56  ;;  %v3555_v56 = vunpack.i.h.bf16 %v5374_v9  ;;  %v3554_v5 = vunpack.i.l.bf16 %v5374_v9 }
 0x368   : > { %v2491_v47 = vpack.c.bf16 %v2478_v45, %v2477_v37  ;;  %v2376_v54 = vsel %vm1442_vm4, %v5120_v35, %v3585_v19 }
 0x369   : > { %v3628_v27 = vpop.permute.xlu2 %3627  ;;  %v2368_v9 = vsel %vm1442_vm4, %v5089_v46, %v3555_v56  ;;  %v2367_v35 = vsel %vm1442_vm4, %v5067_v51, %v3554_v5 }
 0x36a   : > { %2929 = vmatmul.msk.bf16.gmra.mxu1 %vm1626_vm13, %v2491_v47  ;;  %v3630_v36 = vunpack.i.h.bf16 %v3628_v27  ;;  %v3629_v21 = vunpack.i.l.bf16 %v3628_v27  ;;  %v2383_v46 = vsel %vm1459_vm5, %v2367_v35, %v3559_v39 }
 0x36c   : > { %v3593_v33 = vpop.permute.xlu0 %3592 }
 0x36d   : > { %v3588_v41 = vpop.permute.xlu1 %3587  ;;  %v3595_v60 = vunpack.i.h.bf16 %v3593_v33  ;;  %v3594_v38 = vunpack.i.l.bf16 %v3593_v33 }
 0x36e   : > { %v3590_v3 = vunpack.i.h.bf16 %v3588_v41  ;;  %v3589_v62 = vunpack.i.l.bf16 %v3588_v41  ;;  %v3560_v41 = vunpack.i.h.bf16 %v5362_v30 }
 0x36f   : > { %v2469_v22 = vsel %vm1544_vm12, %v2453_v48, %v3594_v38  ;;  %v2470_v26 = vsel %vm1544_vm12, %v2454_v49, %v3595_v60  ;;  %v2399_v49 = vsel %vm1476_vm6, %v2383_v46, %v3579_v10 }
 0x370   : > { %v2392_v47 = vsel %vm1459_vm5, %v2376_v54, %v3590_v3  ;;  %v2391_v14 = vsel %vm1459_vm5, %v2375_v44, %v3589_v62  ;;  %v2384_v8 = vsel %vm1459_vm5, %v2368_v9, %v3560_v41  ;;  %v5454_v62 = vld [vmem:[%s5713_s19] ss:$0 sm:$0xff] }
 0x371   : > { %v3638_v12 = vpop.permute.xlu2 %3637  ;;  %v5465_v44 = vld [vmem:[%s5714_s26] ss:$0 sm:$0xff] }
 0x372   : > { %v3640_v63 = vunpack.i.h.bf16 %v3638_v12  ;;  %v3639_v34 = vunpack.i.l.bf16 %v3638_v12 }
 0x374   : > { %v5401_v58 = vpop.permute.xlu0 %3602 }
 0x375   : > { %v3598_v57 = vpop.permute.xlu1 %3597  ;;  %v3605_v30 = vunpack.i.h.bf16 %v5401_v58  ;;  %v3604_v13 = vunpack.i.l.bf16 %v5401_v58 }
 0x376   : > { %v3600_v43 = vunpack.i.h.bf16 %v3598_v57  ;;  %v3599_v18 = vunpack.i.l.bf16 %v3598_v57 }
 0x378   : > { %v2485_v32 = vsel %vm1561_vm11, %v2469_v22, %v3599_v18  ;;  %v2486_v59 = vsel %vm1561_vm11, %v2470_v26, %v3600_v43  ;;  %v2400_v43 = vsel %vm1476_vm6, %v2384_v8, %v3580_v31  ;;  %v2415_v26 = vsel %vm1493_vm7, %v2399_v49, %v3604_v13  ;;  %v5717_v8 = vld [vmem:[#allocation10_spill] sm:$0xff] }
 0x379   : > { %v2495_v11 = vpack.c.bf16 %v2486_v59, %v2485_v32  ;;  %v3643_v18 = vpop.permute.xlu2 %3642  ;;  %v2416_v32 = vsel %vm1493_vm7, %v2400_v43, %v3605_v30 }
 0x37a   : > { %v3645_v19 = vunpack.i.h.bf16 %v3643_v18  ;;  %v3644_v29 = vunpack.i.l.bf16 %v3643_v18  ;;  %v5719_v18 = vld [vmem:[#allocation5_spill] sm:$0xff] }
 0x37b   : > { %2933 = vmatmul.msk.bf16.gmra.mxu3 %vm1626_vm13, %v2495_v11 }
 0x37c   : > { %v3613_v53 = vpop.permute.xlu0 %3612 }
 0x37d   : > { %v3608_v20 = vpop.permute.xlu1 %3607  ;;  %v3615_v0 = vunpack.i.h.bf16 %v3613_v53  ;;  %v3614_v4 = vunpack.i.l.bf16 %v3613_v53 }
 0x37e   : > { %v3610_v61 = vunpack.i.h.bf16 %v3608_v20  ;;  %v3609_v60 = vunpack.i.l.bf16 %v3608_v20 }
 0x37f   : > { %v2407_v7 = vsel %vm1476_vm6, %v2391_v14, %v3614_v4  ;;  %v2408_v6 = vsel %vm1476_vm6, %v2392_v47, %v3615_v0  ;;  %v5475_v14 = vld [vmem:[%s5715_s13] ss:$0 sm:$0xff] }
 0x380   : > { %v2431_v11 = vsel %vm1510_vm8, %v2415_v26, %v3609_v60  ;;  %v2432_v53 = vsel %vm1510_vm8, %v2416_v32, %v3610_v61 }
 0x381   : > { %v2447_v0 = vsel %vm1527_vm10, %v2431_v11, %v3644_v29  ;;  %v2448_v4 = vsel %vm1527_vm10, %v2432_v53, %v3645_v19 }
 0x384   : > { %v3618_v2 = vpop.permute.xlu0 %3617 }
 0x385   : > { %v3623_v17 = vpop.permute.xlu1 %3622  ;;  %v3620_v50 = vunpack.i.h.bf16 %v3618_v2  ;;  %v3619_v15 = vunpack.i.l.bf16 %v3618_v2 }
 0x386   : > { %v3625_v37 = vunpack.i.h.bf16 %v3623_v17  ;;  %v3624_v45 = vunpack.i.l.bf16 %v3623_v17 }
 0x388   : > { %v2423_v40 = vsel %vm1493_vm7, %v2407_v7, %v3624_v45  ;;  %v2424_v33 = vsel %vm1493_vm7, %v2408_v6, %v3625_v37 }
 0x389   : > { %v2439_v51 = vsel %vm1510_vm8, %v2423_v40, %v3629_v21  ;;  %v2440_v42 = vsel %vm1510_vm8, %v2424_v33, %v3630_v36  ;;  %v5716_v40 = vld [vmem:[#allocation7_spill] sm:$0xff] }
 0x38a   : > { %v2455_v38 = vsel %vm1527_vm10, %v2439_v51, %v3619_v15  ;;  %v2456_v55 = vsel %vm1527_vm10, %v2440_v42, %v3620_v50 }
 0x38c   : > { %v3648_v52 = vpop.permute.xlu0 %3647 }
 0x38d   : > { %v3633_v23 = vpop.permute.xlu1 %3632  ;;  %v3650_v27 = vunpack.i.h.bf16 %v3648_v52  ;;  %v3649_v20 = vunpack.i.l.bf16 %v3648_v52  ;;  %v5718_v52 = vld [vmem:[#allocation11_spill] sm:$0xff] }
 0x38e   : > { %v3635_v24 = vunpack.i.h.bf16 %v3633_v23  ;;  %v3634_v25 = vunpack.i.l.bf16 %v3633_v23 }
 0x38f   : > { %v2463_v17 = vsel %vm1544_vm12, %v2447_v0, %v3649_v20  ;;  %v2464_v54 = vsel %vm1544_vm12, %v2448_v4, %v3650_v27  ;;  %v5720_v0 = vld [vmem:[#allocation14_spill] sm:$0xff] }
 0x390   : > { %v2471_v57 = vsel %vm1544_vm12, %v2455_v38, %v3634_v25  ;;  %v2472_v48 = vsel %vm1544_vm12, %v2456_v55, %v3635_v24 }
 0x391   : > { %v2487_v58 = vsel %vm1561_vm11, %v2471_v57, %v3639_v34  ;;  %v2488_v22 = vsel %vm1561_vm11, %v2472_v48, %v3640_v63 }
 0x392   : > { %v2496_v59 = vpack.c.bf16 %v2488_v22, %v2487_v58 }
 0x394   : > { %2934 = vmatmul.msk.bf16.gmra.mxu3 %vm1626_vm13, %v2496_v59 }
 0x395   : > { %v3653_v3 = vpop.permute.xlu1 %3652 }
 0x396   : > { %v3655_v56 = vunpack.i.h.bf16 %v3653_v3  ;;  %v3654_v5 = vunpack.i.l.bf16 %v3653_v3 }
 0x398   : > { %v2573_v2 = vpop.f32.mrf.mxu1  ;;  %v2479_v37 = vsel %vm1561_vm11, %v2463_v17, %v3654_v5  ;;  %v2480_v45 = vsel %vm1561_vm11, %v2464_v54, %v3655_v56 }
 0x399   : > { %v2574_v47 = vadd.f32 %v5454_v62, %v2573_v2  ;;  %v2492_v12 = vpack.c.bf16 %v2480_v45, %v2479_v37  ;;  %v5721_v37 = vld [vmem:[#allocation6_spill] sm:$0xff] }
 0x39b   : > { %v2617_v7 = vmul.f32 %v5465_v44, %v2574_v47  ;;  %2930 = vmatmul.msk.bf16.gmra.mxu1 %vm1626_vm13, %v2492_v12 }
 0x39d   : > { %v2637_v6 = vadd.f32 %v5475_v14, %v2617_v7 }
 0x39f   : > { %v2653_v9 = vmul.f32 0.5, %v2637_v6 }
 0x3a0   : > { %v2575_v35 = vpop.f32.mrf.mxu1 }
 0x3a1   : > { %v5481_v33 = vadd.f32 %v2653_v9, %v5716_v40  ;;  %v2576_v41 = vadd.f32 %v5454_v62, %v2575_v35  ;;  %v5722_v9 = vld [vmem:[#allocation8_spill] sm:$0xff] }
 0x3a3   : > { %2686 = vst.msk [vmem:[#allocation2 + $0x11] sm:$0xff] %vm1442_vm4, %v5481_v33  ;;  %v2618_v39 = vmul.f32 %v5465_v44, %v2576_v41 }
 0x3a5   : > { %v2638_v36 = vadd.f32 %v5475_v14, %v2618_v39 }
 0x3a7   : > { %v2654_v21 = vmul.f32 0.5, %v2638_v36  ;;  %v2593_v31 = vpop.f32.mrf.mxu3 }
 0x3a8   : > { %v2594_v10 = vadd.f32 %v5454_v62, %v2593_v31 }
 0x3a9   : > { %v5490_v46 = vadd.f32 %v2654_v21, %v5717_v8 }
 0x3aa   : > { %v2625_v51 = vmul.f32 %v5465_v44, %v2594_v10  ;;  %v5723_v10 = vld [vmem:[#allocation15_spill] sm:$0xff] }
 0x3ab   : > { %2687 = vst.msk [vmem:[#allocation2 + $0x21] sm:$0xff] %vm1442_vm4, %v5490_v46 }
 0x3ac   : > { %v2645_v42 = vadd.f32 %v5475_v14, %v2625_v51 }
 0x3ae   : > { %v2661_v63 = vmul.f32 0.5, %v2645_v42 }
 0x3af   : > { %v2595_v34 = vpop.f32.mrf.mxu3 }
 0x3b0   : > { %v5497_v50 = vadd.f32 %v2661_v63, %v4176_v16  ;;  %v2596_v15 = vadd.f32 %v5454_v62, %v2595_v34 }
 0x3b2   : > { %2694 = vst.msk [vmem:[#allocation2 + $0xb1] sm:$0xff] %vm1442_vm4, %v5497_v50  ;;  %v2626_v23 = vmul.f32 %v5465_v44, %v2596_v15  ;;  %v5724_v15 = vld [vmem:[#allocation12_spill] sm:$0xff] }
 0x3b4   : > { %v2646_v30 = vadd.f32 %v5475_v14, %v2626_v23 }
 0x3b6   : > { %v2662_v13 = vmul.f32 0.5, %v2646_v30 }
 0x3b8   : > { %v5505_v24 = vadd.f32 %v2662_v13, %v4207_v1 }
 0x3b9   : > { %v2578_v25 = vpop.f32.mrf.mxu1 }
 0x3ba   : > { %2695 = vst.msk [vmem:[#allocation2 + $0xc1] sm:$0xff] %vm1442_vm4, %v5505_v24  ;;  %v2579_v16 = vadd.f32 %v5454_v62, %v2578_v25 }
 0x3bc   : > { %v2619_v61 = vmul.f32 %v5465_v44, %v2579_v16 }
 0x3be   : > { %v2639_v60 = vadd.f32 %v5475_v14, %v2619_v61 }
 0x3c0   : > { %v2655_v38 = vmul.f32 0.5, %v2639_v60 }
 0x3c1   : > { %v2580_v55 = vpop.f32.mrf.mxu1 }
 0x3c2   : > { %v5513_v57 = vadd.f32 %v2655_v38, %v5718_v52  ;;  %v2581_v48 = vadd.f32 %v5454_v62, %v2580_v55 }
 0x3c4   : > { %2688 = vst.msk [vmem:[#allocation2 + $0x31] sm:$0xff] %vm1442_vm4, %v5513_v57  ;;  %v2620_v1 = vmul.f32 %v5465_v44, %v2581_v48 }
 0x3c6   : > { %v2640_v49 = vadd.f32 %v5475_v14, %v2620_v1 }
 0x3c8   : > { %v2656_v43 = vmul.f32 0.5, %v2640_v49  ;;  %v5725_v49 = vld [vmem:[#allocation13_spill] sm:$0xff] }
 0x3ca   : > { %v5521_v58 = vadd.f32 %v2656_v43, %v5719_v18 }
 0x3cc   : > { %2689 = vst.msk [vmem:[#allocation2 + $0x41] sm:$0xff] %vm1442_vm4, %v5521_v58 }
 0x3cd   : > { %v2598_v22 = vpop.f32.mrf.mxu3 }
 0x3ce   : > { %v2599_v26 = vadd.f32 %v5454_v62, %v2598_v22 }
 0x3d0   : > { %v2627_v32 = vmul.f32 %v5465_v44, %v2599_v26  ;;  %v5726_v26 = vld [vmem:[#allocation9_spill] sm:$0xff] }
 0x3d2   : > { %v2647_v59 = vadd.f32 %v5475_v14, %v2627_v32 }
 0x3d4   : > { %v2663_v11 = vmul.f32 0.5, %v2647_v59 }
 0x3d5   : > { %v2600_v53 = vpop.f32.mrf.mxu3 }
 0x3d6   : > { %v5529_v27 = vadd.f32 %v2663_v11, %v4218_v28  ;;  %v2601_v20 = vadd.f32 %v5454_v62, %v2600_v53 }
 0x3d8   : > { %2696 = vst.msk [vmem:[#allocation2 + $0xd1] sm:$0xff] %vm1442_vm4, %v5529_v27  ;;  %v2628_v19 = vmul.f32 %v5465_v44, %v2601_v20 }
 0x3da   : > { %v2648_v29 = vadd.f32 %v5475_v14, %v2628_v19 }
 0x3dc   : > { %v2664_v3 = vmul.f32 0.5, %v2648_v29 }
 0x3de   : > { %v5537_v4 = vadd.f32 %v2664_v3, %v5720_v0  ;;  %v5727_v0 = vld [vmem:[#allocation19_spill] sm:$0xff] }
 0x3e0   : > { %2697 = vst.msk [vmem:[#allocation2 + $0xe1] sm:$0xff] %vm1442_vm4, %v5537_v4 }
 0x3e7   : > { %v2583_v56 = vpop.f32.mrf.mxu1 }
 0x3e8   : > { %v2584_v28 = vadd.f32 %v5454_v62, %v2583_v56 }
 0x3ea   : > { %v2621_v5 = vmul.f32 %v5465_v44, %v2584_v28  ;;  %v5728_v28 = vld [vmem:[#allocation18_spill] sm:$0xff] }
 0x3ec   : > { %v2641_v17 = vadd.f32 %v5475_v14, %v2621_v5 }
 0x3ee   : > { %v2657_v54 = vmul.f32 0.5, %v2641_v17 }
 0x3ef   : > { %v2585_v2 = vpop.f32.mrf.mxu1 }
 0x3f0   : > { %v2673_v45 = vadd.f32 %v2657_v54, %v5721_v37  ;;  %v2586_v47 = vadd.f32 %v5454_v62, %v2585_v2 }
 0x3f2   : > { %2690 = vst.msk [vmem:[#allocation2 + $0x51] sm:$0xff] %vm1442_vm4, %v2673_v45  ;;  %v2622_v12 = vmul.f32 %v5465_v44, %v2586_v47 }
 0x3f4   : > { %v2642_v7 = vadd.f32 %v5475_v14, %v2622_v12 }
 0x3f6   : > { %v2658_v6 = vmul.f32 0.5, %v2642_v7 }
 0x3f8   : > { %v2674_v35 = vadd.f32 %v2658_v6, %v5722_v9 }
 0x3fa   : > { %2691 = vst.msk [vmem:[#allocation2 + $0x61] sm:$0xff] %vm1442_vm4, %v2674_v35 }
 0x3fe   : > { %v2603_v40 = vpop.f32.mrf.mxu3 }
 0x3ff   : > { %v2604_v41 = vadd.f32 %v5454_v62, %v2603_v40 }
 0x401   : > { %v2629_v39 = vmul.f32 %v5465_v44, %v2604_v41 }
 0x403   : > { %v2649_v36 = vadd.f32 %v5475_v14, %v2629_v39 }
 0x405   : > { %v2665_v21 = vmul.f32 0.5, %v2649_v36 }
 0x406   : > { %v2605_v31 = vpop.f32.mrf.mxu3 }
 0x407   : > { %v2681_v8 = vadd.f32 %v2665_v21, %v5723_v10  ;;  %v2606_v51 = vadd.f32 %v5454_v62, %v2605_v31 }
 0x409   : > { %2698 = vst.msk [vmem:[#allocation2 + $0xf1] sm:$0xff] %vm1442_vm4, %v2681_v8  ;;  %v2630_v42 = vmul.f32 %v5465_v44, %v2606_v51 }
 0x40b   : > { %v2650_v63 = vadd.f32 %v5475_v14, %v2630_v42 }
 0x40d   : > { %v2666_v34 = vmul.f32 0.5, %v2650_v63 }
 0x40f   : > { %v2682_v23 = vadd.f32 %v2666_v34, %v5724_v15 }
 0x411   : > { %2699 = vst.msk [vmem:[#allocation2 + $0x101] sm:$0xff] %vm1442_vm4, %v2682_v23 }
 0x417   : > { %v2608_v30 = vpop.f32.mrf.mxu3 }
 0x418   : > { %v2609_v13 = vadd.f32 %v5454_v62, %v2608_v30  ;;  %v2588_v25 = vpop.f32.mrf.mxu1 }
 0x419   : > { %v2589_v16 = vadd.f32 %v5454_v62, %v2588_v25 }
 0x41a   : > { %v2631_v61 = vmul.f32 %v5465_v44, %v2609_v13 }
 0x41b   : > { %v2623_v60 = vmul.f32 %v5465_v44, %v2589_v16 }
 0x41c   : > { %v2651_v38 = vadd.f32 %v5475_v14, %v2631_v61 }
 0x41d   : > { %v2643_v55 = vadd.f32 %v5475_v14, %v2623_v60 }
 0x41e   : > { %v2667_v52 = vmul.f32 0.5, %v2651_v38 }
 0x41f   : > { %v2659_v48 = vmul.f32 0.5, %v2643_v55  ;;  %v2610_v1 = vpop.f32.mrf.mxu3 }
 0x420   : > { %v2683_v43 = vadd.f32 %v2667_v52, %v5725_v49  ;;  %v2611_v18 = vadd.f32 %v5454_v62, %v2610_v1  ;;  %v2590_v22 = vpop.f32.mrf.mxu1 }
 0x421   : > { %v2675_v32 = vadd.f32 %v2659_v48, %v5726_v26  ;;  %v2591_v59 = vadd.f32 %v5454_v62, %v2590_v22 }
 0x422   : > { %2700 = vst.msk [vmem:[#allocation2 + $0x111] sm:$0xff] %vm1442_vm4, %v2683_v43  ;;  %v2632_v11 = vmul.f32 %v5465_v44, %v2611_v18 }
 0x423   : > { %2692 = vst.msk [vmem:[#allocation2 + $0x71] sm:$0xff] %vm1442_vm4, %v2675_v32  ;;  %v2624_v53 = vmul.f32 %v5465_v44, %v2591_v59 }
 0x424   : > { %v2652_v20 = vadd.f32 %v5475_v14, %v2632_v11 }
 0x425   : > { %v2644_v19 = vadd.f32 %v5475_v14, %v2624_v53 }
 0x426   : > { %v2668_v29 = vmul.f32 0.5, %v2652_v20 }
 0x427   : > { %v2660_v3 = vmul.f32 0.5, %v2644_v19  ;;  %2705 = sbr.rel (%p2935_p5) target bundleno = 1084 (0x43c), region = 76 }
 0x428   : > { %v2684_v56 = vadd.f32 %v2668_v29, %v5727_v0 }
 0x429   : > { %v2676_v5 = vadd.f32 %v2660_v3, %v5728_v28 }
 0x42a   : > { %2701 = vst.msk [vmem:[#allocation2 + $0x121] sm:$0xff] %vm1442_vm4, %v2684_v56 }
 0x42b   : > { %2693 = vst.msk [vmem:[#allocation2 + $0x81] sm:$0xff] %vm1442_vm4, %v2676_v5 }
 0x42c   : > { %2706 = vst.msk [vmem:[%s5669_s12] sm:$0xff] %vm1442_vm4, %v5481_v33 }
 0x42d   : > { %2707 = vst.msk [vmem:[%s5669_s12 + $0x8] sm:$0xff] %vm1442_vm4, %v5490_v46 }
 0x42e   : > { %2708 = vst.msk [vmem:[%s5669_s12 + $0x10] sm:$0xff] %vm1442_vm4, %v5513_v57 }
 0x42f   : > { %2709 = vst.msk [vmem:[%s5669_s12 + $0x18] sm:$0xff] %vm1442_vm4, %v5521_v58 }
 0x430   : > { %2710 = vst.msk [vmem:[%s5669_s12 + $0x20] sm:$0xff] %vm1442_vm4, %v2673_v45 }
 0x431   : > { %2711 = vst.msk [vmem:[%s5669_s12 + $0x28] sm:$0xff] %vm1442_vm4, %v2674_v35 }
 0x432   : > { %2712 = vst.msk [vmem:[%s5669_s12 + $0x30] sm:$0xff] %vm1442_vm4, %v2675_v32 }
 0x433   : > { %2713 = vst.msk [vmem:[%s5669_s12 + $0x38] sm:$0xff] %vm1442_vm4, %v2676_v5 }
 0x434   : > { %2714 = vst.msk [vmem:[%s5669_s12 + $0x40] sm:$0xff] %vm1442_vm4, %v5497_v50 }
 0x435   : > { %2715 = vst.msk [vmem:[%s5669_s12 + $0x48] sm:$0xff] %vm1442_vm4, %v5505_v24 }
 0x436   : > { %2716 = vst.msk [vmem:[%s5669_s12 + $0x50] sm:$0xff] %vm1442_vm4, %v5529_v27 }
 0x437   : > { %2717 = vst.msk [vmem:[%s5669_s12 + $0x58] sm:$0xff] %vm1442_vm4, %v5537_v4 }
 0x438   : > { %2718 = vst.msk [vmem:[%s5669_s12 + $0x60] sm:$0xff] %vm1442_vm4, %v2681_v8 }
 0x439   : > { %2719 = vst.msk [vmem:[%s5669_s12 + $0x68] sm:$0xff] %vm1442_vm4, %v2682_v23 }
 0x43a   : > { %2720 = vst.msk [vmem:[%s5669_s12 + $0x70] sm:$0xff] %vm1442_vm4, %v2683_v43 }
 0x43b   : > { %2721 = vst.msk [vmem:[%s5669_s12 + $0x78] sm:$0xff] %vm1442_vm4, %v2684_v56 }
 0x43c PF: > { %s5729_s26 = sld [smem:[#allocation4_spill]] }
 0x442   : > { %s22_s21 = sadd.s32 1, %s5729_s26  }
 0x443   : > { %p19_p6 = scmp.ge.s32.totalorder %s22_s21, 4  }
 0x445   :  { %21 = sbr.rel (!%p19_p6) target bundleno = 1 (0x1), region = 126 }

</bundles_post_ra>
